<compile_context>
chip_gen: v7x
topology: tpu7x:2x2x1
jax: 0.10.0
libtpu: 0.0.40
codegen_flags: <defaults>
</compile_context>

<pallas_src>
import math
import functools

import jax
import jax.numpy as jnp
from jax.experimental import pallas as pl
from jax.experimental.pallas import tpu as pltpu

LN_EPS = 1e-5


def _layer_norm(z, gamma, beta):
    # Single-pass statistics; clamp variance against catastrophic cancellation.
    mu = jnp.mean(z, axis=-1, keepdims=True)
    var = jnp.maximum(jnp.mean(z * z, axis=-1, keepdims=True) - mu * mu, 0.0)
    return (z - mu) * jax.lax.rsqrt(var + LN_EPS) * gamma + beta


def _encoder_layer_kernel(
    xq_ref,                      # (1, Lq, D) f32  — query rows for this step
    xkv_ref,                     # (1, L,  D) bf16 — full sequence (K/V source)
    wq_ref, bq_ref,              # (D, D) bf16 (pre-scaled), (1, D) f32 (pre-scaled)
    wk_ref, bk_ref,              # (D, D) bf16, (1, D) f32
    wv_ref, bv_ref,              # (D, D) bf16, (1, D) f32
    wo_ref, bo_ref,              # (D, D) bf16, (1, D) f32
    g1_ref, be1_ref,             # (1, D) f32   LayerNorm1 gamma/beta
    w1_ref, b1_ref,              # (D, F) bf16, (1, F) f32   conv1 (1x1)
    w2_ref, b2_ref,              # (F, D) bf16, (1, D) f32   conv2 (1x1)
    g2_ref, be2_ref,             # (1, D) f32   LayerNorm2 gamma/beta
    out_ref,                     # (1, Lq, D) f32
    *rest,                       # [attn_ref (1,H,Lq,L) f32]?, k3_scr, v3_scr
    n_heads: int,
    output_attention: bool,
    bf16_transcendentals: bool,
):
    if output_attention:
        attn_ref, k3_ref, v3_ref = rest
    else:
        k3_ref, v3_ref = rest

    H = n_heads
    L = xkv_ref.shape[1]
    D = xkv_ref.shape[2]
    Dh = D // H

    # ---- K/V projections: ONCE per batch element --------------------------
    # The inner grid axis (q blocks) is "arbitrary" and scratch persists
    # across grid steps, so all q blocks of this batch reuse k3/v3.
    @pl.when(pl.program_id(1) == 0)
    def _project_kv():
        xkv = xkv_ref[0]                                            # (L, D) bf16
        k = jnp.dot(xkv, wk_ref[...], preferred_element_type=jnp.float32) + bk_ref[...]
        v = jnp.dot(xkv, wv_ref[...], preferred_element_type=jnp.float32) + bv_ref[...]
        k3_ref[...] = jnp.transpose(k.reshape(L, H, Dh), (1, 0, 2)).astype(jnp.bfloat16)
        v3_ref[...] = jnp.transpose(v.reshape(L, H, Dh), (1, 0, 2)).astype(jnp.bfloat16)

    xq = xq_ref[0]                                                  # (Lq, D) f32
    Lq = xq.shape[0]

    # ---- Q projection (1/sqrt(Dh) already folded into wq/bq) --------------
    q = jnp.dot(xq.astype(jnp.bfloat16), wq_ref[...],
                preferred_element_type=jnp.float32) + bq_ref[...]
    q3 = jnp.transpose(q.reshape(Lq, H, Dh), (1, 0, 2)).astype(jnp.bfloat16)  # (H,Lq,Dh)

    k3 = k3_ref[...]                                                # (H, L, Dh) bf16
    v3 = v3_ref[...]                                                # (H, L, Dh) bf16

    # ---- head-major attention (batched matmuls, contraction on last axis) -
    s = jnp.einsum("hqd,hkd->hqk", q3, k3,
                   preferred_element_type=jnp.float32)              # (H, Lq, L)
    m = jnp.max(s, axis=-1, keepdims=True)
    p = jnp.exp(s - m)
    denom = jnp.sum(p, axis=-1, keepdims=True)
    if output_attention:
        inv = 1.0 / denom                   # exact: returned rows sum to 1
    else:
        inv = pl.reciprocal(denom, approx=True)   # EUP slot, off the VALU
    a = p * inv
    if output_attention:
        attn_ref[0] = a

    ctx = jnp.einsum("hqk,hkd->hqd", a.astype(jnp.bfloat16), v3,
                     preferred_element_type=jnp.float32)            # (H, Lq, Dh)
    ctx = jnp.transpose(ctx, (1, 0, 2)).reshape(Lq, D)

    new_x = jnp.dot(ctx.astype(jnp.bfloat16), wo_ref[...],
                    preferred_element_type=jnp.float32) + bo_ref[...]

    # ---- residual + LayerNorm1 (dropout == identity in eval mode) ---------
    xn = _layer_norm(xq + new_x, g1_ref[...], be1_ref[...])

    # ---- position-wise FFN: conv1(1x1) -> Swish -> conv2(1x1) --------------
    h1 = jnp.dot(xn.astype(jnp.bfloat16), w1_ref[...],
                 preferred_element_type=jnp.float32) + b1_ref[...]
    if bf16_transcendentals:
        sig = jax.nn.sigmoid(h1.astype(jnp.bfloat16)).astype(jnp.float32)
    else:
        sig = jax.nn.sigmoid(h1)
    h1 = h1 * sig                          # Swish (module's if/elif resolves to Swish)
    y = jnp.dot(h1.astype(jnp.bfloat16), w2_ref[...],
                preferred_element_type=jnp.float32) + b2_ref[...]

    # ---- residual + LayerNorm2 ---------------------------------------------
    out_ref[0] = _layer_norm(xn + y, g2_ref[...], be2_ref[...]).astype(out_ref.dtype)


def _vmem_limit_and_q_cap():
    """Generation-aware scoped-VMEM limit and default query-tile cap."""
    try:
        kind = jax.devices()[0].device_kind.lower()
    except Exception:
        kind = ""
    if "v7" in kind:
        return 48 * 1024 * 1024, 128          # v7x: 64 MiB physical VMEM per TC
    if "v5" in kind or "v6" in kind:
        return 100 * 1024 * 1024, 256         # v5e/v6e: 128 MiB physical VMEM
    return 48 * 1024 * 1024, 128              # unknown / older: stay conservative


def encoder_layer_forward(x, params, n_heads, *, block_q=None,
                          output_attention=True, bf16_transcendentals=True,
                          single_buffer_weights=True):
    """x: (B, L, D). Returns (out (B,L,D) f32, attn (B,H,L,L) f32 or None)."""
    B, L, D = x.shape
    F = params["w1"].shape[1]
    H = n_heads
    assert D % H == 0, "d_model must be divisible by n_heads"
    Dh = D // H

    vmem_limit, q_cap = _vmem_limit_and_q_cap()

    if block_q is None:
        cap = min(L, q_cap)
        block_q = max(d for d in range(1, cap + 1) if L % d == 0)
    assert L % block_q == 0, "block_q must divide L (pad the sequence if needed)"
    nq = L // block_q

    # Fold the 1/sqrt(Dh) attention scale into the Q projection.
    scale = 1.0 / math.sqrt(Dh)
    wq = (params["wq"] * scale).astype(jnp.bfloat16)
    bq = (params["bq"] * scale).astype(jnp.float32)
    bf = lambda name: params[name].astype(jnp.bfloat16)    # MXU-native weights
    f32 = lambda name: params[name].astype(jnp.float32)

    x_f32 = x.astype(jnp.float32)      # query / residual / LayerNorm path
    x_bf16 = x.astype(jnp.bfloat16)    # K/V source: halves the largest DMA

    def _build_and_call(single_buffer):
        if single_buffer:
            # Constant-index weights are fetched once; single-buffer them to
            # reclaim half of their VMEM (key for v7x's 64 MiB).
            wspec = lambda shape: pl.BlockSpec(shape, lambda b, i: (0, 0),
                                               pipeline_mode=pl.Buffered(1))
        else:
            wspec = lambda shape: pl.BlockSpec(shape, lambda b, i: (0, 0))

        in_specs = [
            pl.BlockSpec((1, block_q, D), lambda b, i: (b, i, 0)),   # xq (f32)
            # Full-sequence K/V source: constant index across the inner axis,
            # so Pallas keeps it resident instead of re-fetching per q block.
            pl.BlockSpec((1, L, D), lambda b, i: (b, 0, 0)),         # xkv (bf16)
            wspec((D, D)), wspec((1, D)),                            # wq, bq
            wspec((D, D)), wspec((1, D)),                            # wk, bk
            wspec((D, D)), wspec((1, D)),                            # wv, bv
            wspec((D, D)), wspec((1, D)),                            # wo, bo
            wspec((1, D)), wspec((1, D)),                            # ln1 gamma/beta
            wspec((D, F)), wspec((1, F)),                            # w1, b1
            wspec((F, D)), wspec((1, D)),                            # w2, b2
            wspec((1, D)), wspec((1, D)),                            # ln2 gamma/beta
        ]

        out_spec_x = pl.BlockSpec((1, block_q, D), lambda b, i: (b, i, 0))
        out_shape_x = jax.ShapeDtypeStruct((B, L, D), jnp.float32)
        if output_attention:
            out_specs = (out_spec_x,
                         pl.BlockSpec((1, H, block_q, L), lambda b, i: (b, 0, i, 0)))
            out_shape = (out_shape_x,
                         jax.ShapeDtypeStruct((B, H, L, L), jnp.float32))
        else:
            out_specs = out_spec_x
            out_shape = out_shape_x

        # Persistent bf16 scratch for head-major K/V (written at inner step 0).
        scratch_shapes = [pltpu.VMEM((H, L, Dh), jnp.bfloat16),
                          pltpu.VMEM((H, L, Dh), jnp.bfloat16)]

        # Advisory cost estimate (K/V projections counted once per batch).
        flops = B * (8 * L * D * D + 4 * L * L * D + 4 * L * D * F)
        transcendentals = B * (H * L * L + L * F + 4 * L)
        bytes_accessed = (4 * B * L * D          # xq in (f32)
                          + 2 * B * L * D        # xkv in (bf16)
                          + 4 * B * L * D        # out (f32)
                          + 2 * (4 * D * D + 2 * D * F)   # bf16 weights, single fetch
                          + (4 * B * H * L * L if output_attention else 0))

        kernel = functools.partial(
            _encoder_layer_kernel, n_heads=H,
            output_attention=output_attention,
            bf16_transcendentals=bf16_transcendentals)

        return pl.pallas_call(
            kernel,
            out_shape=out_shape,
            grid_spec=pltpu.PrefetchScalarGridSpec(
                num_scalar_prefetch=0,
                # Keep B outer / q-block inner: weights and xkv keep constant
                # block indices across consecutive steps (no re-DMA).
                grid=(B, nq),
                in_specs=in_specs,
                out_specs=out_specs,
                scratch_shapes=scratch_shapes),
            compiler_params=pltpu.CompilerParams(
                # Inner axis must be sequential: K/V scratch is filled at i==0.
                dimension_semantics=("parallel", "arbitrary"),
                vmem_limit_bytes=vmem_limit),
            cost_estimate=pl.CostEstimate(
                flops=flops,
                transcendentals=transcendentals,
                bytes_accessed=bytes_accessed),
        )(
            x_f32, x_bf16,
            wq, bq, bf("wk"), f32("bk"),
            bf("wv"), f32("bv"), bf("wo"), f32("bo"),
            f32("g1"), f32("be1"),
            bf("w1"), f32("b1"), bf("w2"), f32("b2"),
            f32("g2"), f32("be2"),
        )

    if single_buffer_weights:
        try:
            result = _build_and_call(True)
        except Exception:
            # TODO(synk): pl.Buffered(1) not accepted by this jax build; fall
            # back to default double-buffered weights (costs VMEM only).
            result = _build_and_call(False)
    else:
        result = _build_and_call(False)

    if output_attention:
        return result
    return result, None


def _reference(x, p, n_heads):
    """Plain-JAX f32 reference of the same forward (for correctness check)."""
    B, L, D = x.shape
    H = n_heads
    Dh = D // H
    q = x @ p["wq"] + p["bq"]
    k = x @ p["wk"] + p["bk"]
    v = x @ p["wv"] + p["bv"]
    qh = q.reshape(B, L, H, Dh).transpose(0, 2, 1, 3)
    kh = k.reshape(B, L, H, Dh).transpose(0, 2, 1, 3)
    vh = v.reshape(B, L, H, Dh).transpose(0, 2, 1, 3)
    s = jnp.einsum("bhld,bhsd->bhls", qh, kh) / math.sqrt(Dh)
    a = jax.nn.softmax(s, axis=-1)
    ctx = jnp.einsum("bhls,bhsd->bhld", a, vh).transpose(0, 2, 1, 3).reshape(B, L, D)
    new_x = ctx @ p["wo"] + p["bo"]

    def ln(z, g, b):
        mu = jnp.mean(z, axis=-1, keepdims=True)
        var = jnp.mean((z - mu) ** 2, axis=-1, keepdims=True)
        return (z - mu) / jnp.sqrt(var + LN_EPS) * g + b

    x1 = ln(x + new_x, p["g1"], p["be1"])
    h1 = x1 @ p["w1"] + p["b1"]
    h1 = h1 * jax.nn.sigmoid(h1)
    y = h1 @ p["w2"] + p["b2"]
    return ln(x1 + y, p["g2"], p["be2"]), a


if __name__ == "__main__":
    B, L, D, H = 2, 16, 32, 4
    F = 4 * D  # d_ff

    key = jax.random.PRNGKey(0)
    keys = jax.random.split(key, 13)
    sc = 0.1
    params = {
        "wq": sc * jax.random.normal(keys[0], (D, D), jnp.float32),
        "bq": sc * jax.random.normal(keys[1], (1, D), jnp.float32),
        "wk": sc * jax.random.normal(keys[2], (D, D), jnp.float32),
        "bk": sc * jax.random.normal(keys[3], (1, D), jnp.float32),
        "wv": sc * jax.random.normal(keys[4], (D, D), jnp.float32),
        "bv": sc * jax.random.normal(keys[5], (1, D), jnp.float32),
        "wo": sc * jax.random.normal(keys[6], (D, D), jnp.float32),
        "bo": sc * jax.random.normal(keys[7], (1, D), jnp.float32),
        "g1": jnp.ones((1, D), jnp.float32),
        "be1": jnp.zeros((1, D), jnp.float32),
        # conv1: PyTorch weight (F, D, 1) -> stored transposed (D, F) for x @ W
        "w1": sc * jax.random.normal(keys[8], (D, F), jnp.float32),
        "b1": sc * jax.random.normal(keys[9], (1, F), jnp.float32),
        # conv2: PyTorch weight (D, F, 1) -> stored transposed (F, D)
        "w2": sc * jax.random.normal(keys[10], (F, D), jnp.float32),
        "b2": sc * jax.random.normal(keys[11], (1, D), jnp.float32),
        "g2": jnp.ones((1, D), jnp.float32),
        "be2": jnp.zeros((1, D), jnp.float32),
    }

    x = jax.random.normal(keys[12], (B, L, D), jnp.float32)

    # Full path (attention weights returned); block_q=8 -> nq=2 exercises the
    # once-per-batch K/V projection + scratch-reuse path.
    out, attn = jax.block_until_ready(
        encoder_layer_forward(x, params, H, block_q=8, output_attention=True))
    ref_out, ref_attn = _reference(x, params, H)

    assert out.shape == (B, L, D) and attn.shape == (B, H, L, L)
    # bf16 MXU matmuls + bf16 sigmoid loosen tolerance vs the f32 reference.
    assert jnp.allclose(out, ref_out, atol=5e-2, rtol=5e-2), \
        float(jnp.max(jnp.abs(out - ref_out)))
    assert jnp.allclose(attn, ref_attn, atol=3e-2, rtol=3e-2), \
        float(jnp.max(jnp.abs(attn - ref_attn)))

    # Fast path (no H*L^2 attention writeback; approx reciprocal in softmax).
    out2, attn2 = jax.block_until_ready(
        encoder_layer_forward(x, params, H, block_q=8, output_attention=False))
    assert attn2 is None
    assert jnp.allclose(out2, ref_out, atol=5e-2, rtol=5e-2), \
        float(jnp.max(jnp.abs(out2 - ref_out)))

    print("KERNEL_OK")
</pallas_src>

<mosaic_0001>
module attributes {stable_mosaic.version = 11 : i64} {
  func.func @_encoder_layer_kernel(%arg0: i32, %arg1: i32, %arg2: memref<1x8x32xf32, #tpu.memory_space<vmem>>, %arg3: memref<1x16x32xbf16, #tpu.memory_space<vmem>>, %arg4: memref<32x32xbf16, #tpu.memory_space<vmem>>, %arg5: memref<1x32xf32, #tpu.memory_space<vmem>>, %arg6: memref<32x32xbf16, #tpu.memory_space<vmem>>, %arg7: memref<1x32xf32, #tpu.memory_space<vmem>>, %arg8: memref<32x32xbf16, #tpu.memory_space<vmem>>, %arg9: memref<1x32xf32, #tpu.memory_space<vmem>>, %arg10: memref<32x32xbf16, #tpu.memory_space<vmem>>, %arg11: memref<1x32xf32, #tpu.memory_space<vmem>>, %arg12: memref<1x32xf32, #tpu.memory_space<vmem>>, %arg13: memref<1x32xf32, #tpu.memory_space<vmem>>, %arg14: memref<32x128xbf16, #tpu.memory_space<vmem>>, %arg15: memref<1x128xf32, #tpu.memory_space<vmem>>, %arg16: memref<128x32xbf16, #tpu.memory_space<vmem>>, %arg17: memref<1x32xf32, #tpu.memory_space<vmem>>, %arg18: memref<1x32xf32, #tpu.memory_space<vmem>>, %arg19: memref<1x32xf32, #tpu.memory_space<vmem>>, %arg20: memref<1x8x32xf32, #tpu.memory_space<vmem>>, %arg21: memref<1x4x8x16xf32, #tpu.memory_space<vmem>>, %arg22: memref<4x16x8xbf16, #tpu.memory_space<vmem>>, %arg23: memref<4x16x8xbf16, #tpu.memory_space<vmem>>) attributes {dimension_semantics = [#tpu.dimension_semantics<parallel>, #tpu.dimension_semantics<arbitrary>], iteration_bounds = array<i64: 2, 2>, scalar_prefetch = 0 : i64, scratch_operands = 2 : i64, tpu.core_type = #tpu.core_type<tc>, window_params = [{transform_indices = @transform_0, window_bounds = array<i64: 1, 8, 32>}, {transform_indices = @transform_1, window_bounds = array<i64: 1, 16, 32>}, {pipeline_mode = #tpu.pipeline_mode<synchronous>, transform_indices = @transform_2, window_bounds = array<i64: 32, 32>}, {pipeline_mode = #tpu.pipeline_mode<synchronous>, transform_indices = @transform_3, window_bounds = array<i64: 1, 32>}, {pipeline_mode = #tpu.pipeline_mode<synchronous>, transform_indices = @transform_4, window_bounds = array<i64: 32, 32>}, {pipeline_mode = #tpu.pipeline_mode<synchronous>, transform_indices = @transform_5, window_bounds = array<i64: 1, 32>}, {pipeline_mode = #tpu.pipeline_mode<synchronous>, transform_indices = @transform_6, window_bounds = array<i64: 32, 32>}, {pipeline_mode = #tpu.pipeline_mode<synchronous>, transform_indices = @transform_7, window_bounds = array<i64: 1, 32>}, {pipeline_mode = #tpu.pipeline_mode<synchronous>, transform_indices = @transform_8, window_bounds = array<i64: 32, 32>}, {pipeline_mode = #tpu.pipeline_mode<synchronous>, transform_indices = @transform_9, window_bounds = array<i64: 1, 32>}, {pipeline_mode = #tpu.pipeline_mode<synchronous>, transform_indices = @transform_10, window_bounds = array<i64: 1, 32>}, {pipeline_mode = #tpu.pipeline_mode<synchronous>, transform_indices = @transform_11, window_bounds = array<i64: 1, 32>}, {pipeline_mode = #tpu.pipeline_mode<synchronous>, transform_indices = @transform_12, window_bounds = array<i64: 32, 128>}, {pipeline_mode = #tpu.pipeline_mode<synchronous>, transform_indices = @transform_13, window_bounds = array<i64: 1, 128>}, {pipeline_mode = #tpu.pipeline_mode<synchronous>, transform_indices = @transform_14, window_bounds = array<i64: 128, 32>}, {pipeline_mode = #tpu.pipeline_mode<synchronous>, transform_indices = @transform_15, window_bounds = array<i64: 1, 32>}, {pipeline_mode = #tpu.pipeline_mode<synchronous>, transform_indices = @transform_16, window_bounds = array<i64: 1, 32>}, {pipeline_mode = #tpu.pipeline_mode<synchronous>, transform_indices = @transform_17, window_bounds = array<i64: 1, 32>}, {transform_indices = @transform_18, window_bounds = array<i64: 1, 8, 32>}, {transform_indices = @transform_19, window_bounds = array<i64: 1, 4, 8, 16>}]} {
    %c0_i32 = arith.constant 0 : i32
    %0 = arith.cmpi eq, %arg1, %c0_i32 : i32
    %1 = arith.extui %0 : i1 to i32
    %c0_i32_0 = arith.constant 0 : i32
    %2 = arith.cmpi ne, %1, %c0_i32_0 : i32
    scf.if %2 {
      %c0_61 = arith.constant 0 : index
      %c0_62 = arith.constant 0 : index
      %c0_63 = arith.constant 0 : index
      %118 = vector.load %arg3[%c0_61, %c0_62, %c0_63] : memref<1x16x32xbf16, #tpu.memory_space<vmem>>, vector<1x16x32xbf16>
      %119 = vector.shape_cast %118 : vector<1x16x32xbf16> to vector<16x32xbf16>
      %c0_64 = arith.constant 0 : index
      %c0_65 = arith.constant 0 : index
      %120 = vector.load %arg6[%c0_64, %c0_65] : memref<32x32xbf16, #tpu.memory_space<vmem>>, vector<32x32xbf16>
      %cst_66 = arith.constant dense<0.000000e+00> : vector<16x32xf32>
      %121 = tpu.matmul %119, %120, %cst_66 {dimension_numbers = #tpu.dot_dimension_numbers<[1], [0], [0], [1], [0, 0, 1, 1], [], []>} : vector<16x32xbf16>, vector<32x32xbf16>, vector<16x32xf32> -> vector<16x32xf32>
      %c0_67 = arith.constant 0 : index
      %c0_68 = arith.constant 0 : index
      %122 = vector.load %arg7[%c0_67, %c0_68] : memref<1x32xf32, #tpu.memory_space<vmem>>, vector<1x32xf32>
      %123 = vector.broadcast %122 : vector<1x32xf32> to vector<16x32xf32>
      %124 = arith.addf %121, %123 : vector<16x32xf32>
      %c0_69 = arith.constant 0 : index
      %c0_70 = arith.constant 0 : index
      %125 = vector.load %arg8[%c0_69, %c0_70] : memref<32x32xbf16, #tpu.memory_space<vmem>>, vector<32x32xbf16>
      %cst_71 = arith.constant dense<0.000000e+00> : vector<16x32xf32>
      %126 = tpu.matmul %119, %125, %cst_71 {dimension_numbers = #tpu.dot_dimension_numbers<[1], [0], [0], [1], [0, 0, 1, 1], [], []>} : vector<16x32xbf16>, vector<32x32xbf16>, vector<16x32xf32> -> vector<16x32xf32>
      %c0_72 = arith.constant 0 : index
      %c0_73 = arith.constant 0 : index
      %127 = vector.load %arg9[%c0_72, %c0_73] : memref<1x32xf32, #tpu.memory_space<vmem>>, vector<1x32xf32>
      %128 = vector.broadcast %127 : vector<1x32xf32> to vector<16x32xf32>
      %129 = arith.addf %126, %128 : vector<16x32xf32>
      %130 = vector.shape_cast %124 : vector<16x32xf32> to vector<16x4x8xf32>
      %131 = tpu.transpose %130, [1, 0, 2] : vector<16x4x8xf32> -> vector<4x16x8xf32>
      %132 = arith.truncf %131 : vector<4x16x8xf32> to vector<4x16x8xbf16>
      %c0_74 = arith.constant 0 : index
      %c0_75 = arith.constant 0 : index
      %c0_76 = arith.constant 0 : index
      %133 = vector.load %arg22[%c0_74, %c0_75, %c0_76] : memref<4x16x8xbf16, #tpu.memory_space<vmem>>, vector<4x16x8xbf16>
      tpu.vector_store %arg22[%c0_74, %c0_75, %c0_76], %132 {strides = array<i32>} : memref<4x16x8xbf16, #tpu.memory_space<vmem>>, vector<4x16x8xbf16>,
      %134 = vector.shape_cast %129 : vector<16x32xf32> to vector<16x4x8xf32>
      %135 = tpu.transpose %134, [1, 0, 2] : vector<16x4x8xf32> -> vector<4x16x8xf32>
      %136 = arith.truncf %135 : vector<4x16x8xf32> to vector<4x16x8xbf16>
      %c0_77 = arith.constant 0 : index
      %c0_78 = arith.constant 0 : index
      %c0_79 = arith.constant 0 : index
      %137 = vector.load %arg23[%c0_77, %c0_78, %c0_79] : memref<4x16x8xbf16, #tpu.memory_space<vmem>>, vector<4x16x8xbf16>
      tpu.vector_store %arg23[%c0_77, %c0_78, %c0_79], %136 {strides = array<i32>} : memref<4x16x8xbf16, #tpu.memory_space<vmem>>, vector<4x16x8xbf16>,
    } else {
    }
    %c0 = arith.constant 0 : index
    %c0_1 = arith.constant 0 : index
    %c0_2 = arith.constant 0 : index
    %3 = vector.load %arg2[%c0, %c0_1, %c0_2] : memref<1x8x32xf32, #tpu.memory_space<vmem>>, vector<1x8x32xf32>
    %4 = vector.shape_cast %3 : vector<1x8x32xf32> to vector<8x32xf32>
    %5 = arith.truncf %4 : vector<8x32xf32> to vector<8x32xbf16>
    %c0_3 = arith.constant 0 : index
    %c0_4 = arith.constant 0 : index
    %6 = vector.load %arg4[%c0_3, %c0_4] : memref<32x32xbf16, #tpu.memory_space<vmem>>, vector<32x32xbf16>
    %cst = arith.constant dense<0.000000e+00> : vector<8x32xf32>
    %7 = tpu.matmul %5, %6, %cst {dimension_numbers = #tpu.dot_dimension_numbers<[1], [0], [0], [1], [0, 0, 1, 1], [], []>} : vector<8x32xbf16>, vector<32x32xbf16>, vector<8x32xf32> -> vector<8x32xf32>
    %c0_5 = arith.constant 0 : index
    %c0_6 = arith.constant 0 : index
    %8 = vector.load %arg5[%c0_5, %c0_6] : memref<1x32xf32, #tpu.memory_space<vmem>>, vector<1x32xf32>
    %9 = vector.broadcast %8 : vector<1x32xf32> to vector<8x32xf32>
    %10 = arith.addf %7, %9 : vector<8x32xf32>
    %11 = vector.shape_cast %10 : vector<8x32xf32> to vector<8x4x8xf32>
    %12 = tpu.transpose %11, [1, 0, 2] : vector<8x4x8xf32> -> vector<4x8x8xf32>
    %13 = arith.truncf %12 : vector<4x8x8xf32> to vector<4x8x8xbf16>
    %c0_7 = arith.constant 0 : index
    %c0_8 = arith.constant 0 : index
    %c0_9 = arith.constant 0 : index
    %14 = vector.load %arg22[%c0_7, %c0_8, %c0_9] : memref<4x16x8xbf16, #tpu.memory_space<vmem>>, vector<4x16x8xbf16>
    %c0_10 = arith.constant 0 : index
    %c0_11 = arith.constant 0 : index
    %c0_12 = arith.constant 0 : index
    %15 = vector.load %arg23[%c0_10, %c0_11, %c0_12] : memref<4x16x8xbf16, #tpu.memory_space<vmem>>, vector<4x16x8xbf16>
    "tpu.trace_start"() <{level = 10 : i32, message = "hqd,hkd->hqk"}> : () -> ()
    %cst_13 = arith.constant dense<0.000000e+00> : vector<4x8x16xf32>
    %16 = tpu.matmul %13, %14, %cst_13 {dimension_numbers = #tpu.dot_dimension_numbers<[2], [2], [1], [1], [0, 0, 0, 1, 1, 1], [0], [0]>} : vector<4x8x8xbf16>, vector<4x16x8xbf16>, vector<4x8x16xf32> -> vector<4x8x16xf32>
    "tpu.trace_stop"() : () -> ()
    %cst_14 = arith.constant dense<0xFF800000> : vector<4x8xf32>
    %17 = vector.multi_reduction <maximumf>, %16, %cst_14 [2] : vector<4x8x16xf32> to vector<4x8xf32>
    %18 = vector.shape_cast %17 : vector<4x8xf32> to vector<4x8x1xf32>
    %19 = vector.broadcast %18 : vector<4x8x1xf32> to vector<4x8x16xf32>
    %20 = arith.subf %16, %19 : vector<4x8x16xf32>
    %21 = math.exp %20 : vector<4x8x16xf32>
    %cst_15 = arith.constant dense<0.000000e+00> : vector<4x8xf32>
    %22 = vector.multi_reduction <add>, %21, %cst_15 [2] : vector<4x8x16xf32> to vector<4x8xf32>
    %23 = vector.shape_cast %22 : vector<4x8xf32> to vector<4x8x1xf32>
    %cst_16 = arith.constant 1.000000e+00 : f32
    %24 = vector.broadcast %cst_16 : f32 to vector<4x8x1xf32>
    %25 = arith.divf %24, %23 : vector<4x8x1xf32>
    %26 = vector.broadcast %25 : vector<4x8x1xf32> to vector<4x8x16xf32>
    %27 = arith.mulf %21, %26 : vector<4x8x16xf32>
    %c0_17 = arith.constant 0 : index
    %c0_18 = arith.constant 0 : index
    %c0_19 = arith.constant 0 : index
    %c0_20 = arith.constant 0 : index
    %28 = vector.load %arg21[%c0_17, %c0_18, %c0_19, %c0_20] : memref<1x4x8x16xf32, #tpu.memory_space<vmem>>, vector<1x4x8x16xf32>
    %29 = vector.shape_cast %28 : vector<1x4x8x16xf32> to vector<4x8x16xf32>
    %30 = vector.shape_cast %27 : vector<4x8x16xf32> to vector<1x4x8x16xf32>
    tpu.vector_store %arg21[%c0_17, %c0_18, %c0_19, %c0_20], %30 {strides = array<i32>} : memref<1x4x8x16xf32, #tpu.memory_space<vmem>>, vector<1x4x8x16xf32>,
    %31 = arith.truncf %27 : vector<4x8x16xf32> to vector<4x8x16xbf16>
    "tpu.trace_start"() <{level = 10 : i32, message = "hqk,hkd->hqd"}> : () -> ()
    %cst_21 = arith.constant dense<0.000000e+00> : vector<4x8x8xf32>
    %32 = tpu.matmul %31, %15, %cst_21 {dimension_numbers = #tpu.dot_dimension_numbers<[2], [1], [1], [2], [0, 0, 0, 1, 1, 2], [0], [0]>} : vector<4x8x16xbf16>, vector<4x16x8xbf16>, vector<4x8x8xf32> -> vector<4x8x8xf32>
    "tpu.trace_stop"() : () -> ()
    %33 = tpu.transpose %32, [1, 0, 2] : vector<4x8x8xf32> -> vector<8x4x8xf32>
    %34 = vector.shape_cast %33 : vector<8x4x8xf32> to vector<8x32xf32>
    %35 = arith.truncf %34 : vector<8x32xf32> to vector<8x32xbf16>
    %c0_22 = arith.constant 0 : index
    %c0_23 = arith.constant 0 : index
    %36 = vector.load %arg10[%c0_22, %c0_23] : memref<32x32xbf16, #tpu.memory_space<vmem>>, vector<32x32xbf16>
    %cst_24 = arith.constant dense<0.000000e+00> : vector<8x32xf32>
    %37 = tpu.matmul %35, %36, %cst_24 {dimension_numbers = #tpu.dot_dimension_numbers<[1], [0], [0], [1], [0, 0, 1, 1], [], []>} : vector<8x32xbf16>, vector<32x32xbf16>, vector<8x32xf32> -> vector<8x32xf32>
    %c0_25 = arith.constant 0 : index
    %c0_26 = arith.constant 0 : index
    %38 = vector.load %arg11[%c0_25, %c0_26] : memref<1x32xf32, #tpu.memory_space<vmem>>, vector<1x32xf32>
    %39 = vector.broadcast %38 : vector<1x32xf32> to vector<8x32xf32>
    %40 = arith.addf %37, %39 : vector<8x32xf32>
    %41 = arith.addf %4, %40 : vector<8x32xf32>
    %c0_27 = arith.constant 0 : index
    %c0_28 = arith.constant 0 : index
    %42 = vector.load %arg12[%c0_27, %c0_28] : memref<1x32xf32, #tpu.memory_space<vmem>>, vector<1x32xf32>
    %c0_29 = arith.constant 0 : index
    %c0_30 = arith.constant 0 : index
    %43 = vector.load %arg13[%c0_29, %c0_30] : memref<1x32xf32, #tpu.memory_space<vmem>>, vector<1x32xf32>
    %cst_31 = arith.constant dense<0.000000e+00> : vector<8xf32>
    %44 = vector.multi_reduction <add>, %41, %cst_31 [1] : vector<8x32xf32> to vector<8xf32>
    %45 = vector.shape_cast %44 : vector<8xf32> to vector<8x1xf32>
    %cst_32 = arith.constant 3.200000e+01 : f32
    %46 = vector.broadcast %cst_32 : f32 to vector<8x1xf32>
    %47 = arith.divf %45, %46 : vector<8x1xf32>
    %48 = arith.mulf %41, %41 : vector<8x32xf32>
    %cst_33 = arith.constant dense<0.000000e+00> : vector<8xf32>
    %49 = vector.multi_reduction <add>, %48, %cst_33 [1] : vector<8x32xf32> to vector<8xf32>
    %50 = vector.shape_cast %49 : vector<8xf32> to vector<8x1xf32>
    %cst_34 = arith.constant 3.200000e+01 : f32
    %51 = vector.broadcast %cst_34 : f32 to vector<8x1xf32>
    %52 = arith.divf %50, %51 : vector<8x1xf32>
    %53 = arith.mulf %47, %47 : vector<8x1xf32>
    %54 = arith.subf %52, %53 : vector<8x1xf32>
    %cst_35 = arith.constant 0.000000e+00 : f32
    %55 = vector.broadcast %cst_35 : f32 to vector<8x1xf32>
    %56 = arith.maximumf %54, %55 : vector<8x1xf32>
    %57 = vector.broadcast %47 : vector<8x1xf32> to vector<8x32xf32>
    %58 = arith.subf %41, %57 : vector<8x32xf32>
    %cst_36 = arith.constant 9.99999974E-6 : f32
    %59 = vector.broadcast %cst_36 : f32 to vector<8x1xf32>
    %60 = arith.addf %56, %59 : vector<8x1xf32>
    %61 = math.rsqrt %60 : vector<8x1xf32>
    %62 = vector.broadcast %61 : vector<8x1xf32> to vector<8x32xf32>
    %63 = arith.mulf %58, %62 : vector<8x32xf32>
    %64 = vector.broadcast %42 : vector<1x32xf32> to vector<8x32xf32>
    %65 = arith.mulf %63, %64 : vector<8x32xf32>
    %66 = vector.broadcast %43 : vector<1x32xf32> to vector<8x32xf32>
    %67 = arith.addf %65, %66 : vector<8x32xf32>
    %68 = arith.truncf %67 : vector<8x32xf32> to vector<8x32xbf16>
    %c0_37 = arith.constant 0 : index
    %c0_38 = arith.constant 0 : index
    %69 = vector.load %arg14[%c0_37, %c0_38] : memref<32x128xbf16, #tpu.memory_space<vmem>>, vector<32x128xbf16>
    %cst_39 = arith.constant dense<0.000000e+00> : vector<8x128xf32>
    %70 = tpu.matmul %68, %69, %cst_39 {dimension_numbers = #tpu.dot_dimension_numbers<[1], [0], [0], [1], [0, 0, 1, 1], [], []>} : vector<8x32xbf16>, vector<32x128xbf16>, vector<8x128xf32> -> vector<8x128xf32>
    %c0_40 = arith.constant 0 : index
    %c0_41 = arith.constant 0 : index
    %71 = vector.load %arg15[%c0_40, %c0_41] : memref<1x128xf32, #tpu.memory_space<vmem>>, vector<1x128xf32>
    %72 = vector.broadcast %71 : vector<1x128xf32> to vector<8x128xf32>
    %73 = arith.addf %70, %72 : vector<8x128xf32>
    %74 = arith.truncf %73 : vector<8x128xf32> to vector<8x128xbf16>
    %75 = arith.negf %74 : vector<8x128xbf16>
    %76 = math.exp %75 : vector<8x128xbf16>
    %cst_42 = arith.constant 1.000000e+00 : bf16
    %77 = vector.broadcast %cst_42 : bf16 to vector<8x128xbf16>
    %78 = arith.addf %77, %76 : vector<8x128xbf16>
    %79 = arith.divf %77, %78 : vector<8x128xbf16>
    %80 = arith.extf %79 : vector<8x128xbf16> to vector<8x128xf32>
    %81 = arith.mulf %73, %80 : vector<8x128xf32>
    %82 = arith.truncf %81 : vector<8x128xf32> to vector<8x128xbf16>
    %c0_43 = arith.constant 0 : index
    %c0_44 = arith.constant 0 : index
    %83 = vector.load %arg16[%c0_43, %c0_44] : memref<128x32xbf16, #tpu.memory_space<vmem>>, vector<128x32xbf16>
    %cst_45 = arith.constant dense<0.000000e+00> : vector<8x32xf32>
    %84 = tpu.matmul %82, %83, %cst_45 {dimension_numbers = #tpu.dot_dimension_numbers<[1], [0], [0], [1], [0, 0, 1, 1], [], []>} : vector<8x128xbf16>, vector<128x32xbf16>, vector<8x32xf32> -> vector<8x32xf32>
    %c0_46 = arith.constant 0 : index
    %c0_47 = arith.constant 0 : index
    %85 = vector.load %arg17[%c0_46, %c0_47] : memref<1x32xf32, #tpu.memory_space<vmem>>, vector<1x32xf32>
    %86 = vector.broadcast %85 : vector<1x32xf32> to vector<8x32xf32>
    %87 = arith.addf %84, %86 : vector<8x32xf32>
    %88 = arith.addf %67, %87 : vector<8x32xf32>
    %c0_48 = arith.constant 0 : index
    %c0_49 = arith.constant 0 : index
    %89 = vector.load %arg18[%c0_48, %c0_49] : memref<1x32xf32, #tpu.memory_space<vmem>>, vector<1x32xf32>
    %c0_50 = arith.constant 0 : index
    %c0_51 = arith.constant 0 : index
    %90 = vector.load %arg19[%c0_50, %c0_51] : memref<1x32xf32, #tpu.memory_space<vmem>>, vector<1x32xf32>
    %cst_52 = arith.constant dense<0.000000e+00> : vector<8xf32>
    %91 = vector.multi_reduction <add>, %88, %cst_52 [1] : vector<8x32xf32> to vector<8xf32>
    %92 = vector.shape_cast %91 : vector<8xf32> to vector<8x1xf32>
    %cst_53 = arith.constant 3.200000e+01 : f32
    %93 = vector.broadcast %cst_53 : f32 to vector<8x1xf32>
    %94 = arith.divf %92, %93 : vector<8x1xf32>
    %95 = arith.mulf %88, %88 : vector<8x32xf32>
    %cst_54 = arith.constant dense<0.000000e+00> : vector<8xf32>
    %96 = vector.multi_reduction <add>, %95, %cst_54 [1] : vector<8x32xf32> to vector<8xf32>
    %97 = vector.shape_cast %96 : vector<8xf32> to vector<8x1xf32>
    %cst_55 = arith.constant 3.200000e+01 : f32
    %98 = vector.broadcast %cst_55 : f32 to vector<8x1xf32>
    %99 = arith.divf %97, %98 : vector<8x1xf32>
    %100 = arith.mulf %94, %94 : vector<8x1xf32>
    %101 = arith.subf %99, %100 : vector<8x1xf32>
    %cst_56 = arith.constant 0.000000e+00 : f32
    %102 = vector.broadcast %cst_56 : f32 to vector<8x1xf32>
    %103 = arith.maximumf %101, %102 : vector<8x1xf32>
    %104 = vector.broadcast %94 : vector<8x1xf32> to vector<8x32xf32>
    %105 = arith.subf %88, %104 : vector<8x32xf32>
    %cst_57 = arith.constant 9.99999974E-6 : f32
    %106 = vector.broadcast %cst_57 : f32 to vector<8x1xf32>
    %107 = arith.addf %103, %106 : vector<8x1xf32>
    %108 = math.rsqrt %107 : vector<8x1xf32>
    %109 = vector.broadcast %108 : vector<8x1xf32> to vector<8x32xf32>
    %110 = arith.mulf %105, %109 : vector<8x32xf32>
    %111 = vector.broadcast %89 : vector<1x32xf32> to vector<8x32xf32>
    %112 = arith.mulf %110, %111 : vector<8x32xf32>
    %113 = vector.broadcast %90 : vector<1x32xf32> to vector<8x32xf32>
    %114 = arith.addf %112, %113 : vector<8x32xf32>
    %c0_58 = arith.constant 0 : index
    %c0_59 = arith.constant 0 : index
    %c0_60 = arith.constant 0 : index
    %115 = vector.load %arg20[%c0_58, %c0_59, %c0_60] : memref<1x8x32xf32, #tpu.memory_space<vmem>>, vector<1x8x32xf32>
    %116 = vector.shape_cast %115 : vector<1x8x32xf32> to vector<8x32xf32>
    %117 = vector.shape_cast %114 : vector<8x32xf32> to vector<1x8x32xf32>
    tpu.vector_store %arg20[%c0_58, %c0_59, %c0_60], %117 {strides = array<i32>} : memref<1x8x32xf32, #tpu.memory_space<vmem>>, vector<1x8x32xf32>,
    return
  }
  func.func @transform_0(%arg0: i32, %arg1: i32) -> (i32, i32, i32) {
    %c0_i32 = arith.constant 0 : i32
    %c0_i32_0 = arith.constant 0 : i32
    return %arg0, %arg1, %c0_i32 : i32, i32, i32
  }
  func.func @transform_1(%arg0: i32, %arg1: i32) -> (i32, i32, i32) {
    %c0_i32 = arith.constant 0 : i32
    %c0_i32_0 = arith.constant 0 : i32
    %c0_i32_1 = arith.constant 0 : i32
    return %arg0, %c0_i32, %c0_i32_0 : i32, i32, i32
  }
  func.func @transform_2(%arg0: i32, %arg1: i32) -> (i32, i32) {
    %c0_i32 = arith.constant 0 : i32
    %c0_i32_0 = arith.constant 0 : i32
    %c0_i32_1 = arith.constant 0 : i32
    return %c0_i32, %c0_i32_0 : i32, i32
  }
  func.func @transform_3(%arg0: i32, %arg1: i32) -> (i32, i32) {
    %c0_i32 = arith.constant 0 : i32
    %c0_i32_0 = arith.constant 0 : i32
    %c0_i32_1 = arith.constant 0 : i32
    return %c0_i32, %c0_i32_0 : i32, i32
  }
  func.func @transform_4(%arg0: i32, %arg1: i32) -> (i32, i32) {
    %c0_i32 = arith.constant 0 : i32
    %c0_i32_0 = arith.constant 0 : i32
    %c0_i32_1 = arith.constant 0 : i32
    return %c0_i32, %c0_i32_0 : i32, i32
  }
  func.func @transform_5(%arg0: i32, %arg1: i32) -> (i32, i32) {
    %c0_i32 = arith.constant 0 : i32
    %c0_i32_0 = arith.constant 0 : i32
    %c0_i32_1 = arith.constant 0 : i32
    return %c0_i32, %c0_i32_0 : i32, i32
  }
  func.func @transform_6(%arg0: i32, %arg1: i32) -> (i32, i32) {
    %c0_i32 = arith.constant 0 : i32
    %c0_i32_0 = arith.constant 0 : i32
    %c0_i32_1 = arith.constant 0 : i32
    return %c0_i32, %c0_i32_0 : i32, i32
  }
  func.func @transform_7(%arg0: i32, %arg1: i32) -> (i32, i32) {
    %c0_i32 = arith.constant 0 : i32
    %c0_i32_0 = arith.constant 0 : i32
    %c0_i32_1 = arith.constant 0 : i32
    return %c0_i32, %c0_i32_0 : i32, i32
  }
  func.func @transform_8(%arg0: i32, %arg1: i32) -> (i32, i32) {
    %c0_i32 = arith.constant 0 : i32
    %c0_i32_0 = arith.constant 0 : i32
    %c0_i32_1 = arith.constant 0 : i32
    return %c0_i32, %c0_i32_0 : i32, i32
  }
  func.func @transform_9(%arg0: i32, %arg1: i32) -> (i32, i32) {
    %c0_i32 = arith.constant 0 : i32
    %c0_i32_0 = arith.constant 0 : i32
    %c0_i32_1 = arith.constant 0 : i32
    return %c0_i32, %c0_i32_0 : i32, i32
  }
  func.func @transform_10(%arg0: i32, %arg1: i32) -> (i32, i32) {
    %c0_i32 = arith.constant 0 : i32
    %c0_i32_0 = arith.constant 0 : i32
    %c0_i32_1 = arith.constant 0 : i32
    return %c0_i32, %c0_i32_0 : i32, i32
  }
  func.func @transform_11(%arg0: i32, %arg1: i32) -> (i32, i32) {
    %c0_i32 = arith.constant 0 : i32
    %c0_i32_0 = arith.constant 0 : i32
    %c0_i32_1 = arith.constant 0 : i32
    return %c0_i32, %c0_i32_0 : i32, i32
  }
  func.func @transform_12(%arg0: i32, %arg1: i32) -> (i32, i32) {
    %c0_i32 = arith.constant 0 : i32
    %c0_i32_0 = arith.constant 0 : i32
    %c0_i32_1 = arith.constant 0 : i32
    return %c0_i32, %c0_i32_0 : i32, i32
  }
  func.func @transform_13(%arg0: i32, %arg1: i32) -> (i32, i32) {
    %c0_i32 = arith.constant 0 : i32
    %c0_i32_0 = arith.constant 0 : i32
    %c0_i32_1 = arith.constant 0 : i32
    return %c0_i32, %c0_i32_0 : i32, i32
  }
  func.func @transform_14(%arg0: i32, %arg1: i32) -> (i32, i32) {
    %c0_i32 = arith.constant 0 : i32
    %c0_i32_0 = arith.constant 0 : i32
    %c0_i32_1 = arith.constant 0 : i32
    return %c0_i32, %c0_i32_0 : i32, i32
  }
  func.func @transform_15(%arg0: i32, %arg1: i32) -> (i32, i32) {
    %c0_i32 = arith.constant 0 : i32
    %c0_i32_0 = arith.constant 0 : i32
    %c0_i32_1 = arith.constant 0 : i32
    return %c0_i32, %c0_i32_0 : i32, i32
  }
  func.func @transform_16(%arg0: i32, %arg1: i32) -> (i32, i32) {
    %c0_i32 = arith.constant 0 : i32
    %c0_i32_0 = arith.constant 0 : i32
    %c0_i32_1 = arith.constant 0 : i32
    return %c0_i32, %c0_i32_0 : i32, i32
  }
  func.func @transform_17(%arg0: i32, %arg1: i32) -> (i32, i32) {
    %c0_i32 = arith.constant 0 : i32
    %c0_i32_0 = arith.constant 0 : i32
    %c0_i32_1 = arith.constant 0 : i32
    return %c0_i32, %c0_i32_0 : i32, i32
  }
  func.func @transform_18(%arg0: i32, %arg1: i32) -> (i32, i32, i32) {
    %c0_i32 = arith.constant 0 : i32
    %c0_i32_0 = arith.constant 0 : i32
    return %arg0, %arg1, %c0_i32 : i32, i32, i32
  }
  func.func @transform_19(%arg0: i32, %arg1: i32) -> (i32, i32, i32, i32) {
    %c0_i32 = arith.constant 0 : i32
    %c0_i32_0 = arith.constant 0 : i32
    %c0_i32_1 = arith.constant 0 : i32
    return %arg0, %c0_i32, %arg1, %c0_i32_0 : i32, i32, i32, i32
  }
}

module attributes {stable_mosaic.version = 11 : i64} {
  func.func @_encoder_layer_kernel(%arg0: i32, %arg1: i32, %arg2: memref<1x8x32xf32, #tpu.memory_space<vmem>>, %arg3: memref<1x16x32xbf16, #tpu.memory_space<vmem>>, %arg4: memref<32x32xbf16, #tpu.memory_space<vmem>>, %arg5: memref<1x32xf32, #tpu.memory_space<vmem>>, %arg6: memref<32x32xbf16, #tpu.memory_space<vmem>>, %arg7: memref<1x32xf32, #tpu.memory_space<vmem>>, %arg8: memref<32x32xbf16, #tpu.memory_space<vmem>>, %arg9: memref<1x32xf32, #tpu.memory_space<vmem>>, %arg10: memref<32x32xbf16, #tpu.memory_space<vmem>>, %arg11: memref<1x32xf32, #tpu.memory_space<vmem>>, %arg12: memref<1x32xf32, #tpu.memory_space<vmem>>, %arg13: memref<1x32xf32, #tpu.memory_space<vmem>>, %arg14: memref<32x128xbf16, #tpu.memory_space<vmem>>, %arg15: memref<1x128xf32, #tpu.memory_space<vmem>>, %arg16: memref<128x32xbf16, #tpu.memory_space<vmem>>, %arg17: memref<1x32xf32, #tpu.memory_space<vmem>>, %arg18: memref<1x32xf32, #tpu.memory_space<vmem>>, %arg19: memref<1x32xf32, #tpu.memory_space<vmem>>, %arg20: memref<1x8x32xf32, #tpu.memory_space<vmem>>, %arg21: memref<1x4x8x16xf32, #tpu.memory_space<vmem>>, %arg22: memref<4x16x8xbf16, #tpu.memory_space<vmem>>, %arg23: memref<4x16x8xbf16, #tpu.memory_space<vmem>>) attributes {dimension_semantics = [#tpu.dimension_semantics<parallel>, #tpu.dimension_semantics<arbitrary>], iteration_bounds = array<i64: 2, 2>, scalar_prefetch = 0 : i64, scratch_operands = 2 : i64, tpu.core_type = #tpu.core_type<tc>, window_params = [{transform_indices = @transform_0, window_bounds = array<i64: 1, 8, 32>}, {transform_indices = @transform_1, window_bounds = array<i64: 1, 16, 32>}, {pipeline_mode = #tpu.pipeline_mode<synchronous>, transform_indices = @transform_2, window_bounds = array<i64: 32, 32>}, {pipeline_mode = #tpu.pipeline_mode<synchronous>, transform_indices = @transform_3, window_bounds = array<i64: 1, 32>}, {pipeline_mode = #tpu.pipeline_mode<synchronous>, transform_indices = @transform_4, window_bounds = array<i64: 32, 32>}, {pipeline_mode = #tpu.pipeline_mode<synchronous>, transform_indices = @transform_5, window_bounds = array<i64: 1, 32>}, {pipeline_mode = #tpu.pipeline_mode<synchronous>, transform_indices = @transform_6, window_bounds = array<i64: 32, 32>}, {pipeline_mode = #tpu.pipeline_mode<synchronous>, transform_indices = @transform_7, window_bounds = array<i64: 1, 32>}, {pipeline_mode = #tpu.pipeline_mode<synchronous>, transform_indices = @transform_8, window_bounds = array<i64: 32, 32>}, {pipeline_mode = #tpu.pipeline_mode<synchronous>, transform_indices = @transform_9, window_bounds = array<i64: 1, 32>}, {pipeline_mode = #tpu.pipeline_mode<synchronous>, transform_indices = @transform_10, window_bounds = array<i64: 1, 32>}, {pipeline_mode = #tpu.pipeline_mode<synchronous>, transform_indices = @transform_11, window_bounds = array<i64: 1, 32>}, {pipeline_mode = #tpu.pipeline_mode<synchronous>, transform_indices = @transform_12, window_bounds = array<i64: 32, 128>}, {pipeline_mode = #tpu.pipeline_mode<synchronous>, transform_indices = @transform_13, window_bounds = array<i64: 1, 128>}, {pipeline_mode = #tpu.pipeline_mode<synchronous>, transform_indices = @transform_14, window_bounds = array<i64: 128, 32>}, {pipeline_mode = #tpu.pipeline_mode<synchronous>, transform_indices = @transform_15, window_bounds = array<i64: 1, 32>}, {pipeline_mode = #tpu.pipeline_mode<synchronous>, transform_indices = @transform_16, window_bounds = array<i64: 1, 32>}, {pipeline_mode = #tpu.pipeline_mode<synchronous>, transform_indices = @transform_17, window_bounds = array<i64: 1, 32>}, {transform_indices = @transform_18, window_bounds = array<i64: 1, 8, 32>}, {transform_indices = @transform_19, window_bounds = array<i64: 1, 4, 8, 16>}]} {
    %c0_i32 = arith.constant 0 : i32
    %0 = arith.cmpi eq, %arg1, %c0_i32 : i32
    %1 = arith.extui %0 : i1 to i32
    %c0_i32_0 = arith.constant 0 : i32
    %2 = arith.cmpi ne, %1, %c0_i32_0 : i32
    scf.if %2 {
      %c0_61 = arith.constant 0 : index
      %c0_62 = arith.constant 0 : index
      %c0_63 = arith.constant 0 : index
      %118 = vector.load %arg3[%c0_61, %c0_62, %c0_63] : memref<1x16x32xbf16, #tpu.memory_space<vmem>>, vector<1x16x32xbf16>
      %119 = vector.shape_cast %118 : vector<1x16x32xbf16> to vector<16x32xbf16>
      %c0_64 = arith.constant 0 : index
      %c0_65 = arith.constant 0 : index
      %120 = vector.load %arg6[%c0_64, %c0_65] : memref<32x32xbf16, #tpu.memory_space<vmem>>, vector<32x32xbf16>
      %cst_66 = arith.constant dense<0.000000e+00> : vector<16x32xf32>
      %121 = tpu.matmul %119, %120, %cst_66 {dimension_numbers = #tpu.dot_dimension_numbers<[1], [0], [0], [1], [0, 0, 1, 1], [], []>} : vector<16x32xbf16>, vector<32x32xbf16>, vector<16x32xf32> -> vector<16x32xf32>
      %c0_67 = arith.constant 0 : index
      %c0_68 = arith.constant 0 : index
      %122 = vector.load %arg7[%c0_67, %c0_68] : memref<1x32xf32, #tpu.memory_space<vmem>>, vector<1x32xf32>
      %123 = vector.broadcast %122 : vector<1x32xf32> to vector<16x32xf32>
      %124 = arith.addf %121, %123 : vector<16x32xf32>
      %c0_69 = arith.constant 0 : index
      %c0_70 = arith.constant 0 : index
      %125 = vector.load %arg8[%c0_69, %c0_70] : memref<32x32xbf16, #tpu.memory_space<vmem>>, vector<32x32xbf16>
      %cst_71 = arith.constant dense<0.000000e+00> : vector<16x32xf32>
      %126 = tpu.matmul %119, %125, %cst_71 {dimension_numbers = #tpu.dot_dimension_numbers<[1], [0], [0], [1], [0, 0, 1, 1], [], []>} : vector<16x32xbf16>, vector<32x32xbf16>, vector<16x32xf32> -> vector<16x32xf32>
      %c0_72 = arith.constant 0 : index
      %c0_73 = arith.constant 0 : index
      %127 = vector.load %arg9[%c0_72, %c0_73] : memref<1x32xf32, #tpu.memory_space<vmem>>, vector<1x32xf32>
      %128 = vector.broadcast %127 : vector<1x32xf32> to vector<16x32xf32>
      %129 = arith.addf %126, %128 : vector<16x32xf32>
      %130 = vector.shape_cast %124 : vector<16x32xf32> to vector<16x4x8xf32>
      %131 = tpu.transpose %130, [1, 0, 2] : vector<16x4x8xf32> -> vector<4x16x8xf32>
      %132 = arith.truncf %131 : vector<4x16x8xf32> to vector<4x16x8xbf16>
      %c0_74 = arith.constant 0 : index
      %c0_75 = arith.constant 0 : index
      %c0_76 = arith.constant 0 : index
      %133 = vector.load %arg22[%c0_74, %c0_75, %c0_76] : memref<4x16x8xbf16, #tpu.memory_space<vmem>>, vector<4x16x8xbf16>
      tpu.vector_store %arg22[%c0_74, %c0_75, %c0_76], %132 {strides = array<i32>} : memref<4x16x8xbf16, #tpu.memory_space<vmem>>, vector<4x16x8xbf16>,
      %134 = vector.shape_cast %129 : vector<16x32xf32> to vector<16x4x8xf32>
      %135 = tpu.transpose %134, [1, 0, 2] : vector<16x4x8xf32> -> vector<4x16x8xf32>
      %136 = arith.truncf %135 : vector<4x16x8xf32> to vector<4x16x8xbf16>
      %c0_77 = arith.constant 0 : index
      %c0_78 = arith.constant 0 : index
      %c0_79 = arith.constant 0 : index
      %137 = vector.load %arg23[%c0_77, %c0_78, %c0_79] : memref<4x16x8xbf16, #tpu.memory_space<vmem>>, vector<4x16x8xbf16>
      tpu.vector_store %arg23[%c0_77, %c0_78, %c0_79], %136 {strides = array<i32>} : memref<4x16x8xbf16, #tpu.memory_space<vmem>>, vector<4x16x8xbf16>,
    } else {
    }
    %c0 = arith.constant 0 : index
    %c0_1 = arith.constant 0 : index
    %c0_2 = arith.constant 0 : index
    %3 = vector.load %arg2[%c0, %c0_1, %c0_2] : memref<1x8x32xf32, #tpu.memory_space<vmem>>, vector<1x8x32xf32>
    %4 = vector.shape_cast %3 : vector<1x8x32xf32> to vector<8x32xf32>
    %5 = arith.truncf %4 : vector<8x32xf32> to vector<8x32xbf16>
    %c0_3 = arith.constant 0 : index
    %c0_4 = arith.constant 0 : index
    %6 = vector.load %arg4[%c0_3, %c0_4] : memref<32x32xbf16, #tpu.memory_space<vmem>>, vector<32x32xbf16>
    %cst = arith.constant dense<0.000000e+00> : vector<8x32xf32>
    %7 = tpu.matmul %5, %6, %cst {dimension_numbers = #tpu.dot_dimension_numbers<[1], [0], [0], [1], [0, 0, 1, 1], [], []>} : vector<8x32xbf16>, vector<32x32xbf16>, vector<8x32xf32> -> vector<8x32xf32>
    %c0_5 = arith.constant 0 : index
    %c0_6 = arith.constant 0 : index
    %8 = vector.load %arg5[%c0_5, %c0_6] : memref<1x32xf32, #tpu.memory_space<vmem>>, vector<1x32xf32>
    %9 = vector.broadcast %8 : vector<1x32xf32> to vector<8x32xf32>
    %10 = arith.addf %7, %9 : vector<8x32xf32>
    %11 = vector.shape_cast %10 : vector<8x32xf32> to vector<8x4x8xf32>
    %12 = tpu.transpose %11, [1, 0, 2] : vector<8x4x8xf32> -> vector<4x8x8xf32>
    %13 = arith.truncf %12 : vector<4x8x8xf32> to vector<4x8x8xbf16>
    %c0_7 = arith.constant 0 : index
    %c0_8 = arith.constant 0 : index
    %c0_9 = arith.constant 0 : index
    %14 = vector.load %arg22[%c0_7, %c0_8, %c0_9] : memref<4x16x8xbf16, #tpu.memory_space<vmem>>, vector<4x16x8xbf16>
    %c0_10 = arith.constant 0 : index
    %c0_11 = arith.constant 0 : index
    %c0_12 = arith.constant 0 : index
    %15 = vector.load %arg23[%c0_10, %c0_11, %c0_12] : memref<4x16x8xbf16, #tpu.memory_space<vmem>>, vector<4x16x8xbf16>
    "tpu.trace_start"() <{level = 10 : i32, message = "hqd,hkd->hqk"}> : () -> ()
    %cst_13 = arith.constant dense<0.000000e+00> : vector<4x8x16xf32>
    %16 = tpu.matmul %13, %14, %cst_13 {dimension_numbers = #tpu.dot_dimension_numbers<[2], [2], [1], [1], [0, 0, 0, 1, 1, 1], [0], [0]>} : vector<4x8x8xbf16>, vector<4x16x8xbf16>, vector<4x8x16xf32> -> vector<4x8x16xf32>
    "tpu.trace_stop"() : () -> ()
    %cst_14 = arith.constant dense<0xFF800000> : vector<4x8xf32>
    %17 = vector.multi_reduction <maximumf>, %16, %cst_14 [2] : vector<4x8x16xf32> to vector<4x8xf32>
    %18 = vector.shape_cast %17 : vector<4x8xf32> to vector<4x8x1xf32>
    %19 = vector.broadcast %18 : vector<4x8x1xf32> to vector<4x8x16xf32>
    %20 = arith.subf %16, %19 : vector<4x8x16xf32>
    %21 = math.exp %20 : vector<4x8x16xf32>
    %cst_15 = arith.constant dense<0.000000e+00> : vector<4x8xf32>
    %22 = vector.multi_reduction <add>, %21, %cst_15 [2] : vector<4x8x16xf32> to vector<4x8xf32>
    %23 = vector.shape_cast %22 : vector<4x8xf32> to vector<4x8x1xf32>
    %cst_16 = arith.constant 1.000000e+00 : f32
    %24 = vector.broadcast %cst_16 : f32 to vector<4x8x1xf32>
    %25 = arith.divf %24, %23 : vector<4x8x1xf32>
    %26 = vector.broadcast %25 : vector<4x8x1xf32> to vector<4x8x16xf32>
    %27 = arith.mulf %21, %26 : vector<4x8x16xf32>
    %c0_17 = arith.constant 0 : index
    %c0_18 = arith.constant 0 : index
    %c0_19 = arith.constant 0 : index
    %c0_20 = arith.constant 0 : index
    %28 = vector.load %arg21[%c0_17, %c0_18, %c0_19, %c0_20] : memref<1x4x8x16xf32, #tpu.memory_space<vmem>>, vector<1x4x8x16xf32>
    %29 = vector.shape_cast %28 : vector<1x4x8x16xf32> to vector<4x8x16xf32>
    %30 = vector.shape_cast %27 : vector<4x8x16xf32> to vector<1x4x8x16xf32>
    tpu.vector_store %arg21[%c0_17, %c0_18, %c0_19, %c0_20], %30 {strides = array<i32>} : memref<1x4x8x16xf32, #tpu.memory_space<vmem>>, vector<1x4x8x16xf32>,
    %31 = arith.truncf %27 : vector<4x8x16xf32> to vector<4x8x16xbf16>
    "tpu.trace_start"() <{level = 10 : i32, message = "hqk,hkd->hqd"}> : () -> ()
    %cst_21 = arith.constant dense<0.000000e+00> : vector<4x8x8xf32>
    %32 = tpu.matmul %31, %15, %cst_21 {dimension_numbers = #tpu.dot_dimension_numbers<[2], [1], [1], [2], [0, 0, 0, 1, 1, 2], [0], [0]>} : vector<4x8x16xbf16>, vector<4x16x8xbf16>, vector<4x8x8xf32> -> vector<4x8x8xf32>
    "tpu.trace_stop"() : () -> ()
    %33 = tpu.transpose %32, [1, 0, 2] : vector<4x8x8xf32> -> vector<8x4x8xf32>
    %34 = vector.shape_cast %33 : vector<8x4x8xf32> to vector<8x32xf32>
    %35 = arith.truncf %34 : vector<8x32xf32> to vector<8x32xbf16>
    %c0_22 = arith.constant 0 : index
    %c0_23 = arith.constant 0 : index
    %36 = vector.load %arg10[%c0_22, %c0_23] : memref<32x32xbf16, #tpu.memory_space<vmem>>, vector<32x32xbf16>
    %cst_24 = arith.constant dense<0.000000e+00> : vector<8x32xf32>
    %37 = tpu.matmul %35, %36, %cst_24 {dimension_numbers = #tpu.dot_dimension_numbers<[1], [0], [0], [1], [0, 0, 1, 1], [], []>} : vector<8x32xbf16>, vector<32x32xbf16>, vector<8x32xf32> -> vector<8x32xf32>
    %c0_25 = arith.constant 0 : index
    %c0_26 = arith.constant 0 : index
    %38 = vector.load %arg11[%c0_25, %c0_26] : memref<1x32xf32, #tpu.memory_space<vmem>>, vector<1x32xf32>
    %39 = vector.broadcast %38 : vector<1x32xf32> to vector<8x32xf32>
    %40 = arith.addf %37, %39 : vector<8x32xf32>
    %41 = arith.addf %4, %40 : vector<8x32xf32>
    %c0_27 = arith.constant 0 : index
    %c0_28 = arith.constant 0 : index
    %42 = vector.load %arg12[%c0_27, %c0_28] : memref<1x32xf32, #tpu.memory_space<vmem>>, vector<1x32xf32>
    %c0_29 = arith.constant 0 : index
    %c0_30 = arith.constant 0 : index
    %43 = vector.load %arg13[%c0_29, %c0_30] : memref<1x32xf32, #tpu.memory_space<vmem>>, vector<1x32xf32>
    %cst_31 = arith.constant dense<0.000000e+00> : vector<8xf32>
    %44 = vector.multi_reduction <add>, %41, %cst_31 [1] : vector<8x32xf32> to vector<8xf32>
    %45 = vector.shape_cast %44 : vector<8xf32> to vector<8x1xf32>
    %cst_32 = arith.constant 3.200000e+01 : f32
    %46 = vector.broadcast %cst_32 : f32 to vector<8x1xf32>
    %47 = arith.divf %45, %46 : vector<8x1xf32>
    %48 = arith.mulf %41, %41 : vector<8x32xf32>
    %cst_33 = arith.constant dense<0.000000e+00> : vector<8xf32>
    %49 = vector.multi_reduction <add>, %48, %cst_33 [1] : vector<8x32xf32> to vector<8xf32>
    %50 = vector.shape_cast %49 : vector<8xf32> to vector<8x1xf32>
    %cst_34 = arith.constant 3.200000e+01 : f32
    %51 = vector.broadcast %cst_34 : f32 to vector<8x1xf32>
    %52 = arith.divf %50, %51 : vector<8x1xf32>
    %53 = arith.mulf %47, %47 : vector<8x1xf32>
    %54 = arith.subf %52, %53 : vector<8x1xf32>
    %cst_35 = arith.constant 0.000000e+00 : f32
    %55 = vector.broadcast %cst_35 : f32 to vector<8x1xf32>
    %56 = arith.maximumf %54, %55 : vector<8x1xf32>
    %57 = vector.broadcast %47 : vector<8x1xf32> to vector<8x32xf32>
    %58 = arith.subf %41, %57 : vector<8x32xf32>
    %cst_36 = arith.constant 9.99999974E-6 : f32
    %59 = vector.broadcast %cst_36 : f32 to vector<8x1xf32>
    %60 = arith.addf %56, %59 : vector<8x1xf32>
    %61 = math.rsqrt %60 : vector<8x1xf32>
    %62 = vector.broadcast %61 : vector<8x1xf32> to vector<8x32xf32>
    %63 = arith.mulf %58, %62 : vector<8x32xf32>
    %64 = vector.broadcast %42 : vector<1x32xf32> to vector<8x32xf32>
    %65 = arith.mulf %63, %64 : vector<8x32xf32>
    %66 = vector.broadcast %43 : vector<1x32xf32> to vector<8x32xf32>
    %67 = arith.addf %65, %66 : vector<8x32xf32>
    %68 = arith.truncf %67 : vector<8x32xf32> to vector<8x32xbf16>
    %c0_37 = arith.constant 0 : index
    %c0_38 = arith.constant 0 : index
    %69 = vector.load %arg14[%c0_37, %c0_38] : memref<32x128xbf16, #tpu.memory_space<vmem>>, vector<32x128xbf16>
    %cst_39 = arith.constant dense<0.000000e+00> : vector<8x128xf32>
    %70 = tpu.matmul %68, %69, %cst_39 {dimension_numbers = #tpu.dot_dimension_numbers<[1], [0], [0], [1], [0, 0, 1, 1], [], []>} : vector<8x32xbf16>, vector<32x128xbf16>, vector<8x128xf32> -> vector<8x128xf32>
    %c0_40 = arith.constant 0 : index
    %c0_41 = arith.constant 0 : index
    %71 = vector.load %arg15[%c0_40, %c0_41] : memref<1x128xf32, #tpu.memory_space<vmem>>, vector<1x128xf32>
    %72 = vector.broadcast %71 : vector<1x128xf32> to vector<8x128xf32>
    %73 = arith.addf %70, %72 : vector<8x128xf32>
    %74 = arith.truncf %73 : vector<8x128xf32> to vector<8x128xbf16>
    %75 = arith.negf %74 : vector<8x128xbf16>
    %76 = math.exp %75 : vector<8x128xbf16>
    %cst_42 = arith.constant 1.000000e+00 : bf16
    %77 = vector.broadcast %cst_42 : bf16 to vector<8x128xbf16>
    %78 = arith.addf %77, %76 : vector<8x128xbf16>
    %79 = arith.divf %77, %78 : vector<8x128xbf16>
    %80 = arith.extf %79 : vector<8x128xbf16> to vector<8x128xf32>
    %81 = arith.mulf %73, %80 : vector<8x128xf32>
    %82 = arith.truncf %81 : vector<8x128xf32> to vector<8x128xbf16>
    %c0_43 = arith.constant 0 : index
    %c0_44 = arith.constant 0 : index
    %83 = vector.load %arg16[%c0_43, %c0_44] : memref<128x32xbf16, #tpu.memory_space<vmem>>, vector<128x32xbf16>
    %cst_45 = arith.constant dense<0.000000e+00> : vector<8x32xf32>
    %84 = tpu.matmul %82, %83, %cst_45 {dimension_numbers = #tpu.dot_dimension_numbers<[1], [0], [0], [1], [0, 0, 1, 1], [], []>} : vector<8x128xbf16>, vector<128x32xbf16>, vector<8x32xf32> -> vector<8x32xf32>
    %c0_46 = arith.constant 0 : index
    %c0_47 = arith.constant 0 : index
    %85 = vector.load %arg17[%c0_46, %c0_47] : memref<1x32xf32, #tpu.memory_space<vmem>>, vector<1x32xf32>
    %86 = vector.broadcast %85 : vector<1x32xf32> to vector<8x32xf32>
    %87 = arith.addf %84, %86 : vector<8x32xf32>
    %88 = arith.addf %67, %87 : vector<8x32xf32>
    %c0_48 = arith.constant 0 : index
    %c0_49 = arith.constant 0 : index
    %89 = vector.load %arg18[%c0_48, %c0_49] : memref<1x32xf32, #tpu.memory_space<vmem>>, vector<1x32xf32>
    %c0_50 = arith.constant 0 : index
    %c0_51 = arith.constant 0 : index
    %90 = vector.load %arg19[%c0_50, %c0_51] : memref<1x32xf32, #tpu.memory_space<vmem>>, vector<1x32xf32>
    %cst_52 = arith.constant dense<0.000000e+00> : vector<8xf32>
    %91 = vector.multi_reduction <add>, %88, %cst_52 [1] : vector<8x32xf32> to vector<8xf32>
    %92 = vector.shape_cast %91 : vector<8xf32> to vector<8x1xf32>
    %cst_53 = arith.constant 3.200000e+01 : f32
    %93 = vector.broadcast %cst_53 : f32 to vector<8x1xf32>
    %94 = arith.divf %92, %93 : vector<8x1xf32>
    %95 = arith.mulf %88, %88 : vector<8x32xf32>
    %cst_54 = arith.constant dense<0.000000e+00> : vector<8xf32>
    %96 = vector.multi_reduction <add>, %95, %cst_54 [1] : vector<8x32xf32> to vector<8xf32>
    %97 = vector.shape_cast %96 : vector<8xf32> to vector<8x1xf32>
    %cst_55 = arith.constant 3.200000e+01 : f32
    %98 = vector.broadcast %cst_55 : f32 to vector<8x1xf32>
    %99 = arith.divf %97, %98 : vector<8x1xf32>
    %100 = arith.mulf %94, %94 : vector<8x1xf32>
    %101 = arith.subf %99, %100 : vector<8x1xf32>
    %cst_56 = arith.constant 0.000000e+00 : f32
    %102 = vector.broadcast %cst_56 : f32 to vector<8x1xf32>
    %103 = arith.maximumf %101, %102 : vector<8x1xf32>
    %104 = vector.broadcast %94 : vector<8x1xf32> to vector<8x32xf32>
    %105 = arith.subf %88, %104 : vector<8x32xf32>
    %cst_57 = arith.constant 9.99999974E-6 : f32
    %106 = vector.broadcast %cst_57 : f32 to vector<8x1xf32>
    %107 = arith.addf %103, %106 : vector<8x1xf32>
    %108 = math.rsqrt %107 : vector<8x1xf32>
    %109 = vector.broadcast %108 : vector<8x1xf32> to vector<8x32xf32>
    %110 = arith.mulf %105, %109 : vector<8x32xf32>
    %111 = vector.broadcast %89 : vector<1x32xf32> to vector<8x32xf32>
    %112 = arith.mulf %110, %111 : vector<8x32xf32>
    %113 = vector.broadcast %90 : vector<1x32xf32> to vector<8x32xf32>
    %114 = arith.addf %112, %113 : vector<8x32xf32>
    %c0_58 = arith.constant 0 : index
    %c0_59 = arith.constant 0 : index
    %c0_60 = arith.constant 0 : index
    %115 = vector.load %arg20[%c0_58, %c0_59, %c0_60] : memref<1x8x32xf32, #tpu.memory_space<vmem>>, vector<1x8x32xf32>
    %116 = vector.shape_cast %115 : vector<1x8x32xf32> to vector<8x32xf32>
    %117 = vector.shape_cast %114 : vector<8x32xf32> to vector<1x8x32xf32>
    tpu.vector_store %arg20[%c0_58, %c0_59, %c0_60], %117 {strides = array<i32>} : memref<1x8x32xf32, #tpu.memory_space<vmem>>, vector<1x8x32xf32>,
    return
  }
  func.func @transform_0(%arg0: i32, %arg1: i32) -> (i32, i32, i32) {
    %c0_i32 = arith.constant 0 : i32
    %c0_i32_0 = arith.constant 0 : i32
    return %arg0, %arg1, %c0_i32 : i32, i32, i32
  }
  func.func @transform_1(%arg0: i32, %arg1: i32) -> (i32, i32, i32) {
    %c0_i32 = arith.constant 0 : i32
    %c0_i32_0 = arith.constant 0 : i32
    %c0_i32_1 = arith.constant 0 : i32
    return %arg0, %c0_i32, %c0_i32_0 : i32, i32, i32
  }
  func.func @transform_2(%arg0: i32, %arg1: i32) -> (i32, i32) {
    %c0_i32 = arith.constant 0 : i32
    %c0_i32_0 = arith.constant 0 : i32
    %c0_i32_1 = arith.constant 0 : i32
    return %c0_i32, %c0_i32_0 : i32, i32
  }
  func.func @transform_3(%arg0: i32, %arg1: i32) -> (i32, i32) {
    %c0_i32 = arith.constant 0 : i32
    %c0_i32_0 = arith.constant 0 : i32
    %c0_i32_1 = arith.constant 0 : i32
    return %c0_i32, %c0_i32_0 : i32, i32
  }
  func.func @transform_4(%arg0: i32, %arg1: i32) -> (i32, i32) {
    %c0_i32 = arith.constant 0 : i32
    %c0_i32_0 = arith.constant 0 : i32
    %c0_i32_1 = arith.constant 0 : i32
    return %c0_i32, %c0_i32_0 : i32, i32
  }
  func.func @transform_5(%arg0: i32, %arg1: i32) -> (i32, i32) {
    %c0_i32 = arith.constant 0 : i32
    %c0_i32_0 = arith.constant 0 : i32
    %c0_i32_1 = arith.constant 0 : i32
    return %c0_i32, %c0_i32_0 : i32, i32
  }
  func.func @transform_6(%arg0: i32, %arg1: i32) -> (i32, i32) {
    %c0_i32 = arith.constant 0 : i32
    %c0_i32_0 = arith.constant 0 : i32
    %c0_i32_1 = arith.constant 0 : i32
    return %c0_i32, %c0_i32_0 : i32, i32
  }
  func.func @transform_7(%arg0: i32, %arg1: i32) -> (i32, i32) {
    %c0_i32 = arith.constant 0 : i32
    %c0_i32_0 = arith.constant 0 : i32
    %c0_i32_1 = arith.constant 0 : i32
    return %c0_i32, %c0_i32_0 : i32, i32
  }
  func.func @transform_8(%arg0: i32, %arg1: i32) -> (i32, i32) {
    %c0_i32 = arith.constant 0 : i32
    %c0_i32_0 = arith.constant 0 : i32
    %c0_i32_1 = arith.constant 0 : i32
    return %c0_i32, %c0_i32_0 : i32, i32
  }
  func.func @transform_9(%arg0: i32, %arg1: i32) -> (i32, i32) {
    %c0_i32 = arith.constant 0 : i32
    %c0_i32_0 = arith.constant 0 : i32
    %c0_i32_1 = arith.constant 0 : i32
    return %c0_i32, %c0_i32_0 : i32, i32
  }
  func.func @transform_10(%arg0: i32, %arg1: i32) -> (i32, i32) {
    %c0_i32 = arith.constant 0 : i32
    %c0_i32_0 = arith.constant 0 : i32
    %c0_i32_1 = arith.constant 0 : i32
    return %c0_i32, %c0_i32_0 : i32, i32
  }
  func.func @transform_11(%arg0: i32, %arg1: i32) -> (i32, i32) {
    %c0_i32 = arith.constant 0 : i32
    %c0_i32_0 = arith.constant 0 : i32
    %c0_i32_1 = arith.constant 0 : i32
    return %c0_i32, %c0_i32_0 : i32, i32
  }
  func.func @transform_12(%arg0: i32, %arg1: i32) -> (i32, i32) {
    %c0_i32 = arith.constant 0 : i32
    %c0_i32_0 = arith.constant 0 : i32
    %c0_i32_1 = arith.constant 0 : i32
    return %c0_i32, %c0_i32_0 : i32, i32
  }
  func.func @transform_13(%arg0: i32, %arg1: i32) -> (i32, i32) {
    %c0_i32 = arith.constant 0 : i32
    %c0_i32_0 = arith.constant 0 : i32
    %c0_i32_1 = arith.constant 0 : i32
    return %c0_i32, %c0_i32_0 : i32, i32
  }
  func.func @transform_14(%arg0: i32, %arg1: i32) -> (i32, i32) {
    %c0_i32 = arith.constant 0 : i32
    %c0_i32_0 = arith.constant 0 : i32
    %c0_i32_1 = arith.constant 0 : i32
    return %c0_i32, %c0_i32_0 : i32, i32
  }
  func.func @transform_15(%arg0: i32, %arg1: i32) -> (i32, i32) {
    %c0_i32 = arith.constant 0 : i32
    %c0_i32_0 = arith.constant 0 : i32
    %c0_i32_1 = arith.constant 0 : i32
    return %c0_i32, %c0_i32_0 : i32, i32
  }
  func.func @transform_16(%arg0: i32, %arg1: i32) -> (i32, i32) {
    %c0_i32 = arith.constant 0 : i32
    %c0_i32_0 = arith.constant 0 : i32
    %c0_i32_1 = arith.constant 0 : i32
    return %c0_i32, %c0_i32_0 : i32, i32
  }
  func.func @transform_17(%arg0: i32, %arg1: i32) -> (i32, i32) {
    %c0_i32 = arith.constant 0 : i32
    %c0_i32_0 = arith.constant 0 : i32
    %c0_i32_1 = arith.constant 0 : i32
    return %c0_i32, %c0_i32_0 : i32, i32
  }
  func.func @transform_18(%arg0: i32, %arg1: i32) -> (i32, i32, i32) {
    %c0_i32 = arith.constant 0 : i32
    %c0_i32_0 = arith.constant 0 : i32
    return %arg0, %arg1, %c0_i32 : i32, i32, i32
  }
  func.func @transform_19(%arg0: i32, %arg1: i32) -> (i32, i32, i32, i32) {
    %c0_i32 = arith.constant 0 : i32
    %c0_i32_0 = arith.constant 0 : i32
    %c0_i32_1 = arith.constant 0 : i32
    return %arg0, %c0_i32, %arg1, %c0_i32_0 : i32, i32, i32, i32
  }
}

</mosaic_0001>

<bundles_post_ra>
// kernel: tpu_custom_call.1
= control target key start
LH: loop header
LB: loop body
LE: loop exit
PB: predicated region body
PF: predicated region fallthrough
CT: control target
= control target key end

     0   :  { %s4187_s0 = inlined_call_operand.vmem [shape: f32[2,16,32], index: 0, kind: input, shape index: {}]   ;;  %s4188_s1 = inlined_call_operand.vmem [shape: bf16[2,16,32], index: 1, kind: input, shape index: {}]   ;;  %s4189_s2 = inlined_call_operand.vmem [shape: bf16[32,32], index: 2, kind: input, shape index: {}]   ;;  %s4190_s3 = inlined_call_operand.vmem [shape: f32[1,32], index: 3, kind: input, shape index: {}]   ;;  %s4191_s4 = inlined_call_operand.vmem [shape: bf16[32,32], index: 4, kind: input, shape index: {}]   ;;  %s4192_s5 = inlined_call_operand.vmem [shape: f32[1,32], index: 5, kind: input, shape index: {}]   ;;  %s4193_s6 = inlined_call_operand.hbm [shape: bf16[32,32], index: 6, kind: input, shape index: {}]   ;;  %s4194_s7 = inlined_call_operand.hbm [shape: f32[1,32], index: 7, kind: input, shape index: {}]   ;;  %s4195_s8 = inlined_call_operand.hbm [shape: bf16[32,32], index: 8, kind: input, shape index: {}]   ;;  %s4196_s9 = inlined_call_operand.hbm [shape: f32[1,32], index: 9, kind: input, shape index: {}]   ;;  %s4197_s10 = inlined_call_operand.vmem [shape: f32[1,32], index: 10, kind: input, shape index: {}]   ;;  %s4198_s11 = inlined_call_operand.vmem [shape: f32[1,32], index: 11, kind: input, shape index: {}]   ;;  %s4199_s12 = inlined_call_operand.vmem [shape: bf16[32,128], index: 12, kind: input, shape index: {}]   ;;  %s4200_s13 = inlined_call_operand.vmem [shape: f32[1,128], index: 13, kind: input, shape index: {}]   ;;  %s4201_s14 = inlined_call_operand.vmem [shape: bf16[128,32], index: 14, kind: input, shape index: {}]   ;;  %s4202_s15 = inlined_call_operand.vmem [shape: f32[1,32], index: 15, kind: input, shape index: {}]   ;;  %s4203_s16 = inlined_call_operand.vmem [shape: f32[1,32], index: 16, kind: input, shape index: {}]   ;;  %s4204_s17 = inlined_call_operand.vmem [shape: f32[1,32], index: 17, kind: input, shape index: {}]   ;;  %s4205_s18 = inlined_call_operand.hbm [shape: f32[2,16,32], index: 18, kind: output, shape index: {0}]   ;;  %s4206_s19 = inlined_call_operand.hbm [shape: f32[2,4,16,16], index: 19, kind: output, shape index: {1}]  }
   0x1   :  { %4226 = sst [smem:[#allocation30_spill]] %s4187_s0 }
   0x2   :  { %4227 = sst [smem:[#allocation31_spill]] %s4188_s1 }
   0x3   :  { %4228 = sst [smem:[#allocation32_spill]] %s4189_s2 }
   0x4   :  { %4229 = sst [smem:[#allocation33_spill]] %s4190_s3 }
   0x5   :  { %4230 = sst [smem:[#allocation34_spill]] %s4194_s7 }
   0x6   :  { %4231 = sst [smem:[#allocation35_spill]] %s4200_s13 }
   0x7   :  { %4232 = sst [smem:[#allocation36_spill]] %s4201_s14 }
   0x8   :  { %4233 = sst [smem:[#allocation37_spill]] %s4202_s15 }
   0x9   :  { %4234 = sst [smem:[#allocation38_spill]] %s4203_s16 }
   0xa   :  { %4235 = sst [smem:[#allocation39_spill]] %s4204_s17 }
   0xb   :  { %4236 = sst [smem:[#allocation40_spill]] %s4205_s18 }
   0xc   :  { %4237 = sst [smem:[#allocation41_spill]] %s4206_s19 }
   0xd   :  { %25 = vsyncpa [#allocation5], 0 }
   0xe   :  { %26 = vsyncpa [#allocation8], 0 }
   0xf   :  { %27 = vsyncpa [#allocation11], 0 }
  0x10   :  { %28 = vsyncpa [#allocation6], 0 }
  0x11   :  { %30 = vsyncpa [#allocation6 + $0x1], 0 }
  0x12   :  { %31 = vsyncpa [#allocation14], 0 }
  0x13   :  { %33 = vsyncpa [#allocation14 + $0x1], 0  ;;  %s3572_s0 = smov 0   ;;  %s3574_s30 = smov 0  }
  0x14   :  { %s3576_s20 = smov 0   ;;  %s3578_s21 = smov 0  }
  0x15   :  { %s3580_s1 = smov 0   ;;  %s3582_s22 = smov 0  }
  0x16   :  { %s3584_s2 = smov 0   ;;  %s3586_s23 = smov 0  }
  0x17 LB: > { %4238 = sst [smem:[#allocation20_spill]] %s3415_s0  ;;  %s2780_s24 = sadd.s32 4294967295, %s3443_s23   ;;  %s3443_s23 = sphi %s3586_s23, %s39_s23   ;;  %s3439_s2 = sphi %s3584_s2, %s4281_s2   ;;  %s3435_s22 = sphi %s3582_s22, %s4284_s22   ;;  %s3431_s1 = sphi %s3580_s1, %s4279_s1   ;;  %s3427_s21 = sphi %s3578_s21, %s4278_s21   ;;  %s3423_s20 = sphi %s3576_s20, %s4277_s20   ;;  %s3419_s30 = sphi %s3574_s30, %s4283_s30   ;;  %s3415_s0 = sphi %s3572_s0, %s4282_s0  }
  0x18   : > { %4239 = sst [smem:[#allocation21_spill]] %s3423_s20  ;;  %s2781_s25 = sadd.s32 4294967294, %s3443_s23  }
  0x19   : > { %4240 = sst [smem:[#allocation22_spill]] %s3435_s22  ;;  %s48_s3 = sadd.s32 1, %s3435_s22 }
  0x1a   : > { %4241 = sst [smem:[#allocation23_spill]] %s3439_s2  ;;  %s51_s26 = sadd.s32 1, %s3439_s2 }
  0x1b   : > { %4242 = sst [smem:[#allocation24_spill]] %s3443_s23  ;;  %p49_p0 = scmp.ge.s32.totalorder %s48_s3, 2 }
  0x1c   : > { %s450_s27 = sadd.s32 1, %s3423_s20  ;;  %p460_p1 = scmp.ne.s32.totalorder %s3423_s20, %s3419_s30 }
  0x1d   : > { %p461_p2 = scmp.eq.s32.totalorder %s2780_s24, 3  ;;  %s4286_s3 = smov (%p49_p0, %s48_s3), 0 }
  0x1e   : > { %4243 = sst [smem:[#allocation25_spill]] %s4286_s3  ;;  %s4288_s26 = smov (!%p49_p0, %s51_s26), %s3439_s2 }
  0x1f   : > { %s446_s28 = ssub.s32 %s3435_s22, %s4286_s3  ;;  %p3624_p3 = por %p461_p2, %p460_p1 }
  0x20   : > { %p53_p4 = scmp.ge.s32.totalorder %s4288_s26, 2  ;;  %p466_p5 = scmp.ne.s32.totalorder %s3419_s30, %s3415_s0 }
  0x21   : > { %s4244_s29 = scalar_select %p3624_p3, 1, 0 }
  0x22   : > { %p467_p6 = scmp.eq.s32.totalorder %s2781_s25, 3  ;;  %p2782_p7 = scmp.ge.s32.totalorder %s3443_s23, 1 }
  0x23   : > { %4245 = sst [smem:[#allocation26_spill]] %s4244_s29  ;;  %s4290_s26 = smov (%p53_p4, %s4288_s26), 0 }
  0x24   : > { %4246 = sst [smem:[#allocation27_spill]] %s4290_s26  ;;  %p3633_p8 = por %p467_p6, %p466_p5 }
  0x25   : > { %p502_p9 = scmp.lt.s32.totalorder %s3443_s23, 5  ;;  %s445_s17 = ssub.s32 %s3439_s2, %s4290_s26 }
  0x26   : > { %s4247_s18 = scalar_select %p3633_p8, 1, 0 }
  0x27   : > { %s447_s16 = sor.u32 %s446_s28, %s445_s17  ;;  %p3640_p10 = pnand %p2782_p7, %p502_p9 }
  0x28   : > { %4248 = sst [smem:[#allocation28_spill]] %s4247_s18  ;;  %p448_p11 = scmp.eq.s32.totalorder %s447_s16, 0 }
  0x29   : > { %s4249_s3 = scalar_select %p3640_p10, 1, 0 }
  0x2a   : > { %p3644_p12 = scmp.eq.s32.totalorder %s2780_s24, 0  ;;  %p3032_p13 = pneg %p3640_p10 }
  0x2b   : > { %s3651_s25 = scalar_select %p448_p11, %s3423_s20, %s450_s27  }
  0x2c   : > { %s4250_s22 = scalar_select %p3644_p12, 1, 0 }
  0x2d   : > { %4251 = sst [smem:[#allocation29_spill]] %s3651_s25  ;;  %p3655_p0 = pnand %p3644_p12, %p3032_p13 }
  0x2e   : > { %s3445_s17 = smov [#allocation7]   ;;  %s4253_s7 = sld [smem:[#allocation34_spill]] }
  0x2f   : > { %s540_s28 = sshll.u32 %s3445_s17, 4  ;;  %p3667_p2 = pneg %p3655_p0  ;;  %s541_s28 = int_to_ptr.vmem [resolvable:$true] %s540_s28 }
  0x34   : > { %s3193_s24 = scalar_lea.hbm %s4253_s7, 16 }
  0x35   : > { %p3194_p1 = scmp.ne.s32.totalorder %s4253_s7, %s3193_s24  ;;  %p3200_p6 = scmp.lt.u32.totalorder %s3193_s24, %s4253_s7 }
  0x37   : > { %p3196_p4 = pnand %p3667_p2, %p3194_p1 }
  0x39   : > { %p3197_p5 = pneg %p3196_p4 }
  0x3b   : > { %p3202_p7 = pnand %p3200_p6, %p3197_p5 }
  0x3d   : > { %3205 = shalt.err (!%p3202_p7)
}
  0x3e   : > { %s3206_s26 = scalar_lea.vmem %s541_s28, 16  ;;  %s3213_s0 = scalar_lea.vmem %s541_s28, 32 }
  0x3f   : > { %p3207_p9 = scmp.ne.s32.totalorder %s541_s28, %s3206_s26  ;;  %p3214_p8 = scmp.lt.s32.totalorder %s541_s28, %s541_s28 }
  0x40   : > { %p3215_p3 = scmp.lt.s32.totalorder %s3213_s0, %s3206_s26 }
  0x41   : > { %p3209_p11 = pnand %p3207_p9, %p3667_p2 }
  0x42   : > { %p3216_p12 = por %p3215_p3, %p3214_p8 }
  0x43   : > { %p3210_p13 = pneg %p3209_p11 }
  0x45   : > { %p3217_p10 = pnand %p3216_p12, %p3210_p13 }
  0x47   : > { %3220 = shalt.err (!%p3217_p10)
}
  0x48   : > { %3038 = dma.hbm_to_vmem [thread:$0]  (!%p3655_p0), %s4253_s7, 16, %s541_s28, [#allocation8]  }
  0x49   : > { %s3446_s25 = smov [#allocation4]   ;;  %s3221_s23 = scalar_lea.hbm %s4193_s6, 256 }
  0x4a   : > { %s526_s24 = sshll.u32 %s3446_s25, 4  ;;  %p3222_p3 = scmp.ne.s32.totalorder %s4193_s6, %s3221_s23  ;;  %s527_s24 = int_to_ptr.vmem [resolvable:$true] %s526_s24 }
  0x4b   : > { %p3228_p12 = scmp.lt.u32.totalorder %s3221_s23, %s4193_s6 }
  0x4c   : > { %p3224_p8 = pnand %p3222_p3, %p3667_p2 }
  0x4e   : > { %p3225_p10 = pneg %p3224_p8 }
  0x50   : > { %p3230_p1 = pnand %p3228_p12, %p3225_p10 }
  0x52   : > { %3233 = shalt.err (!%p3230_p1)
}
  0x53   : > { %s3234_s28 = scalar_lea.vmem %s527_s24, 256  ;;  %p3242_p7 = scmp.lt.s32.totalorder %s527_s24, %s527_s24 }
  0x54   : > { %p3235_p4 = scmp.ne.s32.totalorder %s527_s24, %s3234_s28  ;;  %p3243_p9 = scmp.lt.s32.totalorder %s3234_s28, %s3234_s28 }
  0x56   : > { %p3237_p5 = pnand %p3235_p4, %p3667_p2  ;;  %p3244_p11 = por %p3243_p9, %p3242_p7 }
  0x58   : > { %p3238_p6 = pneg %p3237_p5 }
  0x5a   : > { %p3245_p13 = pnand %p3244_p11, %p3238_p6 }
  0x5c   : > { %3248 = shalt.err (!%p3245_p13)
}
  0x5d   : > { %s3447_s19 = smov 64   ;;  %s3448_s20 = smov 4  }
  0x5e   : > { %3035 = dma.hbm_to_vmem [thread:$0]  (!%p3655_p0), %s4193_s6, 256, %s527_s24, [#allocation5], %s3447_s19, %s3447_s19, %s3448_s20  }
  0x5f   : > { %s3449_s2 = smov [#allocation9]   ;;  %s3450_s25 = smov [#allocation10]  }
  0x60   : > { %s550_s16 = sshll.u32 %s3449_s2, 4  ;;  %s564_s17 = sshll.u32 %s3450_s25, 4  ;;  %s551_s16 = int_to_ptr.vmem [resolvable:$true] %s550_s16  ;;  %s565_s17 = int_to_ptr.vmem [resolvable:$true] %s564_s17 }
  0x61   : > { %s3249_s28 = scalar_lea.hbm %s4195_s8, 256 }
  0x62   : > { %p3250_p3 = scmp.ne.s32.totalorder %s4195_s8, %s3249_s28  ;;  %p3256_p12 = scmp.lt.u32.totalorder %s3249_s28, %s4195_s8 }
  0x64   : > { %p3252_p8 = pnand %p3250_p3, %p3667_p2 }
  0x66   : > { %p3253_p10 = pneg %p3252_p8 }
  0x68   : > { %p3258_p1 = pnand %p3256_p12, %p3253_p10 }
  0x6a   : > { %3261 = shalt.err (!%p3258_p1)
}
  0x6b   : > { %s3262_s24 = scalar_lea.vmem %s551_s16, 256  ;;  %p3270_p7 = scmp.lt.s32.totalorder %s551_s16, %s551_s16 }
  0x6c   : > { %p3263_p4 = scmp.ne.s32.totalorder %s551_s16, %s3262_s24  ;;  %p3271_p9 = scmp.lt.s32.totalorder %s3262_s24, %s3262_s24 }
  0x6e   : > { %p3265_p5 = pnand %p3263_p4, %p3667_p2  ;;  %p3272_p11 = por %p3271_p9, %p3270_p7 }
  0x70   : > { %p3266_p6 = pneg %p3265_p5 }
  0x72   : > { %p3273_p13 = pnand %p3272_p11, %p3266_p6 }
  0x74   : > { %3276 = shalt.err (!%p3273_p13)
}
  0x75   : > { %3041 = dma.hbm_to_vmem [thread:$0]  (!%p3655_p0), %s4195_s8, 256, %s551_s16, [#allocation8], %s3447_s19, %s3447_s19, %s3448_s20  }
  0x76   : > { %s3277_s29 = scalar_lea.hbm %s4196_s9, 16 }
  0x77   : > { %p3278_p3 = scmp.ne.s32.totalorder %s4196_s9, %s3277_s29  ;;  %p3284_p12 = scmp.lt.u32.totalorder %s3277_s29, %s4196_s9 }
  0x79   : > { %p3280_p8 = pnand %p3278_p3, %p3667_p2 }
  0x7b   : > { %p3281_p10 = pneg %p3280_p8 }
  0x7d   : > { %p3286_p1 = pnand %p3284_p12, %p3281_p10 }
  0x7f   : > { %3289 = shalt.err (!%p3286_p1)
}
  0x80   : > { %s3290_s0 = scalar_lea.vmem %s565_s17, 16  ;;  %s3297_s19 = scalar_lea.vmem %s565_s17, 32 }
  0x81   : > { %p3291_p4 = scmp.ne.s32.totalorder %s565_s17, %s3290_s0  ;;  %p3298_p7 = scmp.lt.s32.totalorder %s565_s17, %s565_s17 }
  0x82   : > { %p3299_p9 = scmp.lt.s32.totalorder %s3297_s19, %s3290_s0 }
  0x83   : > { %p3293_p5 = pnand %p3291_p4, %p3667_p2 }
  0x84   : > { %p3300_p11 = por %p3299_p9, %p3298_p7 }
  0x85   : > { %p3294_p6 = pneg %p3293_p5 }
  0x87   : > { %p3301_p13 = pnand %p3300_p11, %p3294_p6 }
  0x89   : > { %3304 = shalt.err (!%p3301_p13)
}
  0x8a   : > { %3044 = dma.hbm_to_vmem [thread:$0]  (!%p3655_p0), %s4196_s9, 16, %s565_s17, [#allocation11]  }
  0x8b   : > { %p4255_p3 = scmp.ne.s32.totalorder %s4249_s3, 0 }
  0x8c   : > { %p4256_p8 = scmp.ne.s32.totalorder (!%p4255_p3), %s4250_s22, 0 }
  0x8d   : > { %620 = sbr.rel (%p4255_p3) target bundleno = 2859 (0xb2b), region = 92 }
  0x94   : > { %3394 = dma.done.wait (%p4256_p8), [#allocation5], 256  }
  0x95   : > { %3396 = vsyncadd (%p4256_p8), [#allocation5], 4294967040 }
  0x96   : > { %3398 = dma.done.wait (%p4256_p8), [#allocation8], 272  }
  0x97   : > { %3400 = vsyncadd (%p4256_p8), [#allocation8], 4294967024 }
  0x98   : > { %3402 = dma.done.wait (%p4256_p8), [#allocation11], 16  }
  0x99   : > { %3404 = vsyncadd (%p4256_p8), [#allocation11], 4294967280  ;;  %s3752_s18 = sand.u32 1, %s3419_s30   ;;  %p701_p0 = scmp.lt.s32.totalorder %s3431_s1, 1 }
  0x9a   : > { %s2793_s3 = sshll.u32 %s3752_s18, 3  ;;  %s2794_s27 = sshll.u32 %s3752_s18, 5 }
  0x9b   : > { %s702_s17 = scalar_select %p701_p0, %s3431_s1, 1 }
  0x9c   : > { %p703_p2 = scmp.lt.s32.totalorder %s3427_s21, 1  ;;  %s4257_s13 = sld [smem:[#allocation31_spill]] }
  0x9d   : > { %s2795_s28 = sshll.u32 %s702_s17, 1  ;;  %s2863_s24 = sshll.u32 %s702_s17, 3 }
  0x9e   : > { %s704_s7 = scalar_select %p703_p2, %s3427_s21, 1 }
  0x9f   : > { %s4258_s26 = sld [smem:[#allocation30_spill]]  ;;  %s3768_s19 = scalar_lea.vmem [#allocation12], %s2793_s3 }
  0xa0   : > { %s706_s29 = sadd.s32 %s2795_s28, %s704_s7  ;;  %s3770_s20 = scalar_lea.vmem [#allocation13], %s2794_s27 }
  0xa1   : > { %s2796_s23 = sshll.u32 %s706_s29, 3  ;;  %p2799_p10 = scmp.ne.s32.totalorder %s3427_s21, 0 }
  0xa2   : > { %s713_s14 = scalar_lea.vmem %s4257_s13, %s2863_s24  ;;  %v3150_v0 = vld [vmem:[%s4191_s4] sm:$0xff] (!%p2799_p10)   ;;  %v3451_v1 = vmov (!%p2799_p10), 0.0   ;;  %v3151_v2 = vld [vmem:[%s4191_s4 + $0x8] sm:$0xff] (!%p2799_p10)   ;;  %vm3452_vm0 = vmmov (!%p2799_p10), 0   ;;  %vm750_vm1 = vcmask (!%p2799_p10), 261120   ;;  %s3453_s7 = smov (!%p2799_p10), 112   ;;  %v884_v22 = vlaneseq (!%p2799_p10) }
  0xa3   : > { %719 = sbr.rel (%p2799_p10) target bundleno = 554 (0x22a), region = 112  ;;  %2904 = vmatprep.subr.bf16.mxu0 (!%p2799_p10), %v3451_v1  ;;  %2912 = vmatprep.subr.bf16.mxu1 (!%p2799_p10), %v3451_v1  ;;  %v3152_v3 = vld [vmem:[#allocation4] sm:$0xff] (!%p2799_p10)   ;;  %v3154_v4 = vld [vmem:[#allocation4 + $0x8] sm:$0xff] (!%p2799_p10)   ;;  %s3454_s15 = smov (!%p2799_p10), 120   ;;  %v2805_v14 = vld [vmem:[#allocation7] ss:$0 sm:$0xff] (!%p2799_p10) }
  0xa4   : > { %2905 = vmatpush3.bf16.msra.mxu0 (!%p2799_p10), %v3150_v0  ;;  %2908 = vmatprep.mubr.msk.bf16.mxu0 (!%p2799_p10), %vm3452_vm0, %v3451_v1  ;;  %v3153_v5 = vld [vmem:[%s713_s14] sm:$0xff] (!%p2799_p10)   ;;  %s3455_s22 = smov (!%p2799_p10), 104   ;;  %v3456_v20 = vmov (!%p2799_p10), 1983009808   ;;  %v3457_v23 = vmov (!%p2799_p10), 1934713408  }
  0xa5   : > { %s3766_s0 = scalar_lea.vmem %s4258_s26, %s2796_s23  ;;  %2906 = vmatprep.subr.bf16.mxu0 (!%p2799_p10), %v3451_v1  ;;  %2916 = vmatprep.mubr.msk.bf16.mxu1 (!%p2799_p10), %vm3452_vm0, %v3451_v1  ;;  %v2800_v6 = vld [vmem:[%s4192_s5] ss:$0 sm:$0xff] (!%p2799_p10)  ;;  %v882_v21 = vunpack.c.l.s4 (!%p2799_p10), %v3456_v20  ;;  %v914_v24 = vunpack.c.l.s4 (!%p2799_p10), %v3457_v23  ;;  %v885_v26 = vshrl.u32 (!%p2799_p10), %v884_v22, 7  ;;  %vm1155_vm2 = vcmask (!%p2799_p10), 64512  }
  0xa6   : > { %2913 = vmatpush3.bf16.msra.mxu1 (!%p2799_p10), %v3152_v3 }
  0xa7   : > { %2914 = vmatprep.subr.bf16.mxu1 (!%p2799_p10), %v3451_v1  ;;  %v883_v25 = vunpack.c.0.s8 (!%p2799_p10), %v882_v21  ;;  %v915_v29 = vunpack.c.0.s8 (!%p2799_p10), %v914_v24 }
  0xa8   : > { %2907 = vmatpush3.bf16.msra.mxu0 (!%p2799_p10), %v3151_v2 }
  0xa9   : > { %v3797_v30 = vsub.s32 (!%p2799_p10), %v883_v25, %v885_v26  ;;  %v3799_v37 = vsub.s32 (!%p2799_p10), %v915_v29, %v885_v26 }
  0xaa   : > { %2915 = vmatpush3.bf16.msra.mxu1 %v3154_v4 }
  0xab   : > { %2909 = vmatmul.mubr.msk.bf16.vlgmr.msra.gmra.mrb[0].mxu0 %vm750_vm1, %v3153_v5 }
  0xad   : > { %2917 = vmatmul.mubr.msk.bf16.vlgmr.msra.gmra.mrb[0].mxu1 %vm750_vm1, %v3153_v5 }
 0x17e   : > { %v788_v7 = vpop.f32.mrb[0].mxu0 }
 0x17f   : > { %v789_v8 = vadd.f32 %v2800_v6, %v788_v7  ;;  %v2910_v9 = vpop.f32.mrb[1].mxu0 }
 0x180   : > { %v791_v10 = vpop.f32.mrb[2].mxu0  ;;  %v852_v11 = vpop.f32.mrb[0].mxu1 }
 0x181   : > { %867 = vrot.lane.b32.xlu1 %v789_v8, %s3453_s7  ;;  %861 = vrot.lane.b32.xlu0 %v789_v8, %s3454_s15  ;;  %v2911_v12 = vpop.f32.mrb[3].mxu0  ;;  %v2918_v13 = vpop.f32.mrb[1].mxu1  ;;  %v3782_v16 = vadd.f32 %v2800_v6, %v791_v10  ;;  %v3784_v18 = vadd.f32 %v2805_v14, %v852_v11 }
 0x182   : > { %v855_v15 = vpop.f32.mrb[2].mxu1 }
 0x183   : > { %v2919_v17 = vpop.f32.mrb[3].mxu1  ;;  %v3789_v19 = vadd.f32 %v2805_v14, %v855_v15 }
 0x185   : > { %873 = vrot.lane.b32.xlu0 %v789_v8, %s3455_s22  ;;  %869 = vrot.lane.b32.xlu1 %v3782_v16, %s3453_s7 }
 0x189   : > { %1162 = vrot.lane.b32.xlu0 %v3784_v18, %s3454_s15  ;;  %875 = vrot.lane.b32.xlu1 %v3782_v16, %s3455_s22 }
 0x18d   : > { %1168 = vrot.lane.b32.xlu0 %v3784_v18, %s3453_s7  ;;  %1164 = vrot.lane.b32.xlu1 %v3789_v19, %s3454_s15 }
 0x191   : > { %1170 = vrot.lane.b32.xlu1 %v3789_v19, %s3453_s7  ;;  %863 = vrot.lane.b32.xlu0 %v3782_v16, %s3454_s15 }
 0x195   : > { %1176 = vrot.lane.b32.xlu1 %v3789_v19, %s3455_s22  ;;  %1174 = vrot.lane.b32.xlu0 %v3784_v18, %s3455_s22 }
 0x1f3   : > { %v868_v27 = vpop.permute.xlu1 %867  ;;  %v862_v28 = vpop.permute.xlu0 %861 }
 0x1f4   : > { %v879_v31 = vcombine.low %v789_v8, %v868_v27  ;;  %v880_v32 = vcombine.high %v789_v8, %v868_v27 }
 0x1f6   : > { %v887_v38 = vrot.slane %v879_v31, %v3797_v30  ;;  %v894_v39 = vrot.slane %v880_v32, %v3797_v30 }
 0x1f7   : > { %v874_v33 = vpop.permute.xlu0 %873  ;;  %v870_v34 = vpop.permute.xlu1 %869 }
 0x1f8   : > { %v895_v35 = vcombine.low %v862_v28, %v874_v33  ;;  %v896_v36 = vcombine.high %v862_v28, %v874_v33  ;;  %v947_v58 = vcombine.low %v3782_v16, %v870_v34  ;;  %v948_v59 = vcombine.high %v3782_v16, %v870_v34 }
 0x1fa   : > { %v903_v40 = vrot.slane %v895_v35, %v3797_v30  ;;  %v910_v41 = vrot.slane %v896_v36, %v3797_v30  ;;  %v955_v14 = vrot.slane %v947_v58, %v3797_v30  ;;  %v962_v15 = vrot.slane %v948_v59, %v3797_v30 }
 0x1fb   : > { %v3805_v42 = vpop.permute.xlu0 %1162  ;;  %v876_v43 = vpop.permute.xlu1 %875 }
 0x1fc   : > { %v911_v44 = vcombine.low %v887_v38, %v903_v40  ;;  %v912_v45 = vcombine.high %v887_v38, %v903_v40  ;;  %v927_v46 = vcombine.low %v894_v39, %v910_v41  ;;  %v928_v47 = vcombine.high %v894_v39, %v910_v41 }
 0x1fe   : > { %v919_v48 = vrot.slane %v911_v44, %v3799_v37  ;;  %v926_v49 = vrot.slane %v912_v45, %v3799_v37  ;;  %v935_v50 = vrot.slane %v927_v46, %v3799_v37  ;;  %v942_v51 = vrot.slane %v928_v47, %v3799_v37 }
 0x1ff   : > { %v1169_v52 = vpop.permute.xlu0 %1168  ;;  %v1165_v53 = vpop.permute.xlu1 %1164 }
 0x200   : > { %v1015_v54 = vcombine.low %v919_v48, %v926_v49  ;;  %v2809_v55 = vcombine.high %v919_v48, %v926_v49  ;;  %v1031_v56 = vcombine.low %v935_v50, %v942_v51  ;;  %v2810_v57 = vcombine.high %v935_v50, %v942_v51 }
 0x201   : > { %v1180_v0 = vcombine.low %v3784_v18, %v1169_v52  ;;  %v1181_v1 = vcombine.high %v3784_v18, %v1169_v52 }
 0x202   : > { %v1022_v60 = vrot.slane %v1015_v54, %v3797_v30  ;;  %v1030_v61 = vrot.slane %v2809_v55, %v3797_v30  ;;  %v1038_v62 = vrot.slane %v1031_v56, %v3797_v30  ;;  %v1046_v63 = vrot.slane %v2810_v57, %v3797_v30 }
 0x203   : > { %v1171_v2 = vpop.permute.xlu1 %1170  ;;  %v864_v3 = vpop.permute.xlu0 %863  ;;  %v3830_v16 = vrot.slane %v1180_v0, %v3797_v30  ;;  %v3833_v17 = vrot.slane %v1181_v1, %v3797_v30 }
 0x204   : > { %v1047_v4 = vcombine.low %v1022_v60, %v1030_v61  ;;  %v1048_v5 = vcombine.high %v1022_v60, %v1030_v61  ;;  %v1063_v6 = vcombine.low %v1038_v62, %v1046_v63  ;;  %v1064_v7 = vcombine.high %v1038_v62, %v1046_v63 }
 0x205   : > { %v1248_v8 = vcombine.low %v3789_v19, %v1171_v2  ;;  %v1249_v9 = vcombine.high %v3789_v19, %v1171_v2  ;;  %v963_v10 = vcombine.low %v864_v3, %v876_v43  ;;  %v964_v11 = vcombine.high %v864_v3, %v876_v43 }
 0x206   : > { %v3822_v12 = vrot.slane %v1047_v4, %v3799_v37  ;;  %v3825_v13 = vrot.slane %v1063_v6, %v3799_v37  ;;  %v3838_v21 = vrot.slane %v1048_v5, %v3799_v37  ;;  %v3841_v22 = vrot.slane %v1064_v7, %v3799_v37 }
 0x207   : > { %v971_v18 = vrot.slane %v963_v10, %v3797_v30  ;;  %v978_v19 = vrot.slane %v964_v11, %v3797_v30  ;;  %v1177_v20 = vpop.permute.xlu1 %1176  ;;  %v1256_v23 = vrot.slane %v1248_v8, %v3797_v30  ;;  %v1263_v24 = vrot.slane %v1249_v9, %v3797_v30  ;;  %v1175_v29 = vpop.permute.xlu0 %1174 }
 0x208   : > { %v1079_v31 = vcombine.low %v3822_v12, %v3825_v13  ;;  %v1080_v32 = vcombine.high %v3822_v12, %v3825_v13  ;;  %v1264_v33 = vcombine.low %v1165_v53, %v1177_v20  ;;  %v1265_v34 = vcombine.high %v1165_v53, %v1177_v20 }
 0x209   : > { %v979_v25 = vcombine.low %v955_v14, %v971_v18  ;;  %v980_v26 = vcombine.high %v955_v14, %v971_v18  ;;  %v995_v27 = vcombine.low %v962_v15, %v978_v19  ;;  %v996_v28 = vcombine.high %v962_v15, %v978_v19 }
 0x20a   : > { %v1272_v40 = vrot.slane %v1264_v33, %v3797_v30  ;;  %v1279_v41 = vrot.slane %v1265_v34, %v3797_v30  ;;  %v1196_v43 = vcombine.low %v3805_v42, %v1175_v29  ;;  %v1197_v44 = vcombine.high %v3805_v42, %v1175_v29 }
 0x20b   : > { %v987_v35 = vrot.slane %v979_v25, %v3799_v37  ;;  %v994_v36 = vrot.slane %v980_v26, %v3799_v37  ;;  %v1003_v38 = vrot.slane %v995_v27, %v3799_v37  ;;  %v1010_v39 = vrot.slane %v996_v28, %v3799_v37 }
 0x20c   : > { %v1280_v49 = vcombine.low %v1256_v23, %v1272_v40  ;;  %v1281_v50 = vcombine.high %v1256_v23, %v1272_v40  ;;  %v1296_v51 = vcombine.low %v1263_v24, %v1279_v41  ;;  %v1297_v52 = vcombine.high %v1263_v24, %v1279_v41 }
 0x20d   : > { %v1083_v45 = vcombine.low %v987_v35, %v994_v36  ;;  %v2811_v46 = vcombine.high %v987_v35, %v994_v36  ;;  %v1099_v47 = vcombine.low %v1003_v38, %v1010_v39  ;;  %v2812_v48 = vcombine.high %v1003_v38, %v1010_v39 }
 0x20e   : > { %v1288_v57 = vrot.slane %v1280_v49, %v3799_v37  ;;  %v1295_v42 = vrot.slane %v1281_v50, %v3799_v37  ;;  %v1304_v58 = vrot.slane %v1296_v51, %v3799_v37  ;;  %v1311_v59 = vrot.slane %v1297_v52, %v3799_v37 }
 0x20f   : > { %v1090_v53 = vrot.slane %v1083_v45, %v3797_v30  ;;  %v1098_v54 = vrot.slane %v2811_v46, %v3797_v30  ;;  %v1106_v55 = vrot.slane %v1099_v47, %v3797_v30  ;;  %v1114_v56 = vrot.slane %v2812_v48, %v3797_v30 }
 0x210   : > { %v1384_v0 = vcombine.low %v1288_v57, %v1295_v42  ;;  %v2815_v1 = vcombine.high %v1288_v57, %v1295_v42  ;;  %v1400_v2 = vcombine.low %v1304_v58, %v1311_v59  ;;  %v2816_v3 = vcombine.high %v1304_v58, %v1311_v59 }
 0x211   : > { %v1115_v60 = vcombine.low %v1090_v53, %v1098_v54  ;;  %v1116_v61 = vcombine.high %v1090_v53, %v1098_v54  ;;  %v1131_v62 = vcombine.low %v1106_v55, %v1114_v56  ;;  %v1132_v63 = vcombine.high %v1106_v55, %v1114_v56 }
 0x212   : > { %v1081_v8 = vcombine.low %v3838_v21, %v3841_v22  ;;  %v1082_v9 = vcombine.high %v3838_v21, %v3841_v22  ;;  %v1204_v10 = vrot.slane %v1196_v43, %v3797_v30  ;;  %v1211_v11 = vrot.slane %v1197_v44, %v3797_v30 }
 0x213   : > { %v1123_v4 = vrot.slane %v1115_v60, %v3799_v37  ;;  %v1130_v5 = vrot.slane %v1116_v61, %v3799_v37  ;;  %v1139_v6 = vrot.slane %v1131_v62, %v3799_v37  ;;  %v1146_v7 = vrot.slane %v1132_v63, %v3799_v37 }
 0x214   : > { %v1391_v18 = vrot.slane %v1384_v0, %v3797_v30  ;;  %v1399_v19 = vrot.slane %v2815_v1, %v3797_v30  ;;  %v1407_v20 = vrot.slane %v1400_v2, %v3797_v30  ;;  %v1415_v23 = vrot.slane %v2816_v3, %v3797_v30 }
 0x215   : > { %v1147_v12 = vcombine.low %v1123_v4, %v1139_v6  ;;  %v1148_v13 = vcombine.high %v1123_v4, %v1139_v6  ;;  %v1149_v14 = vcombine.low %v1130_v5, %v1146_v7  ;;  %v1150_v15 = vcombine.high %v1130_v5, %v1146_v7 }
 0x216   : > { %v1212_v22 = vcombine.low %v3830_v16, %v1204_v10  ;;  %v1213_v27 = vcombine.high %v3830_v16, %v1204_v10  ;;  %v1228_v28 = vcombine.low %v3833_v17, %v1211_v11  ;;  %v1229_v29 = vcombine.high %v3833_v17, %v1211_v11 }
 0x217   : > { %v1151_v24 = vpack.c.bf16 %v1147_v12, %v1079_v31  ;;  %v1152_v25 = vpack.c.bf16 %v1148_v13, %v1080_v32  ;;  %v1153_v26 = vpack.c.bf16 %v1149_v14, %v1081_v8  ;;  %v1154_v21 = vpack.c.bf16 %v1150_v15, %v1082_v9 }
 0x218   : > { %v1416_v31 = vcombine.low %v1391_v18, %v1399_v19  ;;  %v1417_v32 = vcombine.high %v1391_v18, %v1399_v19  ;;  %v1432_v33 = vcombine.low %v1407_v20, %v1415_v23  ;;  %v1433_v34 = vcombine.high %v1407_v20, %v1415_v23 }
 0x219   : > { %1156 = vst.msk [vmem:[#allocation2] sm:$0xff] %vm1155_vm2, %v1151_v24  ;;  %1157 = vst.msk [vmem:[#allocation2 + $0x8] sm:$0xff] %vm1155_vm2, %v1152_v25  ;;  %v1220_v35 = vrot.slane %v1212_v22, %v3799_v37  ;;  %v1227_v36 = vrot.slane %v1213_v27, %v3799_v37  ;;  %v1236_v38 = vrot.slane %v1228_v28, %v3799_v37 }
 0x21a   : > { %1158 = vst.msk [vmem:[#allocation2 + $0x10] sm:$0xff] %vm1155_vm2, %v1153_v26  ;;  %1159 = vst.msk [vmem:[#allocation2 + $0x18] sm:$0xff] %vm1155_vm2, %v1154_v21  ;;  %v1243_v39 = vrot.slane %v1229_v29, %v3799_v37  ;;  %v1424_v44 = vrot.slane %v1416_v31, %v3799_v37  ;;  %v1431_v17 = vrot.slane %v1417_v32, %v3799_v37 }
 0x21b   : > { %v1316_v40 = vcombine.low %v1220_v35, %v1227_v36  ;;  %v2813_v41 = vcombine.high %v1220_v35, %v1227_v36  ;;  %v1440_v45 = vrot.slane %v1432_v33, %v3799_v37  ;;  %v1447_v46 = vrot.slane %v1433_v34, %v3799_v37 }
 0x21c   : > { %v1332_v43 = vcombine.low %v1236_v38, %v1243_v39  ;;  %v2814_v16 = vcombine.high %v1236_v38, %v1243_v39 }
 0x21d   : > { %v1323_v47 = vrot.slane %v1316_v40, %v3797_v30  ;;  %v1331_v48 = vrot.slane %v2813_v41, %v3797_v30  ;;  %v1448_v55 = vcombine.low %v1424_v44, %v1440_v45  ;;  %v1449_v56 = vcombine.high %v1424_v44, %v1440_v45 }
 0x21e   : > { %v1339_v49 = vrot.slane %v1332_v43, %v3797_v30  ;;  %v1347_v50 = vrot.slane %v2814_v16, %v3797_v30  ;;  %v1450_v57 = vcombine.low %v1431_v17, %v1447_v46  ;;  %v1451_v42 = vcombine.high %v1431_v17, %v1447_v46 }
 0x21f   : > { %v1348_v51 = vcombine.low %v1323_v47, %v1331_v48  ;;  %v1349_v52 = vcombine.high %v1323_v47, %v1331_v48 }
 0x220   : > { %v1364_v53 = vcombine.low %v1339_v49, %v1347_v50  ;;  %v1365_v54 = vcombine.high %v1339_v49, %v1347_v50 }
 0x221   : > { %v1356_v58 = vrot.slane %v1348_v51, %v3799_v37  ;;  %v1363_v59 = vrot.slane %v1349_v52, %v3799_v37 }
 0x222   : > { %v1372_v60 = vrot.slane %v1364_v53, %v3799_v37  ;;  %v1379_v61 = vrot.slane %v1365_v54, %v3799_v37 }
 0x224   : > { %v1380_v62 = vcombine.low %v1356_v58, %v1372_v60  ;;  %v1381_v63 = vcombine.high %v1356_v58, %v1372_v60  ;;  %v1382_v0 = vcombine.low %v1363_v59, %v1379_v61  ;;  %v1383_v30 = vcombine.high %v1363_v59, %v1379_v61 }
 0x226   : > { %v1452_v1 = vpack.c.bf16 %v1448_v55, %v1380_v62  ;;  %v1453_v2 = vpack.c.bf16 %v1449_v56, %v1381_v63  ;;  %v1454_v3 = vpack.c.bf16 %v1450_v57, %v1382_v0  ;;  %v1455_v4 = vpack.c.bf16 %v1451_v42, %v1383_v30 }
 0x228   : > { %1456 = vst.msk [vmem:[#allocation3] sm:$0xff] %vm1155_vm2, %v1452_v1  ;;  %1457 = vst.msk [vmem:[#allocation3 + $0x8] sm:$0xff] %vm1155_vm2, %v1453_v2 }
 0x229   : > { %1458 = vst.msk [vmem:[#allocation3 + $0x10] sm:$0xff] %vm1155_vm2, %v1454_v3  ;;  %1459 = vst.msk [vmem:[#allocation3 + $0x18] sm:$0xff] %vm1155_vm2, %v1455_v4 }
 0x22a PF: > { %s4259_s29 = sld [smem:[#allocation32_spill]]  ;;  %v3458_v5 = vmov 0.0   ;;  %vm3459_vm3 = vmmov 0   ;;  %v3918_v7 = vld [vmem:[%s3766_s0] sm:$0xff]  ;;  %vm1485_vm4 = vcmask 261120   ;;  %s4260_s0 = sld [smem:[#allocation33_spill]]  ;;  %v1544_v25 = vlaneseq }
 0x22b   : > { %2920 = vmatprep.subr.bf16.mxu0 %v3458_v5  ;;  %2940 = vmatprep.subr.bf16.mxu1 %v3458_v5  ;;  %v1461_v8 = vpack.c.bf16 %v3918_v7, %v3918_v7  ;;  %s3460_s16 = smov 104   ;;  %s3461_s17 = smov 120   ;;  %v1679_v15 = vld [vmem:[#allocation2] sm:$0xff]  ;;  %vm1687_vm5 = vcmask 64512   ;;  %v1681_v18 = vld [vmem:[#allocation2 + $0x10] sm:$0xff]  ;;  %v1680_v1 = vld [vmem:[#allocation2 + $0x8] sm:$0xff] }
 0x22c   : > { %2924 = vmatprep.mubr.msk.bf16.mxu0 %vm3459_vm3, %v3458_v5  ;;  %2942 = vmatprep.mubr.msk.bf16.mxu1 %vm3459_vm3, %v3458_v5  ;;  %v1692_v19 = vsel %vm1687_vm5, %v1679_v15, 0  ;;  %v1784_v20 = vsel %vm1687_vm5, %v1681_v18, 0  ;;  %s3462_s28 = smov 112   ;;  %v3463_v23 = vmov 1983009808   ;;  %v1545_v27 = vshrl.u32 %v1544_v25, 7 }
 0x22d   : > { %2941 = vmatpush3.bf16.xpose.msra.mxu1 %v1784_v20  ;;  %v1542_v24 = vunpack.c.l.s4 %v3463_v23  ;;  %v3464_v26 = vmov 1934713408   ;;  %vm1872_vm6 = vcmask 130048   ;;  %s3465_s24 = smov 16   ;;  %s3466_s3 = smov 8   ;;  %vm2251_vm7 = vcmask 195584  }
 0x22e   : > { %2952 = vmatprep.subr.bf16.mxu1 %v3458_v5  ;;  %v1574_v21 = vunpack.c.l.s4 %v3464_v26  ;;  %s3467_s27 = smov 24   ;;  %s4263_s15 = sld [smem:[#allocation37_spill]] }
 0x22f   : > { %v1543_v22 = vunpack.c.0.s8 %v1542_v24  ;;  %s4264_s22 = sld [smem:[#allocation26_spill]]  ;;  %s2859_s13 = sshll.u32 %s3431_s1, 3 }
 0x230   : > { %v3155_v37 = vld [vmem:[%s4259_s29] sm:$0xff]   ;;  %v3156_v6 = vld [vmem:[%s4259_s29 + $0x8] sm:$0xff]   ;;  %v1575_v31 = vunpack.c.0.s8 %v1574_v21  ;;  %s2609_s14 = sadd.s32 %s3427_s21, %s2859_s13  ;;  %s2612_s2 = sshll.u32 %s3770_s20, 4  ;;  %s4092_s2 = int_to_ptr.vmem [resolvable:$true] %s2612_s2 }
 0x231   : > { %2921 = vmatpush3.bf16.msra.mxu0 %v3155_v37  ;;  %v2817_v9 = vld [vmem:[%s4260_s0] ss:$0 sm:$0xff]  ;;  %v3936_v32 = vsub.s32 %v1543_v22, %v1545_v27  ;;  %v1738_v37 = vsel %vm1687_vm5, %v1680_v1, 0  ;;  %v1685_v1 = vld [vmem:[#allocation3 + $0x10] sm:$0xff]  ;;  %s2860_s23 = sshll.u32 %s2609_s14, 7  ;;  %s4265_s0 = sld [smem:[#allocation41_spill]] }
 0x232   : > { %2922 = vmatprep.subr.bf16.mxu0 %v3458_v5  ;;  %v3938_v39 = vsub.s32 %v1575_v31, %v1545_v27  ;;  %s3468_s7 = smov [#allocation13]  }
 0x235   : > { %2923 = vmatpush3.bf16.msra.mxu0 %v3156_v6  ;;  %p4267_p1 = scmp.ne.s32.totalorder %s4264_s22, 0 }
 0x236   : > { %2928 = vmatprep.subr.bf16.mxu0 %v3458_v5 }
 0x238   : > { %2925 = vmatmul.mubr.msk.bf16.vlgmr.msra.gmra.mrb[0].mxu0 %vm1485_vm4, %v1461_v8 }
 0x239   : > { %2930 = vmatprep.mubr.msk.bf16.mxu0 %vm3459_vm3, %v3458_v5 }
 0x23e   : > { %2929 = vmatpush3.bf16.xpose.msra.mxu0 %v1692_v19 }
 0x23f   : > { %2934 = vmatprep.subr.bf16.mxu0 %v3458_v5 }
 0x30b   : > { %v1523_v10 = vpop.f32.mrb[0].mxu0 }
 0x30c   : > { %v1524_v11 = vadd.f32 %v2817_v9, %v1523_v10  ;;  %v2926_v12 = vpop.f32.mrb[1].mxu0  ;;  %v1682_v9 = vld [vmem:[#allocation2 + $0x18] sm:$0xff] }
 0x30d   : > { %v1526_v13 = vpop.f32.mrb[2].mxu0 }
 0x30e   : > { %1536 = vrot.lane.b32.xlu1 %v1524_v11, %s3460_s16  ;;  %1530 = vrot.lane.b32.xlu0 %v1524_v11, %s3461_s17  ;;  %v2927_v14 = vpop.f32.mrb[3].mxu0  ;;  %s4261_s16 = sld [smem:[#allocation36_spill]]  ;;  %s4266_s17 = smov %s4265_s0 }
 0x312   : > { %1533 = vrot.lane.b32.xlu0 %v1524_v11, %s3462_s28  ;;  %s4090_s28 = scalar_lea.hbm %s4265_s0, %s2860_s23 }
 0x380   : > { %v1537_v28 = vpop.permute.xlu1 %1536  ;;  %v1531_v29 = vpop.permute.xlu0 %1530 }
 0x381   : > { %v1555_v33 = vcombine.low %v1531_v29, %v1537_v28  ;;  %v1556_v34 = vcombine.high %v1531_v29, %v1537_v28 }
 0x383   : > { %v1563_v40 = vrot.slane %v1555_v33, %v3936_v32  ;;  %v1570_v41 = vrot.slane %v1556_v34, %v3936_v32 }
 0x384   : > { %v1534_v35 = vpop.permute.xlu0 %1533 }
 0x385   : > { %v1539_v36 = vcombine.low %v1524_v11, %v1534_v35  ;;  %v1540_v38 = vcombine.high %v1524_v11, %v1534_v35  ;;  %v1830_v11 = vsel %vm1687_vm5, %v1682_v9, 0 }
 0x387   : > { %v1547_v43 = vrot.slane %v1539_v36, %v3936_v32  ;;  %v1554_v16 = vrot.slane %v1540_v38, %v3936_v32 }
 0x389   : > { %v1571_v44 = vcombine.low %v1547_v43, %v1563_v40  ;;  %v1572_v17 = vcombine.high %v1547_v43, %v1563_v40  ;;  %v1587_v45 = vcombine.low %v1554_v16, %v1570_v41  ;;  %v1588_v46 = vcombine.high %v1554_v16, %v1570_v41 }
 0x38b   : > { %v1579_v47 = vrot.slane %v1571_v44, %v3938_v39  ;;  %v1586_v48 = vrot.slane %v1572_v17, %v3938_v39  ;;  %v1595_v49 = vrot.slane %v1587_v45, %v3938_v39  ;;  %v1602_v50 = vrot.slane %v1588_v46, %v3938_v39 }
 0x38d   : > { %v1607_v51 = vcombine.low %v1579_v47, %v1586_v48  ;;  %v2821_v52 = vcombine.high %v1579_v47, %v1586_v48  ;;  %v1623_v53 = vcombine.low %v1595_v49, %v1602_v50  ;;  %v2822_v54 = vcombine.high %v1595_v49, %v1602_v50 }
 0x38f   : > { %v1614_v55 = vrot.slane %v1607_v51, %v3936_v32  ;;  %v1622_v56 = vrot.slane %v2821_v52, %v3936_v32  ;;  %v1630_v57 = vrot.slane %v1623_v53, %v3936_v32  ;;  %v1638_v42 = vrot.slane %v2822_v54, %v3936_v32 }
 0x391   : > { %v1639_v58 = vcombine.low %v1614_v55, %v1622_v56  ;;  %v1655_v59 = vcombine.low %v1630_v57, %v1638_v42  ;;  %v1640_v60 = vcombine.high %v1614_v55, %v1622_v56  ;;  %v1656_v61 = vcombine.high %v1630_v57, %v1638_v42 }
 0x393   : > { %v1647_v62 = vrot.slane %v1639_v58, %v3938_v39  ;;  %v1663_v63 = vrot.slane %v1655_v59, %v3938_v39  ;;  %v1654_v0 = vrot.slane %v1640_v60, %v3938_v39  ;;  %v1670_v30 = vrot.slane %v1656_v61, %v3938_v39  ;;  %v1683_v58 = vld [vmem:[#allocation3] sm:$0xff]  ;;  %v1684_v59 = vld [vmem:[#allocation3 + $0x8] sm:$0xff] }
 0x395   : > { %v1671_v2 = vcombine.low %v1647_v62, %v1663_v63  ;;  %v1673_v3 = vcombine.low %v1654_v0, %v1670_v30  ;;  %v1672_v8 = vcombine.high %v1647_v62, %v1663_v63  ;;  %v1674_v12 = vcombine.high %v1654_v0, %v1670_v30 }
 0x397   : > { %v1675_v4 = vpack.c.bf16 %v1671_v2, %v1671_v2  ;;  %v1677_v6 = vpack.c.bf16 %v1673_v3, %v1673_v3  ;;  %v1676_v10 = vpack.c.bf16 %v1672_v8, %v1672_v8  ;;  %v1678_v13 = vpack.c.bf16 %v1674_v12, %v1674_v12 }
 0x399   : > { %2931 = vmatmul.mubr.msk.bf16.vlgmr.msra.gmra.mrb[4].mxu0 %vm1687_vm5, %v1675_v4  ;;  %2943 = vmatmul.mubr.msk.bf16.vlgmr.msra.gmra.mrb[0].mxu1 %vm1687_vm5, %v1677_v6  ;;  %v1686_v6 = vld [vmem:[#allocation3 + $0x18] sm:$0xff] }
 0x39a   : > { %2935 = vmatpush3.bf16.xpose.msra.mxu0 %v1738_v37  ;;  %2936 = vmatprep.mubr.msk.bf16.mxu0 %vm3459_vm3, %v3458_v5 }
 0x39b   : > { %2946 = vmatprep.subr.bf16.mxu0 %v3458_v5  ;;  %2954 = vmatprep.mubr.msk.bf16.mxu1 %vm3459_vm3, %v3458_v5 }
 0x39c   : > { %2953 = vmatpush3.bf16.msra.mxu1 %v1683_v58 }
 0x39d   : > { %2964 = vmatprep.subr.bf16.mxu1 %v3458_v5 }
 0x3a1   : > { %2937 = vmatmul.mubr.msk.bf16.vlgmr.msra.gmra.mrb[8].mxu0 %vm1687_vm5, %v1676_v10 }
 0x3a2   : > { %2947 = vmatpush3.bf16.xpose.msra.mxu0 %v1830_v11  ;;  %2948 = vmatprep.mubr.msk.bf16.mxu0 %vm3459_vm3, %v3458_v5 }
 0x3a3   : > { %2958 = vmatprep.subr.bf16.mxu0 %v3458_v5 }
 0x3a9   : > { %2949 = vmatmul.mubr.msk.bf16.vlgmr.msra.gmra.mrb[12].mxu0 %vm1687_vm5, %v1678_v13 }
 0x3aa   : > { %2960 = vmatprep.mubr.msk.bf16.mxu0 %vm3459_vm3, %v3458_v5  ;;  %2959 = vmatpush3.bf16.msra.mxu0 %v1684_v59 }
 0x3ab   : > { %2970 = vmatprep.subr.bf16.mxu0 %v3458_v5 }
 0x46c   : > { %v1728_v14 = vpop.f32.mrb[4].mxu0  ;;  %v1820_v15 = vpop.f32.mrb[0].mxu1 }
 0x46d   : > { %v2932_v18 = vpop.f32.mrb[5].mxu0  ;;  %v2944_v19 = vpop.f32.mrb[1].mxu1  ;;  %v1873_v20 = vsel %vm1872_vm6, %v1728_v14, -inf  ;;  %v1879_v31 = vsel %vm1872_vm6, %v1820_v15, -inf }
 0x46e   : > { %v1823_v23 = vpop.f32.mrb[2].mxu1  ;;  %1874 = vmax.xlane.f32.xlu1 %v1873_v20  ;;  %v1731_v24 = vpop.f32.mrb[6].mxu0 }
 0x46f   : > { %v2933_v25 = vpop.f32.mrb[7].mxu0  ;;  %v2945_v26 = vpop.f32.mrb[3].mxu1 }
 0x474   : > { %v1774_v21 = vpop.f32.mrb[8].mxu0 }
 0x475   : > { %v2938_v22 = vpop.f32.mrb[9].mxu0  ;;  %v1876_v27 = vsel %vm1872_vm6, %v1774_v21, -inf }
 0x476   : > { %1877 = vmax.xlane.f32.xlu0 %v1876_v27  ;;  %v1777_v28 = vpop.f32.mrb[10].mxu0 }
 0x477   : > { %v2939_v29 = vpop.f32.mrb[11].mxu0 }
 0x47a   : > { %1880 = vmax.xlane.f32.xlu0 %v1879_v31 }
 0x47c   : > { %v1866_v33 = vpop.f32.mrb[12].mxu0 }
 0x47d   : > { %v2950_v34 = vpop.f32.mrb[13].mxu0  ;;  %v1882_v35 = vsel %vm1872_vm6, %v1866_v33, -inf }
 0x47e   : > { %1883 = vmax.xlane.f32.xlu1 %v1882_v35  ;;  %v1869_v36 = vpop.f32.mrb[14].mxu0 }
 0x47f   : > { %v2951_v38 = vpop.f32.mrb[15].mxu0 }
 0x4fb   : > { %v1875_v40 = vpop.xlane.xlu1 %1874 }
 0x4fc   : > { %v1885_v41 = vsub.f32 %v1728_v14, %v1875_v40  ;;  %v3157_v14 = vld [vmem:[#allocation9] sm:$0xff]  }
 0x4fe   : > { %v1889_v43 = vmul.f32 1.442695, %v1885_v41 }
 0x500   : > { %3169 = vpow2.f32 %v1889_v43 }
 0x503   : > { %v1878_v16 = vpop.xlane.xlu0 %1877 }
 0x504   : > { %v1886_v44 = vsub.f32 %v1774_v21, %v1878_v16 }
 0x506   : > { %v1891_v17 = vmul.f32 1.442695, %v1886_v44 }
 0x507   : > { %v1881_v45 = vpop.xlane.xlu0 %1880 }
 0x508   : > { %3171 = vpow2.f32 %v1891_v17  ;;  %v1887_v46 = vsub.f32 %v1820_v15, %v1881_v45 }
 0x50a   : > { %v3170_v47 = vpop.eup %3169  ;;  %v1893_v48 = vmul.f32 1.442695, %v1887_v46 }
 0x50b   : > { %v1884_v49 = vpop.xlane.xlu1 %1883  ;;  %v1897_v50 = vsel %vm1872_vm6, %v3170_v47, 0.0 }
 0x50c   : > { %3173 = vpow2.f32 %v1893_v48  ;;  %v1888_v51 = vsub.f32 %v1866_v33, %v1884_v49  ;;  %1898 = vadd.xlane.f32.xlu0 %v1897_v50  ;;  %v3158_v48 = vld [vmem:[#allocation9 + $0x8] sm:$0xff]  }
 0x50e   : > { %v1895_v52 = vmul.f32 1.442695, %v1888_v51 }
 0x510   : > { %3175 = vpow2.f32 %v1895_v52 }
 0x512   : > { %v3172_v53 = vpop.eup %3171 }
 0x513   : > { %v1900_v54 = vsel %vm1872_vm6, %v3172_v53, 0.0 }
 0x514   : > { %1901 = vadd.xlane.f32.xlu1 %v1900_v54 }
 0x516   : > { %v3174_v55 = vpop.eup %3173 }
 0x517   : > { %v1903_v56 = vsel %vm1872_vm6, %v3174_v55, 0.0 }
 0x518   : > { %1904 = vadd.xlane.f32.xlu0 %v1903_v56 }
 0x51a   : > { %v3176_v57 = vpop.eup %3175 }
 0x51b   : > { %v1906_v42 = vsel %vm1872_vm6, %v3176_v57, 0.0 }
 0x51c   : > { %1907 = vadd.xlane.f32.xlu1 %v1906_v42 }
 0x599   : > { %v1899_v60 = vpop.xlane.xlu0 %1898 }
 0x59a   : > { %3177 = vrcp.f32 %v1899_v60 }
 0x5a1   : > { %v1902_v61 = vpop.xlane.xlu1 %1901 }
 0x5a2   : > { %3179 = vrcp.f32 %v1902_v61 }
 0x5a4   : > { %v3178_v62 = vpop.eup %3177 }
 0x5a5   : > { %v1917_v63 = vmul.f32 %v3178_v62, %v3170_v47  ;;  %v1905_v0 = vpop.xlane.xlu0 %1904 }
 0x5a6   : > { %3181 = vrcp.f32 %v1905_v0 }
 0x5a7   : > { %1921 = vst.msk [vmem:[%s3770_s20] sm:$0xff] %vm1872_vm6, %v1917_v63  ;;  %v1925_v30 = vpack.c.bf16 %v1917_v63, %v1917_v63 }
 0x5a9   : > { %2955 = vmatmul.mubr.msk.bf16.vlgmr.msra.gmra.mrb[4].mxu1 %vm1872_vm6, %v1925_v30  ;;  %v1908_v2 = vpop.xlane.xlu1 %1907 }
 0x5aa   : > { %3183 = vrcp.f32 %v1908_v2  ;;  %2965 = vmatpush3.bf16.msra.mxu1 %v1685_v1  ;;  %2966 = vmatprep.mubr.msk.bf16.mxu1 %vm3459_vm3, %v3458_v5 }
 0x5ab   : > { %2976 = vmatprep.subr.bf16.mxu1 %v3458_v5 }
 0x5ac   : > { %v3180_v3 = vpop.eup %3179 }
 0x5ad   : > { %v1918_v4 = vmul.f32 %v3180_v3, %v3172_v53 }
 0x5af   : > { %1922 = vst.msk [vmem:[%s3770_s20 + $0x8] sm:$0xff] %vm1872_vm6, %v1918_v4  ;;  %v1926_v37 = vpack.c.bf16 %v1918_v4, %v1918_v4 }
 0x5b0   : > { %v3182_v8 = vpop.eup %3181 }
 0x5b1   : > { %v1919_v9 = vmul.f32 %v3182_v8, %v3174_v55  ;;  %2961 = vmatmul.mubr.msk.bf16.vlgmr.msra.gmra.mrb[16].mxu0 %vm1872_vm6, %v1926_v37 }
 0x5b2   : > { %2971 = vmatpush3.bf16.msra.mxu0 %v1686_v6  ;;  %2972 = vmatprep.mubr.msk.bf16.mxu0 %vm3459_vm3, %v3458_v5 }
 0x5b3   : > { %1923 = vst.msk [vmem:[%s3770_s20 + $0x10] sm:$0xff] %vm1872_vm6, %v1919_v9  ;;  %v1927_v10 = vpack.c.bf16 %v1919_v9, %v1919_v9  ;;  %2984 = vmatprep.subr.bf16.mxu0 %v3458_v5 }
 0x5b4   : > { %v3184_v11 = vpop.eup %3183 }
 0x5b5   : > { %v1920_v12 = vmul.f32 %v3184_v11, %v3176_v57  ;;  %2967 = vmatmul.mubr.msk.bf16.vlgmr.msra.gmra.mrb[8].mxu1 %vm1872_vm6, %v1927_v10 }
 0x5b6   : > { %2980 = vmatprep.mubr.msk.bf16.mxu1 %vm3459_vm3, %v3458_v5  ;;  %2977 = vmatpush3.bf16.msra.mxu1 %v3157_v14 }
 0x5b7   : > { %1924 = vst.msk [vmem:[%s3770_s20 + $0x18] sm:$0xff] %vm1872_vm6, %v1920_v12  ;;  %v1928_v13 = vpack.c.bf16 %v1920_v12, %v1920_v12  ;;  %2978 = vmatprep.subr.bf16.mxu1 %v3458_v5 }
 0x5b9   : > { %2973 = vmatmul.mubr.msk.bf16.vlgmr.msra.gmra.mrb[20].mxu0 %vm1872_vm6, %v1928_v13  ;;  %v2833_v13 = vld [vmem:[#allocation10] ss:$0 sm:$0xff] }
 0x5ba   : > { %2988 = vmatprep.mubr.msk.bf16.mxu0 %vm3459_vm3, %v3458_v5  ;;  %2979 = vmatpush3.bf16.msra.mxu1 %v3158_v48  ;;  %v3164_v48 = vld [vmem:[%s4261_s16 + $0x18] sm:$0xff]  }
 0x5bb   : > { %2992 = vmatprep.subr.bf16.mxu1 %v3458_v5 }
 0x67c   : > { %v1966_v15 = vpop.f32.mrb[4].mxu1 }
 0x67d   : > { %v2956_v18 = vpop.f32.mrb[5].mxu1 }
 0x67e   : > { %v1969_v19 = vpop.f32.mrb[6].mxu1 }
 0x67f   : > { %v2957_v20 = vpop.f32.mrb[7].mxu1 }
 0x684   : > { %v2009_v23 = vpop.f32.mrb[16].mxu0 }
 0x685   : > { %v2962_v24 = vpop.f32.mrb[17].mxu0 }
 0x686   : > { %v2012_v25 = vpop.f32.mrb[18].mxu0 }
 0x687   : > { %v2963_v26 = vpop.f32.mrb[19].mxu0 }
 0x688   : > { %v2052_v21 = vpop.f32.mrb[8].mxu1 }
 0x689   : > { %v2101_v22 = vcombine.low %v1966_v15, %v2052_v21  ;;  %v2102_v27 = vcombine.high %v1966_v15, %v2052_v21  ;;  %v2968_v28 = vpop.f32.mrb[9].mxu1  ;;  %v3159_v21 = vld [vmem:[%s4199_s12] sm:$0xff]  }
 0x68a   : > { %v2055_v29 = vpop.f32.mrb[10].mxu1  ;;  %2985 = vmatpush3.bf16.msra.mxu0 %v3159_v21 }
 0x68b   : > { %v2969_v31 = vpop.f32.mrb[11].mxu1  ;;  %v2109_v40 = vrot.slane %v2101_v22, %v3936_v32  ;;  %v2116_v41 = vrot.slane %v2102_v27, %v3936_v32  ;;  %v3160_v22 = vld [vmem:[%s4199_s12 + $0x8] sm:$0xff]   ;;  %2986 = vmatprep.subr.bf16.mxu0 %v3458_v5 }
 0x68c   : > { %v2095_v33 = vpop.f32.mrb[20].mxu0 }
 0x68d   : > { %v2117_v34 = vcombine.low %v2009_v23, %v2095_v33  ;;  %v2118_v35 = vcombine.high %v2009_v23, %v2095_v33  ;;  %v2974_v36 = vpop.f32.mrb[21].mxu0 }
 0x68e   : > { %v2098_v38 = vpop.f32.mrb[22].mxu0  ;;  %2987 = vmatpush3.bf16.msra.mxu0 %v3160_v22 }
 0x68f   : > { %v2125_v43 = vrot.slane %v2117_v34, %v3936_v32  ;;  %v2132_v16 = vrot.slane %v2118_v35, %v3936_v32  ;;  %v2975_v44 = vpop.f32.mrb[23].mxu0 }
 0x691   : > { %v2133_v17 = vcombine.low %v2109_v40, %v2125_v43  ;;  %v2134_v45 = vcombine.high %v2109_v40, %v2125_v43  ;;  %v2149_v46 = vcombine.low %v2116_v41, %v2132_v16  ;;  %v2150_v47 = vcombine.high %v2116_v41, %v2132_v16  ;;  %v2837_v40 = vld [vmem:[%s4197_s10] ss:$0 sm:$0xff] }
 0x692   : > { %v2838_v43 = vld [vmem:[%s4198_s11] ss:$0 sm:$0xff] }
 0x693   : > { %v2141_v49 = vrot.slane %v2133_v17, %v3938_v39  ;;  %v2148_v50 = vrot.slane %v2134_v45, %v3938_v39  ;;  %v2157_v51 = vrot.slane %v2149_v46, %v3938_v39  ;;  %v2164_v52 = vrot.slane %v2150_v47, %v3938_v39  ;;  %v3161_v45 = vld [vmem:[%s4261_s16] sm:$0xff]   ;;  %v3162_v46 = vld [vmem:[%s4261_s16 + $0x8] sm:$0xff]   ;;  %v3163_v47 = vld [vmem:[%s4261_s16 + $0x10] sm:$0xff]  }
 0x695   : > { %v2169_v53 = vcombine.low %v2141_v49, %v2148_v50  ;;  %v2831_v54 = vcombine.high %v2141_v49, %v2148_v50  ;;  %v2185_v55 = vcombine.low %v2157_v51, %v2164_v52  ;;  %v2832_v56 = vcombine.high %v2157_v51, %v2164_v52  ;;  %v3165_v49 = vld [vmem:[%s4261_s16 + $0x20] sm:$0xff]   ;;  %v3166_v50 = vld [vmem:[%s4261_s16 + $0x28] sm:$0xff]   ;;  %v3167_v51 = vld [vmem:[%s4261_s16 + $0x30] sm:$0xff]  }
 0x696   : > { %v3168_v52 = vld [vmem:[%s4261_s16 + $0x38] sm:$0xff]  }
 0x697   : > { %v2176_v57 = vrot.slane %v2169_v53, %v3936_v32  ;;  %v2184_v42 = vrot.slane %v2831_v54, %v3936_v32  ;;  %v2192_v58 = vrot.slane %v2185_v55, %v3936_v32  ;;  %v2200_v59 = vrot.slane %v2832_v56, %v3936_v32 }
 0x699   : > { %v2202_v60 = vcombine.high %v2176_v57, %v2184_v42  ;;  %v2218_v61 = vcombine.high %v2192_v58, %v2200_v59  ;;  %v2201_v62 = vcombine.low %v2176_v57, %v2184_v42  ;;  %v2217_v63 = vcombine.low %v2192_v58, %v2200_v59 }
 0x69b   : > { %v2216_v0 = vrot.slane %v2202_v60, %v3938_v39  ;;  %v2232_v30 = vrot.slane %v2218_v61, %v3938_v39  ;;  %v2209_v1 = vrot.slane %v2201_v62, %v3938_v39  ;;  %v2225_v2 = vrot.slane %v2217_v63, %v3938_v39 }
 0x69d   : > { %v2235_v3 = vcombine.low %v2216_v0, %v2232_v30  ;;  %v2234_v4 = vcombine.high %v2209_v1, %v2225_v2  ;;  %v2236_v37 = vcombine.high %v2216_v0, %v2232_v30  ;;  %v2233_v6 = vcombine.low %v2209_v1, %v2225_v2  ;;  %v2844_v1 = vld [vmem:[%s4263_s15] ss:$0 sm:$0xff]  ;;  %s3309_s15 = sshll.u32 %s3468_s7, 4  ;;  %s3310_s15 = int_to_ptr.vmem [resolvable:$false] %s3309_s15 }
 0x69e   : > { %s3311_s20 = scalar_lea.vmem %s3310_s15, 1024  ;;  %p3312_p6 = scmp.lt.s32.totalorder %s4092_s2, %s3310_s15 }
 0x69f   : > { %2242 = vrot.lane.b32.xlu1 %v2235_v3, %s3465_s24  ;;  %2238 = vrot.lane.b32.xlu0 %v2234_v4, %s3466_s3  ;;  %s4262_s24 = sld [smem:[#allocation35_spill]] }
 0x6a3   : > { %2246 = vrot.lane.b32.xlu1 %v2236_v37, %s3467_s27  ;;  %s3305_s27 = scalar_lea.vmem %s4092_s2, 512 }
 0x6a4   : > { %p3306_p12 = scmp.ne.s32.totalorder %s4092_s2, %s3305_s27  ;;  %p3313_p7 = scmp.lt.s32.totalorder %s3311_s20, %s3305_s27 }
 0x6a5   : > { %v2839_v53 = vld [vmem:[%s4262_s24] ss:$0 sm:$0xff]  ;;  %s2583_s24 = scalar_lea.sflag [#allocation14], %s3752_s18 }
 0x6a6   : > { %p3307_p4 = pnand %p3306_p12, %p4267_p1  ;;  %p3314_p9 = por %p3313_p7, %p3312_p6 }
 0x6a8   : > { %p3308_p5 = pneg %p3307_p4 }
 0x6aa   : > { %p3315_p11 = pnand %p3314_p9, %p3308_p5 }
 0x711   : > { %v2243_v32 = vpop.permute.xlu1 %2242  ;;  %v2239_v8 = vpop.permute.xlu0 %2238 }
 0x712   : > { %v2249_v9 = vsel %vm1687_vm5, %v2233_v6, %v2239_v8 }
 0x713   : > { %v2250_v11 = vsel %vm1872_vm6, %v2249_v9, %v2243_v32 }
 0x715   : > { %v2247_v10 = vpop.permute.xlu1 %2246 }
 0x716   : > { %v2252_v39 = vsel %vm2251_vm7, %v2250_v11, %v2247_v10 }
 0x717   : > { %v2253_v12 = vpack.c.bf16 %v2252_v39, %v2252_v39 }
 0x719   : > { %2981 = vmatmul.mubr.msk.bf16.vlgmr.msra.gmra.mrb[12].mxu1 %vm1485_vm4, %v2253_v12 }
 0x71a   : > { %3008 = vmatprep.mubr.msk.bf16.mxu1 %vm3459_vm3, %v3458_v5  ;;  %2993 = vmatpush3.bf16.msra.mxu1 %v3161_v45 }
 0x71b   : > { %2994 = vmatprep.subr.bf16.mxu1 %v3458_v5 }
 0x71e   : > { %2995 = vmatpush3.bf16.msra.mxu1 %v3162_v46 }
 0x71f   : > { %2996 = vmatprep.subr.bf16.mxu1 %v3458_v5 }
 0x722   : > { %2997 = vmatpush3.bf16.msra.mxu1 %v3163_v47 }
 0x723   : > { %2998 = vmatprep.subr.bf16.mxu1 %v3458_v5 }
 0x726   : > { %2999 = vmatpush3.bf16.msra.mxu1 %v3164_v48 }
 0x727   : > { %3000 = vmatprep.subr.bf16.mxu1 %v3458_v5 }
 0x72a   : > { %3001 = vmatpush3.bf16.msra.mxu1 %v3165_v49 }
 0x72b   : > { %3002 = vmatprep.subr.bf16.mxu1 %v3458_v5 }
 0x72e   : > { %3003 = vmatpush3.bf16.msra.mxu1 %v3166_v50 }
 0x72f   : > { %3004 = vmatprep.subr.bf16.mxu1 %v3458_v5 }
 0x732   : > { %3005 = vmatpush3.bf16.msra.mxu1 %v3167_v51 }
 0x733   : > { %3006 = vmatprep.subr.bf16.mxu1 %v3458_v5 }
 0x736   : > { %3007 = vmatpush3.bf16.msra.mxu1 %v3168_v52 }
 0x7ec   : > { %v2314_v14 = vpop.f32.mrb[12].mxu1 }
 0x7ed   : > { %v2315_v15 = vadd.f32 %v2833_v13, %v2314_v14  ;;  %v2982_v18 = vpop.f32.mrb[13].mxu1 }
 0x7ee   : > { %v2317_v19 = vpop.f32.mrb[14].mxu1 }
 0x7ef   : > { %v2320_v20 = vadd.f32 %v2315_v15, %v3918_v7  ;;  %v2983_v23 = vpop.f32.mrb[15].mxu1 }
 0x7f1   : > { %v2323_v24 = vsel %vm1485_vm4, %v2320_v20, 0.0  ;;  %v2328_v25 = vmul.f32 %v2320_v20, %v2320_v20 }
 0x7f2   : > { %2324 = vadd.xlane.f32.xlu0 %v2323_v24 }
 0x7f3   : > { %v2329_v26 = vsel %vm1485_vm4, %v2328_v25, 0.0 }
 0x7f4   : > { %2330 = vadd.xlane.f32.xlu1 %v2329_v26 }
 0x87f   : > { %v2325_v7 = vpop.xlane.xlu0 %2324 }
 0x880   : > { %v2327_v27 = vmul.f32 0.03125, %v2325_v7 }
 0x881   : > { %v2331_v28 = vpop.xlane.xlu1 %2330 }
 0x882   : > { %v2333_v29 = vmul.f32 %v2327_v27, %v2327_v27  ;;  %v2332_v31 = vmul.f32 0.03125, %v2331_v28  ;;  %v2336_v36 = vsub.f32 %v2320_v20, %v2327_v27 }
 0x884   : > { %v2334_v33 = vsub.f32 %v2332_v31, %v2333_v29 }
 0x886   : > { %v2335_v34 = vmax.f32 %v2334_v33, 0.0 }
 0x888   : > { %v2337_v35 = vadd.f32 1e-05, %v2335_v34 }
 0x88a   : > { %3185 = vrsqrt.f32 %v2337_v35 }
 0x894   : > { %v3186_v38 = vpop.eup %3185 }
 0x895   : > { %v2339_v41 = vmul.f32 %v3186_v38, %v2336_v36 }
 0x897   : > { %v2346_v16 = vmul.f32 %v2837_v40, %v2339_v41 }
 0x899   : > { %v2353_v44 = vadd.f32 %v2838_v43, %v2346_v16 }
 0x89b   : > { %v2354_v17 = vpack.c.bf16 %v2353_v44, %v2353_v44 }
 0x89d   : > { %2989 = vmatmul.mubr.msk.bf16.vlgmr.msra.gmra.mrb[24].mxu0 %vm1485_vm4, %v2354_v17 }
 0x970   : > { %v2415_v54 = vpop.f32.mrb[24].mxu0 }
 0x971   : > { %v2416_v55 = vadd.f32 %v2839_v53, %v2415_v54  ;;  %v2990_v56 = vpop.f32.mrb[25].mxu0 }
 0x972   : > { %v2418_v57 = vpop.f32.mrb[26].mxu0 }
 0x973   : > { %v2421_v42 = vpack.c.bf16 %v2416_v55, %v2416_v55  ;;  %v2991_v58 = vpop.f32.mrb[27].mxu0 }
 0x975   : > { %v2843_v59 = vmul.bf16 3216621497, %v2421_v42 }
 0x977   : > { %3187 = vpow.bf16 %v2843_v59 }
 0x982   : > { %v3188_v60 = vpop.eup %3187 }
 0x983   : > { %v2426_v61 = vadd.bf16 1065369472, %v3188_v60 }
 0x985   : > { %3189 = vrcp.bf16 %v2426_v61 }
 0x990   : > { %v3190_v5 = vpop.eup %3189 }
 0x991   : > { %v2428_v62 = vmul.bf16 1065369472, %v3190_v5 }
 0x993   : > { %v2429_v63 = vunpack.c.l.bf16 %v2428_v62 }
 0x995   : > { %v2430_v0 = vmul.f32 %v2429_v63, %v2416_v55 }
 0x997   : > { %v2431_v30 = vpack.c.bf16 %v2430_v0, %v2430_v0 }
 0x999   : > { %3009 = vmatmul.mubr.bf16.vlgmr.msra.gmra.mrb[16].mxu1 %v2431_v30 }
 0xa6c   : > { %v2537_v2 = vpop.f32.mrb[16].mxu1 }
 0xa6d   : > { %v2538_v3 = vadd.f32 %v2844_v1, %v2537_v2  ;;  %v3010_v4 = vpop.f32.mrb[17].mxu1 }
 0xa6e   : > { %v2540_v37 = vpop.f32.mrb[18].mxu1 }
 0xa6f   : > { %v2543_v6 = vadd.f32 %v2538_v3, %v2353_v44  ;;  %v3011_v32 = vpop.f32.mrb[19].mxu1 }
 0xa71   : > { %v2546_v8 = vsel %vm1485_vm4, %v2543_v6, 0.0  ;;  %v2550_v9 = vmul.f32 %v2543_v6, %v2543_v6 }
 0xa72   : > { %2547 = vadd.xlane.f32.xlu0 %v2546_v8 }
 0xa73   : > { %v2551_v10 = vsel %vm1485_vm4, %v2550_v9, 0.0 }
 0xa76   : > { %2552 = vadd.xlane.f32.xlu0 %v2551_v10 }
 0xa77   : > { %3318 = shalt.err (!%p3315_p11)
}
 0xa78   : > { %s3319_s13 = scalar_lea.hbm %s4090_s28, 512  ;;  %s3323_s25 = scalar_lea.hbm %s4266_s17, 2048 }
 0xa79   : > { %p3320_p13 = scmp.ne.s32.totalorder %s4090_s28, %s3319_s13  ;;  %p3324_p0 = scmp.lt.u32.totalorder %s4090_s28, %s4266_s17 }
 0xa7a   : > { %p3325_p2 = scmp.lt.u32.totalorder %s3323_s25, %s3319_s13  ;;  %p3327_p12 = scmp.lt.u32.totalorder %s3319_s13, %s4090_s28 }
 0xa7b   : > { %p3321_p3 = pnand %p3320_p13, %p4267_p1 }
 0xa7c   : > { %p3326_p10 = por %p3325_p2, %p3324_p0 }
 0xa7d   : > { %p3322_p8 = pneg %p3321_p3 }
 0xa7e   : > { %p3328_p4 = por %p3327_p12, %p3326_p10 }
 0xa80   : > { %p3329_p5 = pnand %p3328_p4, %p3322_p8 }
 0xa82   : > { %3332 = shalt.err (!%p3329_p5)
}
 0xa83   : > { %s3469_s27 = smov 128   ;;  %s3470_s7 = smov 256  }
 0xa84   : > { %3029 = dma.vmem_to_hbm [thread:$0]  (%p4267_p1), %s4092_s2, 512, %s4090_s28, %s2583_s24, %s3469_s27, %s3470_s7, %s3466_s3  }
 0xa85   : > { %s2857_s15 = sshll.u32 %s3431_s1, 1  ;;  %s4268_s3 = sld [smem:[#allocation38_spill]] }
 0xa86   : > { %s2594_s20 = sadd.s32 %s3427_s21, %s2857_s15  ;;  %s4269_s24 = sld [smem:[#allocation39_spill]] }
 0xa87   : > { %s2858_s23 = sshll.u32 %s2594_s20, 7  ;;  %s2598_s25 = sshll.u32 %s3768_s19, 4  ;;  %s4133_s25 = int_to_ptr.vmem [resolvable:$true] %s2598_s25 }
 0xa88   : > { %s4270_s1 = sld [smem:[#allocation40_spill]]  ;;  %s2578_s21 = scalar_lea.sflag [#allocation6], %s3752_s18 }
 0xa89   : > { %s3333_s15 = scalar_lea.vmem %s4133_s25, 128  ;;  %s3471_s20 = smov [#allocation12]  }
 0xa8a   : > { %p3334_p6 = scmp.ne.s32.totalorder %s4133_s25, %s3333_s15  ;;  %s3337_s13 = sshll.u32 %s3471_s20, 4  ;;  %s3338_s13 = int_to_ptr.vmem [resolvable:$false] %s3337_s13 }
 0xa8b   : > { %v2853_v24 = vld [vmem:[%s4268_s3] ss:$0 sm:$0xff]  ;;  %s3339_s14 = scalar_lea.vmem %s3338_s13, 256  ;;  %p3340_p11 = scmp.lt.s32.totalorder %s4133_s25, %s3338_s13 }
 0xa8c   : > { %v2854_v26 = vld [vmem:[%s4269_s24] ss:$0 sm:$0xff]  ;;  %p3335_p7 = pnand %p3334_p6, %p4267_p1  ;;  %p3341_p13 = scmp.lt.s32.totalorder %s3339_s14, %s3333_s15 }
 0xa8e   : > { %s4271_s27 = smov %s4270_s1  ;;  %s4131_s7 = scalar_lea.hbm %s4270_s1, %s2858_s23 }
 0xa8f   : > { %p3336_p9 = pneg %p3335_p7  ;;  %p3342_p3 = por %p3341_p13, %p3340_p11 }
 0xa91   : > { %p3343_p8 = pnand %p3342_p3, %p3336_p9 }
 0xaff   : > { %v2548_v11 = vpop.xlane.xlu0 %2547 }
 0xb00   : > { %v2549_v39 = vmul.f32 0.03125, %v2548_v11 }
 0xb02   : > { %v2555_v13 = vmul.f32 %v2549_v39, %v2549_v39  ;;  %v2558_v20 = vsub.f32 %v2543_v6, %v2549_v39 }
 0xb03   : > { %v2553_v12 = vpop.xlane.xlu0 %2552 }
 0xb04   : > { %v2554_v14 = vmul.f32 0.03125, %v2553_v12 }
 0xb06   : > { %v2556_v15 = vsub.f32 %v2554_v14, %v2555_v13 }
 0xb08   : > { %v2557_v18 = vmax.f32 %v2556_v15, 0.0 }
 0xb0a   : > { %v2559_v19 = vadd.f32 1e-05, %v2557_v18 }
 0xb0c   : > { %3191 = vrsqrt.f32 %v2559_v19 }
 0xb16   : > { %v3192_v23 = vpop.eup %3191 }
 0xb17   : > { %v2561_v25 = vmul.f32 %v3192_v23, %v2558_v20 }
 0xb19   : > { %v2568_v21 = vmul.f32 %v2853_v24, %v2561_v25 }
 0xb1b   : > { %v2575_v22 = vadd.f32 %v2854_v26, %v2568_v21 }
 0xb1d   : > { %2576 = vst.msk [vmem:[%s3768_s19] sm:$0xff] %vm1485_vm4, %v2575_v22 }
 0xb1e   : > { %3346 = shalt.err (!%p3343_p8)
}
 0xb1f   : > { %s3347_s18 = scalar_lea.hbm %s4131_s7, 128  ;;  %s3351_s2 = scalar_lea.hbm %s4271_s27, 512 }
 0xb20   : > { %p3348_p0 = scmp.ne.s32.totalorder %s4131_s7, %s3347_s18  ;;  %p3352_p12 = scmp.lt.u32.totalorder %s4131_s7, %s4271_s27 }
 0xb21   : > { %p3353_p4 = scmp.lt.u32.totalorder %s3351_s2, %s3347_s18  ;;  %p3355_p6 = scmp.lt.u32.totalorder %s3347_s18, %s4131_s7 }
 0xb22   : > { %p3349_p2 = pnand %p3348_p0, %p4267_p1 }
 0xb23   : > { %p3354_p5 = por %p3353_p4, %p3352_p12 }
 0xb24   : > { %p3350_p10 = pneg %p3349_p2 }
 0xb25   : > { %p3356_p7 = por %p3355_p6, %p3354_p5 }
 0xb27   : > { %p3357_p9 = pnand %p3356_p7, %p3350_p10 }
 0xb29   : > { %3360 = shalt.err (!%p3357_p9)
}
 0xb2a   : > { %3028 = dma.vmem_to_hbm [thread:$0]  (%p4267_p1), %s4133_s25, 128, %s4131_s7, %s2578_s21  }
 0xb2b PF: > { %s4272_s23 = sld [smem:[#allocation24_spill]]  ;;  %s4273_s26 = sld [smem:[#allocation20_spill]] }
 0xb2c   : > { %s4274_s0 = sld [smem:[#allocation28_spill]] }
 0xb31   : > { %p3060_p11 = scmp.ge.s32.totalorder %s4272_s23, 2  ;;  %s2627_s1 = sand.u32 1, %s4273_s26  }
 0xb32   : > { %p4275_p13 = scmp.ne.s32.totalorder %s4274_s0, 0  ;;  %s2628_s15 = scalar_lea.sflag [#allocation6], %s2627_s1 }
 0xb34   : > { %p3046_p3 = pnand %p3060_p11, %p4275_p13 }
 0xb36   : > { %3406 = dma.done.wait (!%p3046_p3), %s2628_s15, 128  }
 0xb37   : > { %3408 = vsyncadd (!%p3046_p3), %s2628_s15, 4294967168  ;;  %s2637_s20 = scalar_lea.sflag [#allocation14], %s2627_s1 }
 0xb38   : > { %3410 = dma.done.wait (!%p3046_p3), %s2637_s20, 512  }
 0xb39   : > { %3412 = vsyncadd (!%p3046_p3), %s2637_s20, 4294966784  ;;  %s39_s23 = sadd.s32 1, %s4272_s23   ;;  %s4276_s22 = sld [smem:[#allocation21_spill]] }
 0xb3a   : > { %p36_p8 = scmp.ge.s32.totalorder %s39_s23, 6   ;;  %s4277_s20 = sld [smem:[#allocation29_spill]] }
 0xb3b   : > { %s4278_s21 = sld [smem:[#allocation22_spill]]  ;;  %s4279_s1 = sld [smem:[#allocation23_spill]] }
 0xb3c   : > { %s4280_s25 = sld [smem:[#allocation25_spill]]  ;;  %s4281_s2 = sld [smem:[#allocation27_spill]] }
 0xb3d   : > { %s4282_s0 = smov %s3419_s30  ;;  %38 = sbr.rel (!%p36_p8) target bundleno = 23 (0x17), region = 168 }
 0xb3f   : > { %s4283_s30 = smov %s4276_s22 }
 0xb42   : > { %s4284_s22 = smov %s4280_s25 }
 0xb44   :  { %2642 = vsyncpa [#allocation5], 1 }
 0xb45   :  { %2644 = vsyncpa [#allocation5 + $0x1], 1 }
 0xb46   :  { %2645 = vsyncpa [#allocation8], 1 }
 0xb47   :  { %2646 = vsyncpa [#allocation11], 1 }
 0xb48   :  { %2647 = vsyncpa [#allocation6], 1 }
 0xb49   :  { %2649 = vsyncpa [#allocation6 + $0x1], 1 }
 0xb4a   :  { %2650 = vsyncpa [#allocation14], 1 }
 0xb4b   :  { %2652 = vsyncpa [#allocation14 + $0x1], 1 }

// kernel: tpu_custom_call.1
= control target key start
LH: loop header
LB: loop body
LE: loop exit
PB: predicated region body
PF: predicated region fallthrough
CT: control target
= control target key end

     0   :  { %s4187_s0 = inlined_call_operand.vmem [shape: f32[2,16,32], index: 0, kind: input, shape index: {}]   ;;  %s4188_s1 = inlined_call_operand.vmem [shape: bf16[2,16,32], index: 1, kind: input, shape index: {}]   ;;  %s4189_s2 = inlined_call_operand.vmem [shape: bf16[32,32], index: 2, kind: input, shape index: {}]   ;;  %s4190_s3 = inlined_call_operand.vmem [shape: f32[1,32], index: 3, kind: input, shape index: {}]   ;;  %s4191_s4 = inlined_call_operand.vmem [shape: bf16[32,32], index: 4, kind: input, shape index: {}]   ;;  %s4192_s5 = inlined_call_operand.vmem [shape: f32[1,32], index: 5, kind: input, shape index: {}]   ;;  %s4193_s6 = inlined_call_operand.hbm [shape: bf16[32,32], index: 6, kind: input, shape index: {}]   ;;  %s4194_s7 = inlined_call_operand.hbm [shape: f32[1,32], index: 7, kind: input, shape index: {}]   ;;  %s4195_s8 = inlined_call_operand.hbm [shape: bf16[32,32], index: 8, kind: input, shape index: {}]   ;;  %s4196_s9 = inlined_call_operand.hbm [shape: f32[1,32], index: 9, kind: input, shape index: {}]   ;;  %s4197_s10 = inlined_call_operand.vmem [shape: f32[1,32], index: 10, kind: input, shape index: {}]   ;;  %s4198_s11 = inlined_call_operand.vmem [shape: f32[1,32], index: 11, kind: input, shape index: {}]   ;;  %s4199_s12 = inlined_call_operand.vmem [shape: bf16[32,128], index: 12, kind: input, shape index: {}]   ;;  %s4200_s13 = inlined_call_operand.vmem [shape: f32[1,128], index: 13, kind: input, shape index: {}]   ;;  %s4201_s14 = inlined_call_operand.vmem [shape: bf16[128,32], index: 14, kind: input, shape index: {}]   ;;  %s4202_s15 = inlined_call_operand.vmem [shape: f32[1,32], index: 15, kind: input, shape index: {}]   ;;  %s4203_s16 = inlined_call_operand.vmem [shape: f32[1,32], index: 16, kind: input, shape index: {}]   ;;  %s4204_s17 = inlined_call_operand.vmem [shape: f32[1,32], index: 17, kind: input, shape index: {}]   ;;  %s4205_s18 = inlined_call_operand.hbm [shape: f32[2,16,32], index: 18, kind: output, shape index: {0}]   ;;  %s4206_s19 = inlined_call_operand.hbm [shape: f32[2,4,16,16], index: 19, kind: output, shape index: {1}]  }
   0x1   :  { %4226 = sst [smem:[#allocation30_spill]] %s4187_s0 }
   0x2   :  { %4227 = sst [smem:[#allocation31_spill]] %s4188_s1 }
   0x3   :  { %4228 = sst [smem:[#allocation32_spill]] %s4189_s2 }
   0x4   :  { %4229 = sst [smem:[#allocation33_spill]] %s4190_s3 }
   0x5   :  { %4230 = sst [smem:[#allocation34_spill]] %s4194_s7 }
   0x6   :  { %4231 = sst [smem:[#allocation35_spill]] %s4200_s13 }
   0x7   :  { %4232 = sst [smem:[#allocation36_spill]] %s4201_s14 }
   0x8   :  { %4233 = sst [smem:[#allocation37_spill]] %s4202_s15 }
   0x9   :  { %4234 = sst [smem:[#allocation38_spill]] %s4203_s16 }
   0xa   :  { %4235 = sst [smem:[#allocation39_spill]] %s4204_s17 }
   0xb   :  { %4236 = sst [smem:[#allocation40_spill]] %s4205_s18 }
   0xc   :  { %4237 = sst [smem:[#allocation41_spill]] %s4206_s19 }
   0xd   :  { %25 = vsyncpa [#allocation5], 0 }
   0xe   :  { %26 = vsyncpa [#allocation8], 0 }
   0xf   :  { %27 = vsyncpa [#allocation11], 0 }
  0x10   :  { %28 = vsyncpa [#allocation6], 0 }
  0x11   :  { %30 = vsyncpa [#allocation6 + $0x1], 0 }
  0x12   :  { %31 = vsyncpa [#allocation14], 0 }
  0x13   :  { %33 = vsyncpa [#allocation14 + $0x1], 0  ;;  %s3572_s0 = smov 0   ;;  %s3574_s30 = smov 0  }
  0x14   :  { %s3576_s20 = smov 0   ;;  %s3578_s21 = smov 0  }
  0x15   :  { %s3580_s1 = smov 0   ;;  %s3582_s22 = smov 0  }
  0x16   :  { %s3584_s2 = smov 0   ;;  %s3586_s23 = smov 0  }
  0x17 LB: > { %4238 = sst [smem:[#allocation20_spill]] %s3415_s0  ;;  %s2780_s24 = sadd.s32 4294967295, %s3443_s23   ;;  %s3443_s23 = sphi %s3586_s23, %s39_s23   ;;  %s3439_s2 = sphi %s3584_s2, %s4281_s2   ;;  %s3435_s22 = sphi %s3582_s22, %s4284_s22   ;;  %s3431_s1 = sphi %s3580_s1, %s4279_s1   ;;  %s3427_s21 = sphi %s3578_s21, %s4278_s21   ;;  %s3423_s20 = sphi %s3576_s20, %s4277_s20   ;;  %s3419_s30 = sphi %s3574_s30, %s4283_s30   ;;  %s3415_s0 = sphi %s3572_s0, %s4282_s0  }
  0x18   : > { %4239 = sst [smem:[#allocation21_spill]] %s3423_s20  ;;  %s2781_s25 = sadd.s32 4294967294, %s3443_s23  }
  0x19   : > { %4240 = sst [smem:[#allocation22_spill]] %s3435_s22  ;;  %s48_s3 = sadd.s32 1, %s3435_s22 }
  0x1a   : > { %4241 = sst [smem:[#allocation23_spill]] %s3439_s2  ;;  %s51_s26 = sadd.s32 1, %s3439_s2 }
  0x1b   : > { %4242 = sst [smem:[#allocation24_spill]] %s3443_s23  ;;  %p49_p0 = scmp.ge.s32.totalorder %s48_s3, 2 }
  0x1c   : > { %s450_s27 = sadd.s32 1, %s3423_s20  ;;  %p460_p1 = scmp.ne.s32.totalorder %s3423_s20, %s3419_s30 }
  0x1d   : > { %p461_p2 = scmp.eq.s32.totalorder %s2780_s24, 3  ;;  %s4286_s3 = smov (%p49_p0, %s48_s3), 0 }
  0x1e   : > { %4243 = sst [smem:[#allocation25_spill]] %s4286_s3  ;;  %s4288_s26 = smov (!%p49_p0, %s51_s26), %s3439_s2 }
  0x1f   : > { %s446_s28 = ssub.s32 %s3435_s22, %s4286_s3  ;;  %p3624_p3 = por %p461_p2, %p460_p1 }
  0x20   : > { %p53_p4 = scmp.ge.s32.totalorder %s4288_s26, 2  ;;  %p466_p5 = scmp.ne.s32.totalorder %s3419_s30, %s3415_s0 }
  0x21   : > { %s4244_s29 = scalar_select %p3624_p3, 1, 0 }
  0x22   : > { %p467_p6 = scmp.eq.s32.totalorder %s2781_s25, 3  ;;  %p2782_p7 = scmp.ge.s32.totalorder %s3443_s23, 1 }
  0x23   : > { %4245 = sst [smem:[#allocation26_spill]] %s4244_s29  ;;  %s4290_s26 = smov (%p53_p4, %s4288_s26), 0 }
  0x24   : > { %4246 = sst [smem:[#allocation27_spill]] %s4290_s26  ;;  %p3633_p8 = por %p467_p6, %p466_p5 }
  0x25   : > { %p502_p9 = scmp.lt.s32.totalorder %s3443_s23, 5  ;;  %s445_s17 = ssub.s32 %s3439_s2, %s4290_s26 }
  0x26   : > { %s4247_s18 = scalar_select %p3633_p8, 1, 0 }
  0x27   : > { %s447_s16 = sor.u32 %s446_s28, %s445_s17  ;;  %p3640_p10 = pnand %p2782_p7, %p502_p9 }
  0x28   : > { %4248 = sst [smem:[#allocation28_spill]] %s4247_s18  ;;  %p448_p11 = scmp.eq.s32.totalorder %s447_s16, 0 }
  0x29   : > { %s4249_s3 = scalar_select %p3640_p10, 1, 0 }
  0x2a   : > { %p3644_p12 = scmp.eq.s32.totalorder %s2780_s24, 0  ;;  %p3032_p13 = pneg %p3640_p10 }
  0x2b   : > { %s3651_s25 = scalar_select %p448_p11, %s3423_s20, %s450_s27  }
  0x2c   : > { %s4250_s22 = scalar_select %p3644_p12, 1, 0 }
  0x2d   : > { %4251 = sst [smem:[#allocation29_spill]] %s3651_s25  ;;  %p3655_p0 = pnand %p3644_p12, %p3032_p13 }
  0x2e   : > { %s3445_s17 = smov [#allocation7]   ;;  %s4253_s7 = sld [smem:[#allocation34_spill]] }
  0x2f   : > { %s540_s28 = sshll.u32 %s3445_s17, 4  ;;  %p3667_p2 = pneg %p3655_p0  ;;  %s541_s28 = int_to_ptr.vmem [resolvable:$true] %s540_s28 }
  0x34   : > { %s3193_s24 = scalar_lea.hbm %s4253_s7, 16 }
  0x35   : > { %p3194_p1 = scmp.ne.s32.totalorder %s4253_s7, %s3193_s24  ;;  %p3200_p6 = scmp.lt.u32.totalorder %s3193_s24, %s4253_s7 }
  0x37   : > { %p3196_p4 = pnand %p3667_p2, %p3194_p1 }
  0x39   : > { %p3197_p5 = pneg %p3196_p4 }
  0x3b   : > { %p3202_p7 = pnand %p3200_p6, %p3197_p5 }
  0x3d   : > { %3205 = shalt.err (!%p3202_p7)
}
  0x3e   : > { %s3206_s26 = scalar_lea.vmem %s541_s28, 16  ;;  %s3213_s0 = scalar_lea.vmem %s541_s28, 32 }
  0x3f   : > { %p3207_p9 = scmp.ne.s32.totalorder %s541_s28, %s3206_s26  ;;  %p3214_p8 = scmp.lt.s32.totalorder %s541_s28, %s541_s28 }
  0x40   : > { %p3215_p3 = scmp.lt.s32.totalorder %s3213_s0, %s3206_s26 }
  0x41   : > { %p3209_p11 = pnand %p3207_p9, %p3667_p2 }
  0x42   : > { %p3216_p12 = por %p3215_p3, %p3214_p8 }
  0x43   : > { %p3210_p13 = pneg %p3209_p11 }
  0x45   : > { %p3217_p10 = pnand %p3216_p12, %p3210_p13 }
  0x47   : > { %3220 = shalt.err (!%p3217_p10)
}
  0x48   : > { %3038 = dma.hbm_to_vmem [thread:$0]  (!%p3655_p0), %s4253_s7, 16, %s541_s28, [#allocation8]  }
  0x49   : > { %s3446_s25 = smov [#allocation4]   ;;  %s3221_s23 = scalar_lea.hbm %s4193_s6, 256 }
  0x4a   : > { %s526_s24 = sshll.u32 %s3446_s25, 4  ;;  %p3222_p3 = scmp.ne.s32.totalorder %s4193_s6, %s3221_s23  ;;  %s527_s24 = int_to_ptr.vmem [resolvable:$true] %s526_s24 }
  0x4b   : > { %p3228_p12 = scmp.lt.u32.totalorder %s3221_s23, %s4193_s6 }
  0x4c   : > { %p3224_p8 = pnand %p3222_p3, %p3667_p2 }
  0x4e   : > { %p3225_p10 = pneg %p3224_p8 }
  0x50   : > { %p3230_p1 = pnand %p3228_p12, %p3225_p10 }
  0x52   : > { %3233 = shalt.err (!%p3230_p1)
}
  0x53   : > { %s3234_s28 = scalar_lea.vmem %s527_s24, 256  ;;  %p3242_p7 = scmp.lt.s32.totalorder %s527_s24, %s527_s24 }
  0x54   : > { %p3235_p4 = scmp.ne.s32.totalorder %s527_s24, %s3234_s28  ;;  %p3243_p9 = scmp.lt.s32.totalorder %s3234_s28, %s3234_s28 }
  0x56   : > { %p3237_p5 = pnand %p3235_p4, %p3667_p2  ;;  %p3244_p11 = por %p3243_p9, %p3242_p7 }
  0x58   : > { %p3238_p6 = pneg %p3237_p5 }
  0x5a   : > { %p3245_p13 = pnand %p3244_p11, %p3238_p6 }
  0x5c   : > { %3248 = shalt.err (!%p3245_p13)
}
  0x5d   : > { %s3447_s19 = smov 64   ;;  %s3448_s20 = smov 4  }
  0x5e   : > { %3035 = dma.hbm_to_vmem [thread:$0]  (!%p3655_p0), %s4193_s6, 256, %s527_s24, [#allocation5], %s3447_s19, %s3447_s19, %s3448_s20  }
  0x5f   : > { %s3449_s2 = smov [#allocation9]   ;;  %s3450_s25 = smov [#allocation10]  }
  0x60   : > { %s550_s16 = sshll.u32 %s3449_s2, 4  ;;  %s564_s17 = sshll.u32 %s3450_s25, 4  ;;  %s551_s16 = int_to_ptr.vmem [resolvable:$true] %s550_s16  ;;  %s565_s17 = int_to_ptr.vmem [resolvable:$true] %s564_s17 }
  0x61   : > { %s3249_s28 = scalar_lea.hbm %s4195_s8, 256 }
  0x62   : > { %p3250_p3 = scmp.ne.s32.totalorder %s4195_s8, %s3249_s28  ;;  %p3256_p12 = scmp.lt.u32.totalorder %s3249_s28, %s4195_s8 }
  0x64   : > { %p3252_p8 = pnand %p3250_p3, %p3667_p2 }
  0x66   : > { %p3253_p10 = pneg %p3252_p8 }
  0x68   : > { %p3258_p1 = pnand %p3256_p12, %p3253_p10 }
  0x6a   : > { %3261 = shalt.err (!%p3258_p1)
}
  0x6b   : > { %s3262_s24 = scalar_lea.vmem %s551_s16, 256  ;;  %p3270_p7 = scmp.lt.s32.totalorder %s551_s16, %s551_s16 }
  0x6c   : > { %p3263_p4 = scmp.ne.s32.totalorder %s551_s16, %s3262_s24  ;;  %p3271_p9 = scmp.lt.s32.totalorder %s3262_s24, %s3262_s24 }
  0x6e   : > { %p3265_p5 = pnand %p3263_p4, %p3667_p2  ;;  %p3272_p11 = por %p3271_p9, %p3270_p7 }
  0x70   : > { %p3266_p6 = pneg %p3265_p5 }
  0x72   : > { %p3273_p13 = pnand %p3272_p11, %p3266_p6 }
  0x74   : > { %3276 = shalt.err (!%p3273_p13)
}
  0x75   : > { %3041 = dma.hbm_to_vmem [thread:$0]  (!%p3655_p0), %s4195_s8, 256, %s551_s16, [#allocation8], %s3447_s19, %s3447_s19, %s3448_s20  }
  0x76   : > { %s3277_s29 = scalar_lea.hbm %s4196_s9, 16 }
  0x77   : > { %p3278_p3 = scmp.ne.s32.totalorder %s4196_s9, %s3277_s29  ;;  %p3284_p12 = scmp.lt.u32.totalorder %s3277_s29, %s4196_s9 }
  0x79   : > { %p3280_p8 = pnand %p3278_p3, %p3667_p2 }
  0x7b   : > { %p3281_p10 = pneg %p3280_p8 }
  0x7d   : > { %p3286_p1 = pnand %p3284_p12, %p3281_p10 }
  0x7f   : > { %3289 = shalt.err (!%p3286_p1)
}
  0x80   : > { %s3290_s0 = scalar_lea.vmem %s565_s17, 16  ;;  %s3297_s19 = scalar_lea.vmem %s565_s17, 32 }
  0x81   : > { %p3291_p4 = scmp.ne.s32.totalorder %s565_s17, %s3290_s0  ;;  %p3298_p7 = scmp.lt.s32.totalorder %s565_s17, %s565_s17 }
  0x82   : > { %p3299_p9 = scmp.lt.s32.totalorder %s3297_s19, %s3290_s0 }
  0x83   : > { %p3293_p5 = pnand %p3291_p4, %p3667_p2 }
  0x84   : > { %p3300_p11 = por %p3299_p9, %p3298_p7 }
  0x85   : > { %p3294_p6 = pneg %p3293_p5 }
  0x87   : > { %p3301_p13 = pnand %p3300_p11, %p3294_p6 }
  0x89   : > { %3304 = shalt.err (!%p3301_p13)
}
  0x8a   : > { %3044 = dma.hbm_to_vmem [thread:$0]  (!%p3655_p0), %s4196_s9, 16, %s565_s17, [#allocation11]  }
  0x8b   : > { %p4255_p3 = scmp.ne.s32.totalorder %s4249_s3, 0 }
  0x8c   : > { %p4256_p8 = scmp.ne.s32.totalorder (!%p4255_p3), %s4250_s22, 0 }
  0x8d   : > { %620 = sbr.rel (%p4255_p3) target bundleno = 2859 (0xb2b), region = 92 }
  0x94   : > { %3394 = dma.done.wait (%p4256_p8), [#allocation5], 256  }
  0x95   : > { %3396 = vsyncadd (%p4256_p8), [#allocation5], 4294967040 }
  0x96   : > { %3398 = dma.done.wait (%p4256_p8), [#allocation8], 272  }
  0x97   : > { %3400 = vsyncadd (%p4256_p8), [#allocation8], 4294967024 }
  0x98   : > { %3402 = dma.done.wait (%p4256_p8), [#allocation11], 16  }
  0x99   : > { %3404 = vsyncadd (%p4256_p8), [#allocation11], 4294967280  ;;  %s3752_s18 = sand.u32 1, %s3419_s30   ;;  %p701_p0 = scmp.lt.s32.totalorder %s3431_s1, 1 }
  0x9a   : > { %s2793_s3 = sshll.u32 %s3752_s18, 3  ;;  %s2794_s27 = sshll.u32 %s3752_s18, 5 }
  0x9b   : > { %s702_s17 = scalar_select %p701_p0, %s3431_s1, 1 }
  0x9c   : > { %p703_p2 = scmp.lt.s32.totalorder %s3427_s21, 1  ;;  %s4257_s13 = sld [smem:[#allocation31_spill]] }
  0x9d   : > { %s2795_s28 = sshll.u32 %s702_s17, 1  ;;  %s2863_s24 = sshll.u32 %s702_s17, 3 }
  0x9e   : > { %s704_s7 = scalar_select %p703_p2, %s3427_s21, 1 }
  0x9f   : > { %s4258_s26 = sld [smem:[#allocation30_spill]]  ;;  %s3768_s19 = scalar_lea.vmem [#allocation12], %s2793_s3 }
  0xa0   : > { %s706_s29 = sadd.s32 %s2795_s28, %s704_s7  ;;  %s3770_s20 = scalar_lea.vmem [#allocation13], %s2794_s27 }
  0xa1   : > { %s2796_s23 = sshll.u32 %s706_s29, 3  ;;  %p2799_p10 = scmp.ne.s32.totalorder %s3427_s21, 0 }
  0xa2   : > { %s713_s14 = scalar_lea.vmem %s4257_s13, %s2863_s24  ;;  %v3150_v0 = vld [vmem:[%s4191_s4] sm:$0xff] (!%p2799_p10)   ;;  %v3451_v1 = vmov (!%p2799_p10), 0.0   ;;  %v3151_v2 = vld [vmem:[%s4191_s4 + $0x8] sm:$0xff] (!%p2799_p10)   ;;  %vm3452_vm0 = vmmov (!%p2799_p10), 0   ;;  %vm750_vm1 = vcmask (!%p2799_p10), 261120   ;;  %s3453_s7 = smov (!%p2799_p10), 112   ;;  %v884_v22 = vlaneseq (!%p2799_p10) }
  0xa3   : > { %719 = sbr.rel (%p2799_p10) target bundleno = 554 (0x22a), region = 112  ;;  %2904 = vmatprep.subr.bf16.mxu0 (!%p2799_p10), %v3451_v1  ;;  %2912 = vmatprep.subr.bf16.mxu1 (!%p2799_p10), %v3451_v1  ;;  %v3152_v3 = vld [vmem:[#allocation4] sm:$0xff] (!%p2799_p10)   ;;  %v3154_v4 = vld [vmem:[#allocation4 + $0x8] sm:$0xff] (!%p2799_p10)   ;;  %s3454_s15 = smov (!%p2799_p10), 120   ;;  %v2805_v14 = vld [vmem:[#allocation7] ss:$0 sm:$0xff] (!%p2799_p10) }
  0xa4   : > { %2905 = vmatpush3.bf16.msra.mxu0 (!%p2799_p10), %v3150_v0  ;;  %2908 = vmatprep.mubr.msk.bf16.mxu0 (!%p2799_p10), %vm3452_vm0, %v3451_v1  ;;  %v3153_v5 = vld [vmem:[%s713_s14] sm:$0xff] (!%p2799_p10)   ;;  %s3455_s22 = smov (!%p2799_p10), 104   ;;  %v3456_v20 = vmov (!%p2799_p10), 1983009808   ;;  %v3457_v23 = vmov (!%p2799_p10), 1934713408  }
  0xa5   : > { %s3766_s0 = scalar_lea.vmem %s4258_s26, %s2796_s23  ;;  %2906 = vmatprep.subr.bf16.mxu0 (!%p2799_p10), %v3451_v1  ;;  %2916 = vmatprep.mubr.msk.bf16.mxu1 (!%p2799_p10), %vm3452_vm0, %v3451_v1  ;;  %v2800_v6 = vld [vmem:[%s4192_s5] ss:$0 sm:$0xff] (!%p2799_p10)  ;;  %v882_v21 = vunpack.c.l.s4 (!%p2799_p10), %v3456_v20  ;;  %v914_v24 = vunpack.c.l.s4 (!%p2799_p10), %v3457_v23  ;;  %v885_v26 = vshrl.u32 (!%p2799_p10), %v884_v22, 7  ;;  %vm1155_vm2 = vcmask (!%p2799_p10), 64512  }
  0xa6   : > { %2913 = vmatpush3.bf16.msra.mxu1 (!%p2799_p10), %v3152_v3 }
  0xa7   : > { %2914 = vmatprep.subr.bf16.mxu1 (!%p2799_p10), %v3451_v1  ;;  %v883_v25 = vunpack.c.0.s8 (!%p2799_p10), %v882_v21  ;;  %v915_v29 = vunpack.c.0.s8 (!%p2799_p10), %v914_v24 }
  0xa8   : > { %2907 = vmatpush3.bf16.msra.mxu0 (!%p2799_p10), %v3151_v2 }
  0xa9   : > { %v3797_v30 = vsub.s32 (!%p2799_p10), %v883_v25, %v885_v26  ;;  %v3799_v37 = vsub.s32 (!%p2799_p10), %v915_v29, %v885_v26 }
  0xaa   : > { %2915 = vmatpush3.bf16.msra.mxu1 %v3154_v4 }
  0xab   : > { %2909 = vmatmul.mubr.msk.bf16.vlgmr.msra.gmra.mrb[0].mxu0 %vm750_vm1, %v3153_v5 }
  0xad   : > { %2917 = vmatmul.mubr.msk.bf16.vlgmr.msra.gmra.mrb[0].mxu1 %vm750_vm1, %v3153_v5 }
 0x17e   : > { %v788_v7 = vpop.f32.mrb[0].mxu0 }
 0x17f   : > { %v789_v8 = vadd.f32 %v2800_v6, %v788_v7  ;;  %v2910_v9 = vpop.f32.mrb[1].mxu0 }
 0x180   : > { %v791_v10 = vpop.f32.mrb[2].mxu0  ;;  %v852_v11 = vpop.f32.mrb[0].mxu1 }
 0x181   : > { %867 = vrot.lane.b32.xlu1 %v789_v8, %s3453_s7  ;;  %861 = vrot.lane.b32.xlu0 %v789_v8, %s3454_s15  ;;  %v2911_v12 = vpop.f32.mrb[3].mxu0  ;;  %v2918_v13 = vpop.f32.mrb[1].mxu1  ;;  %v3782_v16 = vadd.f32 %v2800_v6, %v791_v10  ;;  %v3784_v18 = vadd.f32 %v2805_v14, %v852_v11 }
 0x182   : > { %v855_v15 = vpop.f32.mrb[2].mxu1 }
 0x183   : > { %v2919_v17 = vpop.f32.mrb[3].mxu1  ;;  %v3789_v19 = vadd.f32 %v2805_v14, %v855_v15 }
 0x185   : > { %873 = vrot.lane.b32.xlu0 %v789_v8, %s3455_s22  ;;  %869 = vrot.lane.b32.xlu1 %v3782_v16, %s3453_s7 }
 0x189   : > { %1162 = vrot.lane.b32.xlu0 %v3784_v18, %s3454_s15  ;;  %875 = vrot.lane.b32.xlu1 %v3782_v16, %s3455_s22 }
 0x18d   : > { %1168 = vrot.lane.b32.xlu0 %v3784_v18, %s3453_s7  ;;  %1164 = vrot.lane.b32.xlu1 %v3789_v19, %s3454_s15 }
 0x191   : > { %1170 = vrot.lane.b32.xlu1 %v3789_v19, %s3453_s7  ;;  %863 = vrot.lane.b32.xlu0 %v3782_v16, %s3454_s15 }
 0x195   : > { %1176 = vrot.lane.b32.xlu1 %v3789_v19, %s3455_s22  ;;  %1174 = vrot.lane.b32.xlu0 %v3784_v18, %s3455_s22 }
 0x1f3   : > { %v868_v27 = vpop.permute.xlu1 %867  ;;  %v862_v28 = vpop.permute.xlu0 %861 }
 0x1f4   : > { %v879_v31 = vcombine.low %v789_v8, %v868_v27  ;;  %v880_v32 = vcombine.high %v789_v8, %v868_v27 }
 0x1f6   : > { %v887_v38 = vrot.slane %v879_v31, %v3797_v30  ;;  %v894_v39 = vrot.slane %v880_v32, %v3797_v30 }
 0x1f7   : > { %v874_v33 = vpop.permute.xlu0 %873  ;;  %v870_v34 = vpop.permute.xlu1 %869 }
 0x1f8   : > { %v895_v35 = vcombine.low %v862_v28, %v874_v33  ;;  %v896_v36 = vcombine.high %v862_v28, %v874_v33  ;;  %v947_v58 = vcombine.low %v3782_v16, %v870_v34  ;;  %v948_v59 = vcombine.high %v3782_v16, %v870_v34 }
 0x1fa   : > { %v903_v40 = vrot.slane %v895_v35, %v3797_v30  ;;  %v910_v41 = vrot.slane %v896_v36, %v3797_v30  ;;  %v955_v14 = vrot.slane %v947_v58, %v3797_v30  ;;  %v962_v15 = vrot.slane %v948_v59, %v3797_v30 }
 0x1fb   : > { %v3805_v42 = vpop.permute.xlu0 %1162  ;;  %v876_v43 = vpop.permute.xlu1 %875 }
 0x1fc   : > { %v911_v44 = vcombine.low %v887_v38, %v903_v40  ;;  %v912_v45 = vcombine.high %v887_v38, %v903_v40  ;;  %v927_v46 = vcombine.low %v894_v39, %v910_v41  ;;  %v928_v47 = vcombine.high %v894_v39, %v910_v41 }
 0x1fe   : > { %v919_v48 = vrot.slane %v911_v44, %v3799_v37  ;;  %v926_v49 = vrot.slane %v912_v45, %v3799_v37  ;;  %v935_v50 = vrot.slane %v927_v46, %v3799_v37  ;;  %v942_v51 = vrot.slane %v928_v47, %v3799_v37 }
 0x1ff   : > { %v1169_v52 = vpop.permute.xlu0 %1168  ;;  %v1165_v53 = vpop.permute.xlu1 %1164 }
 0x200   : > { %v1015_v54 = vcombine.low %v919_v48, %v926_v49  ;;  %v2809_v55 = vcombine.high %v919_v48, %v926_v49  ;;  %v1031_v56 = vcombine.low %v935_v50, %v942_v51  ;;  %v2810_v57 = vcombine.high %v935_v50, %v942_v51 }
 0x201   : > { %v1180_v0 = vcombine.low %v3784_v18, %v1169_v52  ;;  %v1181_v1 = vcombine.high %v3784_v18, %v1169_v52 }
 0x202   : > { %v1022_v60 = vrot.slane %v1015_v54, %v3797_v30  ;;  %v1030_v61 = vrot.slane %v2809_v55, %v3797_v30  ;;  %v1038_v62 = vrot.slane %v1031_v56, %v3797_v30  ;;  %v1046_v63 = vrot.slane %v2810_v57, %v3797_v30 }
 0x203   : > { %v1171_v2 = vpop.permute.xlu1 %1170  ;;  %v864_v3 = vpop.permute.xlu0 %863  ;;  %v3830_v16 = vrot.slane %v1180_v0, %v3797_v30  ;;  %v3833_v17 = vrot.slane %v1181_v1, %v3797_v30 }
 0x204   : > { %v1047_v4 = vcombine.low %v1022_v60, %v1030_v61  ;;  %v1048_v5 = vcombine.high %v1022_v60, %v1030_v61  ;;  %v1063_v6 = vcombine.low %v1038_v62, %v1046_v63  ;;  %v1064_v7 = vcombine.high %v1038_v62, %v1046_v63 }
 0x205   : > { %v1248_v8 = vcombine.low %v3789_v19, %v1171_v2  ;;  %v1249_v9 = vcombine.high %v3789_v19, %v1171_v2  ;;  %v963_v10 = vcombine.low %v864_v3, %v876_v43  ;;  %v964_v11 = vcombine.high %v864_v3, %v876_v43 }
 0x206   : > { %v3822_v12 = vrot.slane %v1047_v4, %v3799_v37  ;;  %v3825_v13 = vrot.slane %v1063_v6, %v3799_v37  ;;  %v3838_v21 = vrot.slane %v1048_v5, %v3799_v37  ;;  %v3841_v22 = vrot.slane %v1064_v7, %v3799_v37 }
 0x207   : > { %v971_v18 = vrot.slane %v963_v10, %v3797_v30  ;;  %v978_v19 = vrot.slane %v964_v11, %v3797_v30  ;;  %v1177_v20 = vpop.permute.xlu1 %1176  ;;  %v1256_v23 = vrot.slane %v1248_v8, %v3797_v30  ;;  %v1263_v24 = vrot.slane %v1249_v9, %v3797_v30  ;;  %v1175_v29 = vpop.permute.xlu0 %1174 }
 0x208   : > { %v1079_v31 = vcombine.low %v3822_v12, %v3825_v13  ;;  %v1080_v32 = vcombine.high %v3822_v12, %v3825_v13  ;;  %v1264_v33 = vcombine.low %v1165_v53, %v1177_v20  ;;  %v1265_v34 = vcombine.high %v1165_v53, %v1177_v20 }
 0x209   : > { %v979_v25 = vcombine.low %v955_v14, %v971_v18  ;;  %v980_v26 = vcombine.high %v955_v14, %v971_v18  ;;  %v995_v27 = vcombine.low %v962_v15, %v978_v19  ;;  %v996_v28 = vcombine.high %v962_v15, %v978_v19 }
 0x20a   : > { %v1272_v40 = vrot.slane %v1264_v33, %v3797_v30  ;;  %v1279_v41 = vrot.slane %v1265_v34, %v3797_v30  ;;  %v1196_v43 = vcombine.low %v3805_v42, %v1175_v29  ;;  %v1197_v44 = vcombine.high %v3805_v42, %v1175_v29 }
 0x20b   : > { %v987_v35 = vrot.slane %v979_v25, %v3799_v37  ;;  %v994_v36 = vrot.slane %v980_v26, %v3799_v37  ;;  %v1003_v38 = vrot.slane %v995_v27, %v3799_v37  ;;  %v1010_v39 = vrot.slane %v996_v28, %v3799_v37 }
 0x20c   : > { %v1280_v49 = vcombine.low %v1256_v23, %v1272_v40  ;;  %v1281_v50 = vcombine.high %v1256_v23, %v1272_v40  ;;  %v1296_v51 = vcombine.low %v1263_v24, %v1279_v41  ;;  %v1297_v52 = vcombine.high %v1263_v24, %v1279_v41 }
 0x20d   : > { %v1083_v45 = vcombine.low %v987_v35, %v994_v36  ;;  %v2811_v46 = vcombine.high %v987_v35, %v994_v36  ;;  %v1099_v47 = vcombine.low %v1003_v38, %v1010_v39  ;;  %v2812_v48 = vcombine.high %v1003_v38, %v1010_v39 }
 0x20e   : > { %v1288_v57 = vrot.slane %v1280_v49, %v3799_v37  ;;  %v1295_v42 = vrot.slane %v1281_v50, %v3799_v37  ;;  %v1304_v58 = vrot.slane %v1296_v51, %v3799_v37  ;;  %v1311_v59 = vrot.slane %v1297_v52, %v3799_v37 }
 0x20f   : > { %v1090_v53 = vrot.slane %v1083_v45, %v3797_v30  ;;  %v1098_v54 = vrot.slane %v2811_v46, %v3797_v30  ;;  %v1106_v55 = vrot.slane %v1099_v47, %v3797_v30  ;;  %v1114_v56 = vrot.slane %v2812_v48, %v3797_v30 }
 0x210   : > { %v1384_v0 = vcombine.low %v1288_v57, %v1295_v42  ;;  %v2815_v1 = vcombine.high %v1288_v57, %v1295_v42  ;;  %v1400_v2 = vcombine.low %v1304_v58, %v1311_v59  ;;  %v2816_v3 = vcombine.high %v1304_v58, %v1311_v59 }
 0x211   : > { %v1115_v60 = vcombine.low %v1090_v53, %v1098_v54  ;;  %v1116_v61 = vcombine.high %v1090_v53, %v1098_v54  ;;  %v1131_v62 = vcombine.low %v1106_v55, %v1114_v56  ;;  %v1132_v63 = vcombine.high %v1106_v55, %v1114_v56 }
 0x212   : > { %v1081_v8 = vcombine.low %v3838_v21, %v3841_v22  ;;  %v1082_v9 = vcombine.high %v3838_v21, %v3841_v22  ;;  %v1204_v10 = vrot.slane %v1196_v43, %v3797_v30  ;;  %v1211_v11 = vrot.slane %v1197_v44, %v3797_v30 }
 0x213   : > { %v1123_v4 = vrot.slane %v1115_v60, %v3799_v37  ;;  %v1130_v5 = vrot.slane %v1116_v61, %v3799_v37  ;;  %v1139_v6 = vrot.slane %v1131_v62, %v3799_v37  ;;  %v1146_v7 = vrot.slane %v1132_v63, %v3799_v37 }
 0x214   : > { %v1391_v18 = vrot.slane %v1384_v0, %v3797_v30  ;;  %v1399_v19 = vrot.slane %v2815_v1, %v3797_v30  ;;  %v1407_v20 = vrot.slane %v1400_v2, %v3797_v30  ;;  %v1415_v23 = vrot.slane %v2816_v3, %v3797_v30 }
 0x215   : > { %v1147_v12 = vcombine.low %v1123_v4, %v1139_v6  ;;  %v1148_v13 = vcombine.high %v1123_v4, %v1139_v6  ;;  %v1149_v14 = vcombine.low %v1130_v5, %v1146_v7  ;;  %v1150_v15 = vcombine.high %v1130_v5, %v1146_v7 }
 0x216   : > { %v1212_v22 = vcombine.low %v3830_v16, %v1204_v10  ;;  %v1213_v27 = vcombine.high %v3830_v16, %v1204_v10  ;;  %v1228_v28 = vcombine.low %v3833_v17, %v1211_v11  ;;  %v1229_v29 = vcombine.high %v3833_v17, %v1211_v11 }
 0x217   : > { %v1151_v24 = vpack.c.bf16 %v1147_v12, %v1079_v31  ;;  %v1152_v25 = vpack.c.bf16 %v1148_v13, %v1080_v32  ;;  %v1153_v26 = vpack.c.bf16 %v1149_v14, %v1081_v8  ;;  %v1154_v21 = vpack.c.bf16 %v1150_v15, %v1082_v9 }
 0x218   : > { %v1416_v31 = vcombine.low %v1391_v18, %v1399_v19  ;;  %v1417_v32 = vcombine.high %v1391_v18, %v1399_v19  ;;  %v1432_v33 = vcombine.low %v1407_v20, %v1415_v23  ;;  %v1433_v34 = vcombine.high %v1407_v20, %v1415_v23 }
 0x219   : > { %1156 = vst.msk [vmem:[#allocation2] sm:$0xff] %vm1155_vm2, %v1151_v24  ;;  %1157 = vst.msk [vmem:[#allocation2 + $0x8] sm:$0xff] %vm1155_vm2, %v1152_v25  ;;  %v1220_v35 = vrot.slane %v1212_v22, %v3799_v37  ;;  %v1227_v36 = vrot.slane %v1213_v27, %v3799_v37  ;;  %v1236_v38 = vrot.slane %v1228_v28, %v3799_v37 }
 0x21a   : > { %1158 = vst.msk [vmem:[#allocation2 + $0x10] sm:$0xff] %vm1155_vm2, %v1153_v26  ;;  %1159 = vst.msk [vmem:[#allocation2 + $0x18] sm:$0xff] %vm1155_vm2, %v1154_v21  ;;  %v1243_v39 = vrot.slane %v1229_v29, %v3799_v37  ;;  %v1424_v44 = vrot.slane %v1416_v31, %v3799_v37  ;;  %v1431_v17 = vrot.slane %v1417_v32, %v3799_v37 }
 0x21b   : > { %v1316_v40 = vcombine.low %v1220_v35, %v1227_v36  ;;  %v2813_v41 = vcombine.high %v1220_v35, %v1227_v36  ;;  %v1440_v45 = vrot.slane %v1432_v33, %v3799_v37  ;;  %v1447_v46 = vrot.slane %v1433_v34, %v3799_v37 }
 0x21c   : > { %v1332_v43 = vcombine.low %v1236_v38, %v1243_v39  ;;  %v2814_v16 = vcombine.high %v1236_v38, %v1243_v39 }
 0x21d   : > { %v1323_v47 = vrot.slane %v1316_v40, %v3797_v30  ;;  %v1331_v48 = vrot.slane %v2813_v41, %v3797_v30  ;;  %v1448_v55 = vcombine.low %v1424_v44, %v1440_v45  ;;  %v1449_v56 = vcombine.high %v1424_v44, %v1440_v45 }
 0x21e   : > { %v1339_v49 = vrot.slane %v1332_v43, %v3797_v30  ;;  %v1347_v50 = vrot.slane %v2814_v16, %v3797_v30  ;;  %v1450_v57 = vcombine.low %v1431_v17, %v1447_v46  ;;  %v1451_v42 = vcombine.high %v1431_v17, %v1447_v46 }
 0x21f   : > { %v1348_v51 = vcombine.low %v1323_v47, %v1331_v48  ;;  %v1349_v52 = vcombine.high %v1323_v47, %v1331_v48 }
 0x220   : > { %v1364_v53 = vcombine.low %v1339_v49, %v1347_v50  ;;  %v1365_v54 = vcombine.high %v1339_v49, %v1347_v50 }
 0x221   : > { %v1356_v58 = vrot.slane %v1348_v51, %v3799_v37  ;;  %v1363_v59 = vrot.slane %v1349_v52, %v3799_v37 }
 0x222   : > { %v1372_v60 = vrot.slane %v1364_v53, %v3799_v37  ;;  %v1379_v61 = vrot.slane %v1365_v54, %v3799_v37 }
 0x224   : > { %v1380_v62 = vcombine.low %v1356_v58, %v1372_v60  ;;  %v1381_v63 = vcombine.high %v1356_v58, %v1372_v60  ;;  %v1382_v0 = vcombine.low %v1363_v59, %v1379_v61  ;;  %v1383_v30 = vcombine.high %v1363_v59, %v1379_v61 }
 0x226   : > { %v1452_v1 = vpack.c.bf16 %v1448_v55, %v1380_v62  ;;  %v1453_v2 = vpack.c.bf16 %v1449_v56, %v1381_v63  ;;  %v1454_v3 = vpack.c.bf16 %v1450_v57, %v1382_v0  ;;  %v1455_v4 = vpack.c.bf16 %v1451_v42, %v1383_v30 }
 0x228   : > { %1456 = vst.msk [vmem:[#allocation3] sm:$0xff] %vm1155_vm2, %v1452_v1  ;;  %1457 = vst.msk [vmem:[#allocation3 + $0x8] sm:$0xff] %vm1155_vm2, %v1453_v2 }
 0x229   : > { %1458 = vst.msk [vmem:[#allocation3 + $0x10] sm:$0xff] %vm1155_vm2, %v1454_v3  ;;  %1459 = vst.msk [vmem:[#allocation3 + $0x18] sm:$0xff] %vm1155_vm2, %v1455_v4 }
 0x22a PF: > { %s4259_s29 = sld [smem:[#allocation32_spill]]  ;;  %v3458_v5 = vmov 0.0   ;;  %vm3459_vm3 = vmmov 0   ;;  %v3918_v7 = vld [vmem:[%s3766_s0] sm:$0xff]  ;;  %vm1485_vm4 = vcmask 261120   ;;  %s4260_s0 = sld [smem:[#allocation33_spill]]  ;;  %v1544_v25 = vlaneseq }
 0x22b   : > { %2920 = vmatprep.subr.bf16.mxu0 %v3458_v5  ;;  %2940 = vmatprep.subr.bf16.mxu1 %v3458_v5  ;;  %v1461_v8 = vpack.c.bf16 %v3918_v7, %v3918_v7  ;;  %s3460_s16 = smov 104   ;;  %s3461_s17 = smov 120   ;;  %v1679_v15 = vld [vmem:[#allocation2] sm:$0xff]  ;;  %vm1687_vm5 = vcmask 64512   ;;  %v1681_v18 = vld [vmem:[#allocation2 + $0x10] sm:$0xff]  ;;  %v1680_v1 = vld [vmem:[#allocation2 + $0x8] sm:$0xff] }
 0x22c   : > { %2924 = vmatprep.mubr.msk.bf16.mxu0 %vm3459_vm3, %v3458_v5  ;;  %2942 = vmatprep.mubr.msk.bf16.mxu1 %vm3459_vm3, %v3458_v5  ;;  %v1692_v19 = vsel %vm1687_vm5, %v1679_v15, 0  ;;  %v1784_v20 = vsel %vm1687_vm5, %v1681_v18, 0  ;;  %s3462_s28 = smov 112   ;;  %v3463_v23 = vmov 1983009808   ;;  %v1545_v27 = vshrl.u32 %v1544_v25, 7 }
 0x22d   : > { %2941 = vmatpush3.bf16.xpose.msra.mxu1 %v1784_v20  ;;  %v1542_v24 = vunpack.c.l.s4 %v3463_v23  ;;  %v3464_v26 = vmov 1934713408   ;;  %vm1872_vm6 = vcmask 130048   ;;  %s3465_s24 = smov 16   ;;  %s3466_s3 = smov 8   ;;  %vm2251_vm7 = vcmask 195584  }
 0x22e   : > { %2952 = vmatprep.subr.bf16.mxu1 %v3458_v5  ;;  %v1574_v21 = vunpack.c.l.s4 %v3464_v26  ;;  %s3467_s27 = smov 24   ;;  %s4263_s15 = sld [smem:[#allocation37_spill]] }
 0x22f   : > { %v1543_v22 = vunpack.c.0.s8 %v1542_v24  ;;  %s4264_s22 = sld [smem:[#allocation26_spill]]  ;;  %s2859_s13 = sshll.u32 %s3431_s1, 3 }
 0x230   : > { %v3155_v37 = vld [vmem:[%s4259_s29] sm:$0xff]   ;;  %v3156_v6 = vld [vmem:[%s4259_s29 + $0x8] sm:$0xff]   ;;  %v1575_v31 = vunpack.c.0.s8 %v1574_v21  ;;  %s2609_s14 = sadd.s32 %s3427_s21, %s2859_s13  ;;  %s2612_s2 = sshll.u32 %s3770_s20, 4  ;;  %s4092_s2 = int_to_ptr.vmem [resolvable:$true] %s2612_s2 }
 0x231   : > { %2921 = vmatpush3.bf16.msra.mxu0 %v3155_v37  ;;  %v2817_v9 = vld [vmem:[%s4260_s0] ss:$0 sm:$0xff]  ;;  %v3936_v32 = vsub.s32 %v1543_v22, %v1545_v27  ;;  %v1738_v37 = vsel %vm1687_vm5, %v1680_v1, 0  ;;  %v1685_v1 = vld [vmem:[#allocation3 + $0x10] sm:$0xff]  ;;  %s2860_s23 = sshll.u32 %s2609_s14, 7  ;;  %s4265_s0 = sld [smem:[#allocation41_spill]] }
 0x232   : > { %2922 = vmatprep.subr.bf16.mxu0 %v3458_v5  ;;  %v3938_v39 = vsub.s32 %v1575_v31, %v1545_v27  ;;  %s3468_s7 = smov [#allocation13]  }
 0x235   : > { %2923 = vmatpush3.bf16.msra.mxu0 %v3156_v6  ;;  %p4267_p1 = scmp.ne.s32.totalorder %s4264_s22, 0 }
 0x236   : > { %2928 = vmatprep.subr.bf16.mxu0 %v3458_v5 }
 0x238   : > { %2925 = vmatmul.mubr.msk.bf16.vlgmr.msra.gmra.mrb[0].mxu0 %vm1485_vm4, %v1461_v8 }
 0x239   : > { %2930 = vmatprep.mubr.msk.bf16.mxu0 %vm3459_vm3, %v3458_v5 }
 0x23e   : > { %2929 = vmatpush3.bf16.xpose.msra.mxu0 %v1692_v19 }
 0x23f   : > { %2934 = vmatprep.subr.bf16.mxu0 %v3458_v5 }
 0x30b   : > { %v1523_v10 = vpop.f32.mrb[0].mxu0 }
 0x30c   : > { %v1524_v11 = vadd.f32 %v2817_v9, %v1523_v10  ;;  %v2926_v12 = vpop.f32.mrb[1].mxu0  ;;  %v1682_v9 = vld [vmem:[#allocation2 + $0x18] sm:$0xff] }
 0x30d   : > { %v1526_v13 = vpop.f32.mrb[2].mxu0 }
 0x30e   : > { %1536 = vrot.lane.b32.xlu1 %v1524_v11, %s3460_s16  ;;  %1530 = vrot.lane.b32.xlu0 %v1524_v11, %s3461_s17  ;;  %v2927_v14 = vpop.f32.mrb[3].mxu0  ;;  %s4261_s16 = sld [smem:[#allocation36_spill]]  ;;  %s4266_s17 = smov %s4265_s0 }
 0x312   : > { %1533 = vrot.lane.b32.xlu0 %v1524_v11, %s3462_s28  ;;  %s4090_s28 = scalar_lea.hbm %s4265_s0, %s2860_s23 }
 0x380   : > { %v1537_v28 = vpop.permute.xlu1 %1536  ;;  %v1531_v29 = vpop.permute.xlu0 %1530 }
 0x381   : > { %v1555_v33 = vcombine.low %v1531_v29, %v1537_v28  ;;  %v1556_v34 = vcombine.high %v1531_v29, %v1537_v28 }
 0x383   : > { %v1563_v40 = vrot.slane %v1555_v33, %v3936_v32  ;;  %v1570_v41 = vrot.slane %v1556_v34, %v3936_v32 }
 0x384   : > { %v1534_v35 = vpop.permute.xlu0 %1533 }
 0x385   : > { %v1539_v36 = vcombine.low %v1524_v11, %v1534_v35  ;;  %v1540_v38 = vcombine.high %v1524_v11, %v1534_v35  ;;  %v1830_v11 = vsel %vm1687_vm5, %v1682_v9, 0 }
 0x387   : > { %v1547_v43 = vrot.slane %v1539_v36, %v3936_v32  ;;  %v1554_v16 = vrot.slane %v1540_v38, %v3936_v32 }
 0x389   : > { %v1571_v44 = vcombine.low %v1547_v43, %v1563_v40  ;;  %v1572_v17 = vcombine.high %v1547_v43, %v1563_v40  ;;  %v1587_v45 = vcombine.low %v1554_v16, %v1570_v41  ;;  %v1588_v46 = vcombine.high %v1554_v16, %v1570_v41 }
 0x38b   : > { %v1579_v47 = vrot.slane %v1571_v44, %v3938_v39  ;;  %v1586_v48 = vrot.slane %v1572_v17, %v3938_v39  ;;  %v1595_v49 = vrot.slane %v1587_v45, %v3938_v39  ;;  %v1602_v50 = vrot.slane %v1588_v46, %v3938_v39 }
 0x38d   : > { %v1607_v51 = vcombine.low %v1579_v47, %v1586_v48  ;;  %v2821_v52 = vcombine.high %v1579_v47, %v1586_v48  ;;  %v1623_v53 = vcombine.low %v1595_v49, %v1602_v50  ;;  %v2822_v54 = vcombine.high %v1595_v49, %v1602_v50 }
 0x38f   : > { %v1614_v55 = vrot.slane %v1607_v51, %v3936_v32  ;;  %v1622_v56 = vrot.slane %v2821_v52, %v3936_v32  ;;  %v1630_v57 = vrot.slane %v1623_v53, %v3936_v32  ;;  %v1638_v42 = vrot.slane %v2822_v54, %v3936_v32 }
 0x391   : > { %v1639_v58 = vcombine.low %v1614_v55, %v1622_v56  ;;  %v1655_v59 = vcombine.low %v1630_v57, %v1638_v42  ;;  %v1640_v60 = vcombine.high %v1614_v55, %v1622_v56  ;;  %v1656_v61 = vcombine.high %v1630_v57, %v1638_v42 }
 0x393   : > { %v1647_v62 = vrot.slane %v1639_v58, %v3938_v39  ;;  %v1663_v63 = vrot.slane %v1655_v59, %v3938_v39  ;;  %v1654_v0 = vrot.slane %v1640_v60, %v3938_v39  ;;  %v1670_v30 = vrot.slane %v1656_v61, %v3938_v39  ;;  %v1683_v58 = vld [vmem:[#allocation3] sm:$0xff]  ;;  %v1684_v59 = vld [vmem:[#allocation3 + $0x8] sm:$0xff] }
 0x395   : > { %v1671_v2 = vcombine.low %v1647_v62, %v1663_v63  ;;  %v1673_v3 = vcombine.low %v1654_v0, %v1670_v30  ;;  %v1672_v8 = vcombine.high %v1647_v62, %v1663_v63  ;;  %v1674_v12 = vcombine.high %v1654_v0, %v1670_v30 }
 0x397   : > { %v1675_v4 = vpack.c.bf16 %v1671_v2, %v1671_v2  ;;  %v1677_v6 = vpack.c.bf16 %v1673_v3, %v1673_v3  ;;  %v1676_v10 = vpack.c.bf16 %v1672_v8, %v1672_v8  ;;  %v1678_v13 = vpack.c.bf16 %v1674_v12, %v1674_v12 }
 0x399   : > { %2931 = vmatmul.mubr.msk.bf16.vlgmr.msra.gmra.mrb[4].mxu0 %vm1687_vm5, %v1675_v4  ;;  %2943 = vmatmul.mubr.msk.bf16.vlgmr.msra.gmra.mrb[0].mxu1 %vm1687_vm5, %v1677_v6  ;;  %v1686_v6 = vld [vmem:[#allocation3 + $0x18] sm:$0xff] }
 0x39a   : > { %2935 = vmatpush3.bf16.xpose.msra.mxu0 %v1738_v37  ;;  %2936 = vmatprep.mubr.msk.bf16.mxu0 %vm3459_vm3, %v3458_v5 }
 0x39b   : > { %2946 = vmatprep.subr.bf16.mxu0 %v3458_v5  ;;  %2954 = vmatprep.mubr.msk.bf16.mxu1 %vm3459_vm3, %v3458_v5 }
 0x39c   : > { %2953 = vmatpush3.bf16.msra.mxu1 %v1683_v58 }
 0x39d   : > { %2964 = vmatprep.subr.bf16.mxu1 %v3458_v5 }
 0x3a1   : > { %2937 = vmatmul.mubr.msk.bf16.vlgmr.msra.gmra.mrb[8].mxu0 %vm1687_vm5, %v1676_v10 }
 0x3a2   : > { %2947 = vmatpush3.bf16.xpose.msra.mxu0 %v1830_v11  ;;  %2948 = vmatprep.mubr.msk.bf16.mxu0 %vm3459_vm3, %v3458_v5 }
 0x3a3   : > { %2958 = vmatprep.subr.bf16.mxu0 %v3458_v5 }
 0x3a9   : > { %2949 = vmatmul.mubr.msk.bf16.vlgmr.msra.gmra.mrb[12].mxu0 %vm1687_vm5, %v1678_v13 }
 0x3aa   : > { %2960 = vmatprep.mubr.msk.bf16.mxu0 %vm3459_vm3, %v3458_v5  ;;  %2959 = vmatpush3.bf16.msra.mxu0 %v1684_v59 }
 0x3ab   : > { %2970 = vmatprep.subr.bf16.mxu0 %v3458_v5 }
 0x46c   : > { %v1728_v14 = vpop.f32.mrb[4].mxu0  ;;  %v1820_v15 = vpop.f32.mrb[0].mxu1 }
 0x46d   : > { %v2932_v18 = vpop.f32.mrb[5].mxu0  ;;  %v2944_v19 = vpop.f32.mrb[1].mxu1  ;;  %v1873_v20 = vsel %vm1872_vm6, %v1728_v14, -inf  ;;  %v1879_v31 = vsel %vm1872_vm6, %v1820_v15, -inf }
 0x46e   : > { %v1823_v23 = vpop.f32.mrb[2].mxu1  ;;  %1874 = vmax.xlane.f32.xlu1 %v1873_v20  ;;  %v1731_v24 = vpop.f32.mrb[6].mxu0 }
 0x46f   : > { %v2933_v25 = vpop.f32.mrb[7].mxu0  ;;  %v2945_v26 = vpop.f32.mrb[3].mxu1 }
 0x474   : > { %v1774_v21 = vpop.f32.mrb[8].mxu0 }
 0x475   : > { %v2938_v22 = vpop.f32.mrb[9].mxu0  ;;  %v1876_v27 = vsel %vm1872_vm6, %v1774_v21, -inf }
 0x476   : > { %1877 = vmax.xlane.f32.xlu0 %v1876_v27  ;;  %v1777_v28 = vpop.f32.mrb[10].mxu0 }
 0x477   : > { %v2939_v29 = vpop.f32.mrb[11].mxu0 }
 0x47a   : > { %1880 = vmax.xlane.f32.xlu0 %v1879_v31 }
 0x47c   : > { %v1866_v33 = vpop.f32.mrb[12].mxu0 }
 0x47d   : > { %v2950_v34 = vpop.f32.mrb[13].mxu0  ;;  %v1882_v35 = vsel %vm1872_vm6, %v1866_v33, -inf }
 0x47e   : > { %1883 = vmax.xlane.f32.xlu1 %v1882_v35  ;;  %v1869_v36 = vpop.f32.mrb[14].mxu0 }
 0x47f   : > { %v2951_v38 = vpop.f32.mrb[15].mxu0 }
 0x4fb   : > { %v1875_v40 = vpop.xlane.xlu1 %1874 }
 0x4fc   : > { %v1885_v41 = vsub.f32 %v1728_v14, %v1875_v40  ;;  %v3157_v14 = vld [vmem:[#allocation9] sm:$0xff]  }
 0x4fe   : > { %v1889_v43 = vmul.f32 1.442695, %v1885_v41 }
 0x500   : > { %3169 = vpow2.f32 %v1889_v43 }
 0x503   : > { %v1878_v16 = vpop.xlane.xlu0 %1877 }
 0x504   : > { %v1886_v44 = vsub.f32 %v1774_v21, %v1878_v16 }
 0x506   : > { %v1891_v17 = vmul.f32 1.442695, %v1886_v44 }
 0x507   : > { %v1881_v45 = vpop.xlane.xlu0 %1880 }
 0x508   : > { %3171 = vpow2.f32 %v1891_v17  ;;  %v1887_v46 = vsub.f32 %v1820_v15, %v1881_v45 }
 0x50a   : > { %v3170_v47 = vpop.eup %3169  ;;  %v1893_v48 = vmul.f32 1.442695, %v1887_v46 }
 0x50b   : > { %v1884_v49 = vpop.xlane.xlu1 %1883  ;;  %v1897_v50 = vsel %vm1872_vm6, %v3170_v47, 0.0 }
 0x50c   : > { %3173 = vpow2.f32 %v1893_v48  ;;  %v1888_v51 = vsub.f32 %v1866_v33, %v1884_v49  ;;  %1898 = vadd.xlane.f32.xlu0 %v1897_v50  ;;  %v3158_v48 = vld [vmem:[#allocation9 + $0x8] sm:$0xff]  }
 0x50e   : > { %v1895_v52 = vmul.f32 1.442695, %v1888_v51 }
 0x510   : > { %3175 = vpow2.f32 %v1895_v52 }
 0x512   : > { %v3172_v53 = vpop.eup %3171 }
 0x513   : > { %v1900_v54 = vsel %vm1872_vm6, %v3172_v53, 0.0 }
 0x514   : > { %1901 = vadd.xlane.f32.xlu1 %v1900_v54 }
 0x516   : > { %v3174_v55 = vpop.eup %3173 }
 0x517   : > { %v1903_v56 = vsel %vm1872_vm6, %v3174_v55, 0.0 }
 0x518   : > { %1904 = vadd.xlane.f32.xlu0 %v1903_v56 }
 0x51a   : > { %v3176_v57 = vpop.eup %3175 }
 0x51b   : > { %v1906_v42 = vsel %vm1872_vm6, %v3176_v57, 0.0 }
 0x51c   : > { %1907 = vadd.xlane.f32.xlu1 %v1906_v42 }
 0x599   : > { %v1899_v60 = vpop.xlane.xlu0 %1898 }
 0x59a   : > { %3177 = vrcp.f32 %v1899_v60 }
 0x5a1   : > { %v1902_v61 = vpop.xlane.xlu1 %1901 }
 0x5a2   : > { %3179 = vrcp.f32 %v1902_v61 }
 0x5a4   : > { %v3178_v62 = vpop.eup %3177 }
 0x5a5   : > { %v1917_v63 = vmul.f32 %v3178_v62, %v3170_v47  ;;  %v1905_v0 = vpop.xlane.xlu0 %1904 }
 0x5a6   : > { %3181 = vrcp.f32 %v1905_v0 }
 0x5a7   : > { %1921 = vst.msk [vmem:[%s3770_s20] sm:$0xff] %vm1872_vm6, %v1917_v63  ;;  %v1925_v30 = vpack.c.bf16 %v1917_v63, %v1917_v63 }
 0x5a9   : > { %2955 = vmatmul.mubr.msk.bf16.vlgmr.msra.gmra.mrb[4].mxu1 %vm1872_vm6, %v1925_v30  ;;  %v1908_v2 = vpop.xlane.xlu1 %1907 }
 0x5aa   : > { %3183 = vrcp.f32 %v1908_v2  ;;  %2965 = vmatpush3.bf16.msra.mxu1 %v1685_v1  ;;  %2966 = vmatprep.mubr.msk.bf16.mxu1 %vm3459_vm3, %v3458_v5 }
 0x5ab   : > { %2976 = vmatprep.subr.bf16.mxu1 %v3458_v5 }
 0x5ac   : > { %v3180_v3 = vpop.eup %3179 }
 0x5ad   : > { %v1918_v4 = vmul.f32 %v3180_v3, %v3172_v53 }
 0x5af   : > { %1922 = vst.msk [vmem:[%s3770_s20 + $0x8] sm:$0xff] %vm1872_vm6, %v1918_v4  ;;  %v1926_v37 = vpack.c.bf16 %v1918_v4, %v1918_v4 }
 0x5b0   : > { %v3182_v8 = vpop.eup %3181 }
 0x5b1   : > { %v1919_v9 = vmul.f32 %v3182_v8, %v3174_v55  ;;  %2961 = vmatmul.mubr.msk.bf16.vlgmr.msra.gmra.mrb[16].mxu0 %vm1872_vm6, %v1926_v37 }
 0x5b2   : > { %2971 = vmatpush3.bf16.msra.mxu0 %v1686_v6  ;;  %2972 = vmatprep.mubr.msk.bf16.mxu0 %vm3459_vm3, %v3458_v5 }
 0x5b3   : > { %1923 = vst.msk [vmem:[%s3770_s20 + $0x10] sm:$0xff] %vm1872_vm6, %v1919_v9  ;;  %v1927_v10 = vpack.c.bf16 %v1919_v9, %v1919_v9  ;;  %2984 = vmatprep.subr.bf16.mxu0 %v3458_v5 }
 0x5b4   : > { %v3184_v11 = vpop.eup %3183 }
 0x5b5   : > { %v1920_v12 = vmul.f32 %v3184_v11, %v3176_v57  ;;  %2967 = vmatmul.mubr.msk.bf16.vlgmr.msra.gmra.mrb[8].mxu1 %vm1872_vm6, %v1927_v10 }
 0x5b6   : > { %2980 = vmatprep.mubr.msk.bf16.mxu1 %vm3459_vm3, %v3458_v5  ;;  %2977 = vmatpush3.bf16.msra.mxu1 %v3157_v14 }
 0x5b7   : > { %1924 = vst.msk [vmem:[%s3770_s20 + $0x18] sm:$0xff] %vm1872_vm6, %v1920_v12  ;;  %v1928_v13 = vpack.c.bf16 %v1920_v12, %v1920_v12  ;;  %2978 = vmatprep.subr.bf16.mxu1 %v3458_v5 }
 0x5b9   : > { %2973 = vmatmul.mubr.msk.bf16.vlgmr.msra.gmra.mrb[20].mxu0 %vm1872_vm6, %v1928_v13  ;;  %v2833_v13 = vld [vmem:[#allocation10] ss:$0 sm:$0xff] }
 0x5ba   : > { %2988 = vmatprep.mubr.msk.bf16.mxu0 %vm3459_vm3, %v3458_v5  ;;  %2979 = vmatpush3.bf16.msra.mxu1 %v3158_v48  ;;  %v3164_v48 = vld [vmem:[%s4261_s16 + $0x18] sm:$0xff]  }
 0x5bb   : > { %2992 = vmatprep.subr.bf16.mxu1 %v3458_v5 }
 0x67c   : > { %v1966_v15 = vpop.f32.mrb[4].mxu1 }
 0x67d   : > { %v2956_v18 = vpop.f32.mrb[5].mxu1 }
 0x67e   : > { %v1969_v19 = vpop.f32.mrb[6].mxu1 }
 0x67f   : > { %v2957_v20 = vpop.f32.mrb[7].mxu1 }
 0x684   : > { %v2009_v23 = vpop.f32.mrb[16].mxu0 }
 0x685   : > { %v2962_v24 = vpop.f32.mrb[17].mxu0 }
 0x686   : > { %v2012_v25 = vpop.f32.mrb[18].mxu0 }
 0x687   : > { %v2963_v26 = vpop.f32.mrb[19].mxu0 }
 0x688   : > { %v2052_v21 = vpop.f32.mrb[8].mxu1 }
 0x689   : > { %v2101_v22 = vcombine.low %v1966_v15, %v2052_v21  ;;  %v2102_v27 = vcombine.high %v1966_v15, %v2052_v21  ;;  %v2968_v28 = vpop.f32.mrb[9].mxu1  ;;  %v3159_v21 = vld [vmem:[%s4199_s12] sm:$0xff]  }
 0x68a   : > { %v2055_v29 = vpop.f32.mrb[10].mxu1  ;;  %2985 = vmatpush3.bf16.msra.mxu0 %v3159_v21 }
 0x68b   : > { %v2969_v31 = vpop.f32.mrb[11].mxu1  ;;  %v2109_v40 = vrot.slane %v2101_v22, %v3936_v32  ;;  %v2116_v41 = vrot.slane %v2102_v27, %v3936_v32  ;;  %v3160_v22 = vld [vmem:[%s4199_s12 + $0x8] sm:$0xff]   ;;  %2986 = vmatprep.subr.bf16.mxu0 %v3458_v5 }
 0x68c   : > { %v2095_v33 = vpop.f32.mrb[20].mxu0 }
 0x68d   : > { %v2117_v34 = vcombine.low %v2009_v23, %v2095_v33  ;;  %v2118_v35 = vcombine.high %v2009_v23, %v2095_v33  ;;  %v2974_v36 = vpop.f32.mrb[21].mxu0 }
 0x68e   : > { %v2098_v38 = vpop.f32.mrb[22].mxu0  ;;  %2987 = vmatpush3.bf16.msra.mxu0 %v3160_v22 }
 0x68f   : > { %v2125_v43 = vrot.slane %v2117_v34, %v3936_v32  ;;  %v2132_v16 = vrot.slane %v2118_v35, %v3936_v32  ;;  %v2975_v44 = vpop.f32.mrb[23].mxu0 }
 0x691   : > { %v2133_v17 = vcombine.low %v2109_v40, %v2125_v43  ;;  %v2134_v45 = vcombine.high %v2109_v40, %v2125_v43  ;;  %v2149_v46 = vcombine.low %v2116_v41, %v2132_v16  ;;  %v2150_v47 = vcombine.high %v2116_v41, %v2132_v16  ;;  %v2837_v40 = vld [vmem:[%s4197_s10] ss:$0 sm:$0xff] }
 0x692   : > { %v2838_v43 = vld [vmem:[%s4198_s11] ss:$0 sm:$0xff] }
 0x693   : > { %v2141_v49 = vrot.slane %v2133_v17, %v3938_v39  ;;  %v2148_v50 = vrot.slane %v2134_v45, %v3938_v39  ;;  %v2157_v51 = vrot.slane %v2149_v46, %v3938_v39  ;;  %v2164_v52 = vrot.slane %v2150_v47, %v3938_v39  ;;  %v3161_v45 = vld [vmem:[%s4261_s16] sm:$0xff]   ;;  %v3162_v46 = vld [vmem:[%s4261_s16 + $0x8] sm:$0xff]   ;;  %v3163_v47 = vld [vmem:[%s4261_s16 + $0x10] sm:$0xff]  }
 0x695   : > { %v2169_v53 = vcombine.low %v2141_v49, %v2148_v50  ;;  %v2831_v54 = vcombine.high %v2141_v49, %v2148_v50  ;;  %v2185_v55 = vcombine.low %v2157_v51, %v2164_v52  ;;  %v2832_v56 = vcombine.high %v2157_v51, %v2164_v52  ;;  %v3165_v49 = vld [vmem:[%s4261_s16 + $0x20] sm:$0xff]   ;;  %v3166_v50 = vld [vmem:[%s4261_s16 + $0x28] sm:$0xff]   ;;  %v3167_v51 = vld [vmem:[%s4261_s16 + $0x30] sm:$0xff]  }
 0x696   : > { %v3168_v52 = vld [vmem:[%s4261_s16 + $0x38] sm:$0xff]  }
 0x697   : > { %v2176_v57 = vrot.slane %v2169_v53, %v3936_v32  ;;  %v2184_v42 = vrot.slane %v2831_v54, %v3936_v32  ;;  %v2192_v58 = vrot.slane %v2185_v55, %v3936_v32  ;;  %v2200_v59 = vrot.slane %v2832_v56, %v3936_v32 }
 0x699   : > { %v2202_v60 = vcombine.high %v2176_v57, %v2184_v42  ;;  %v2218_v61 = vcombine.high %v2192_v58, %v2200_v59  ;;  %v2201_v62 = vcombine.low %v2176_v57, %v2184_v42  ;;  %v2217_v63 = vcombine.low %v2192_v58, %v2200_v59 }
 0x69b   : > { %v2216_v0 = vrot.slane %v2202_v60, %v3938_v39  ;;  %v2232_v30 = vrot.slane %v2218_v61, %v3938_v39  ;;  %v2209_v1 = vrot.slane %v2201_v62, %v3938_v39  ;;  %v2225_v2 = vrot.slane %v2217_v63, %v3938_v39 }
 0x69d   : > { %v2235_v3 = vcombine.low %v2216_v0, %v2232_v30  ;;  %v2234_v4 = vcombine.high %v2209_v1, %v2225_v2  ;;  %v2236_v37 = vcombine.high %v2216_v0, %v2232_v30  ;;  %v2233_v6 = vcombine.low %v2209_v1, %v2225_v2  ;;  %v2844_v1 = vld [vmem:[%s4263_s15] ss:$0 sm:$0xff]  ;;  %s3309_s15 = sshll.u32 %s3468_s7, 4  ;;  %s3310_s15 = int_to_ptr.vmem [resolvable:$false] %s3309_s15 }
 0x69e   : > { %s3311_s20 = scalar_lea.vmem %s3310_s15, 1024  ;;  %p3312_p6 = scmp.lt.s32.totalorder %s4092_s2, %s3310_s15 }
 0x69f   : > { %2242 = vrot.lane.b32.xlu1 %v2235_v3, %s3465_s24  ;;  %2238 = vrot.lane.b32.xlu0 %v2234_v4, %s3466_s3  ;;  %s4262_s24 = sld [smem:[#allocation35_spill]] }
 0x6a3   : > { %2246 = vrot.lane.b32.xlu1 %v2236_v37, %s3467_s27  ;;  %s3305_s27 = scalar_lea.vmem %s4092_s2, 512 }
 0x6a4   : > { %p3306_p12 = scmp.ne.s32.totalorder %s4092_s2, %s3305_s27  ;;  %p3313_p7 = scmp.lt.s32.totalorder %s3311_s20, %s3305_s27 }
 0x6a5   : > { %v2839_v53 = vld [vmem:[%s4262_s24] ss:$0 sm:$0xff]  ;;  %s2583_s24 = scalar_lea.sflag [#allocation14], %s3752_s18 }
 0x6a6   : > { %p3307_p4 = pnand %p3306_p12, %p4267_p1  ;;  %p3314_p9 = por %p3313_p7, %p3312_p6 }
 0x6a8   : > { %p3308_p5 = pneg %p3307_p4 }
 0x6aa   : > { %p3315_p11 = pnand %p3314_p9, %p3308_p5 }
 0x711   : > { %v2243_v32 = vpop.permute.xlu1 %2242  ;;  %v2239_v8 = vpop.permute.xlu0 %2238 }
 0x712   : > { %v2249_v9 = vsel %vm1687_vm5, %v2233_v6, %v2239_v8 }
 0x713   : > { %v2250_v11 = vsel %vm1872_vm6, %v2249_v9, %v2243_v32 }
 0x715   : > { %v2247_v10 = vpop.permute.xlu1 %2246 }
 0x716   : > { %v2252_v39 = vsel %vm2251_vm7, %v2250_v11, %v2247_v10 }
 0x717   : > { %v2253_v12 = vpack.c.bf16 %v2252_v39, %v2252_v39 }
 0x719   : > { %2981 = vmatmul.mubr.msk.bf16.vlgmr.msra.gmra.mrb[12].mxu1 %vm1485_vm4, %v2253_v12 }
 0x71a   : > { %3008 = vmatprep.mubr.msk.bf16.mxu1 %vm3459_vm3, %v3458_v5  ;;  %2993 = vmatpush3.bf16.msra.mxu1 %v3161_v45 }
 0x71b   : > { %2994 = vmatprep.subr.bf16.mxu1 %v3458_v5 }
 0x71e   : > { %2995 = vmatpush3.bf16.msra.mxu1 %v3162_v46 }
 0x71f   : > { %2996 = vmatprep.subr.bf16.mxu1 %v3458_v5 }
 0x722   : > { %2997 = vmatpush3.bf16.msra.mxu1 %v3163_v47 }
 0x723   : > { %2998 = vmatprep.subr.bf16.mxu1 %v3458_v5 }
 0x726   : > { %2999 = vmatpush3.bf16.msra.mxu1 %v3164_v48 }
 0x727   : > { %3000 = vmatprep.subr.bf16.mxu1 %v3458_v5 }
 0x72a   : > { %3001 = vmatpush3.bf16.msra.mxu1 %v3165_v49 }
 0x72b   : > { %3002 = vmatprep.subr.bf16.mxu1 %v3458_v5 }
 0x72e   : > { %3003 = vmatpush3.bf16.msra.mxu1 %v3166_v50 }
 0x72f   : > { %3004 = vmatprep.subr.bf16.mxu1 %v3458_v5 }
 0x732   : > { %3005 = vmatpush3.bf16.msra.mxu1 %v3167_v51 }
 0x733   : > { %3006 = vmatprep.subr.bf16.mxu1 %v3458_v5 }
 0x736   : > { %3007 = vmatpush3.bf16.msra.mxu1 %v3168_v52 }
 0x7ec   : > { %v2314_v14 = vpop.f32.mrb[12].mxu1 }
 0x7ed   : > { %v2315_v15 = vadd.f32 %v2833_v13, %v2314_v14  ;;  %v2982_v18 = vpop.f32.mrb[13].mxu1 }
 0x7ee   : > { %v2317_v19 = vpop.f32.mrb[14].mxu1 }
 0x7ef   : > { %v2320_v20 = vadd.f32 %v2315_v15, %v3918_v7  ;;  %v2983_v23 = vpop.f32.mrb[15].mxu1 }
 0x7f1   : > { %v2323_v24 = vsel %vm1485_vm4, %v2320_v20, 0.0  ;;  %v2328_v25 = vmul.f32 %v2320_v20, %v2320_v20 }
 0x7f2   : > { %2324 = vadd.xlane.f32.xlu0 %v2323_v24 }
 0x7f3   : > { %v2329_v26 = vsel %vm1485_vm4, %v2328_v25, 0.0 }
 0x7f4   : > { %2330 = vadd.xlane.f32.xlu1 %v2329_v26 }
 0x87f   : > { %v2325_v7 = vpop.xlane.xlu0 %2324 }
 0x880   : > { %v2327_v27 = vmul.f32 0.03125, %v2325_v7 }
 0x881   : > { %v2331_v28 = vpop.xlane.xlu1 %2330 }
 0x882   : > { %v2333_v29 = vmul.f32 %v2327_v27, %v2327_v27  ;;  %v2332_v31 = vmul.f32 0.03125, %v2331_v28  ;;  %v2336_v36 = vsub.f32 %v2320_v20, %v2327_v27 }
 0x884   : > { %v2334_v33 = vsub.f32 %v2332_v31, %v2333_v29 }
 0x886   : > { %v2335_v34 = vmax.f32 %v2334_v33, 0.0 }
 0x888   : > { %v2337_v35 = vadd.f32 1e-05, %v2335_v34 }
 0x88a   : > { %3185 = vrsqrt.f32 %v2337_v35 }
 0x894   : > { %v3186_v38 = vpop.eup %3185 }
 0x895   : > { %v2339_v41 = vmul.f32 %v3186_v38, %v2336_v36 }
 0x897   : > { %v2346_v16 = vmul.f32 %v2837_v40, %v2339_v41 }
 0x899   : > { %v2353_v44 = vadd.f32 %v2838_v43, %v2346_v16 }
 0x89b   : > { %v2354_v17 = vpack.c.bf16 %v2353_v44, %v2353_v44 }
 0x89d   : > { %2989 = vmatmul.mubr.msk.bf16.vlgmr.msra.gmra.mrb[24].mxu0 %vm1485_vm4, %v2354_v17 }
 0x970   : > { %v2415_v54 = vpop.f32.mrb[24].mxu0 }
 0x971   : > { %v2416_v55 = vadd.f32 %v2839_v53, %v2415_v54  ;;  %v2990_v56 = vpop.f32.mrb[25].mxu0 }
 0x972   : > { %v2418_v57 = vpop.f32.mrb[26].mxu0 }
 0x973   : > { %v2421_v42 = vpack.c.bf16 %v2416_v55, %v2416_v55  ;;  %v2991_v58 = vpop.f32.mrb[27].mxu0 }
 0x975   : > { %v2843_v59 = vmul.bf16 3216621497, %v2421_v42 }
 0x977   : > { %3187 = vpow.bf16 %v2843_v59 }
 0x982   : > { %v3188_v60 = vpop.eup %3187 }
 0x983   : > { %v2426_v61 = vadd.bf16 1065369472, %v3188_v60 }
 0x985   : > { %3189 = vrcp.bf16 %v2426_v61 }
 0x990   : > { %v3190_v5 = vpop.eup %3189 }
 0x991   : > { %v2428_v62 = vmul.bf16 1065369472, %v3190_v5 }
 0x993   : > { %v2429_v63 = vunpack.c.l.bf16 %v2428_v62 }
 0x995   : > { %v2430_v0 = vmul.f32 %v2429_v63, %v2416_v55 }
 0x997   : > { %v2431_v30 = vpack.c.bf16 %v2430_v0, %v2430_v0 }
 0x999   : > { %3009 = vmatmul.mubr.bf16.vlgmr.msra.gmra.mrb[16].mxu1 %v2431_v30 }
 0xa6c   : > { %v2537_v2 = vpop.f32.mrb[16].mxu1 }
 0xa6d   : > { %v2538_v3 = vadd.f32 %v2844_v1, %v2537_v2  ;;  %v3010_v4 = vpop.f32.mrb[17].mxu1 }
 0xa6e   : > { %v2540_v37 = vpop.f32.mrb[18].mxu1 }
 0xa6f   : > { %v2543_v6 = vadd.f32 %v2538_v3, %v2353_v44  ;;  %v3011_v32 = vpop.f32.mrb[19].mxu1 }
 0xa71   : > { %v2546_v8 = vsel %vm1485_vm4, %v2543_v6, 0.0  ;;  %v2550_v9 = vmul.f32 %v2543_v6, %v2543_v6 }
 0xa72   : > { %2547 = vadd.xlane.f32.xlu0 %v2546_v8 }
 0xa73   : > { %v2551_v10 = vsel %vm1485_vm4, %v2550_v9, 0.0 }
 0xa76   : > { %2552 = vadd.xlane.f32.xlu0 %v2551_v10 }
 0xa77   : > { %3318 = shalt.err (!%p3315_p11)
}
 0xa78   : > { %s3319_s13 = scalar_lea.hbm %s4090_s28, 512  ;;  %s3323_s25 = scalar_lea.hbm %s4266_s17, 2048 }
 0xa79   : > { %p3320_p13 = scmp.ne.s32.totalorder %s4090_s28, %s3319_s13  ;;  %p3324_p0 = scmp.lt.u32.totalorder %s4090_s28, %s4266_s17 }
 0xa7a   : > { %p3325_p2 = scmp.lt.u32.totalorder %s3323_s25, %s3319_s13  ;;  %p3327_p12 = scmp.lt.u32.totalorder %s3319_s13, %s4090_s28 }
 0xa7b   : > { %p3321_p3 = pnand %p3320_p13, %p4267_p1 }
 0xa7c   : > { %p3326_p10 = por %p3325_p2, %p3324_p0 }
 0xa7d   : > { %p3322_p8 = pneg %p3321_p3 }
 0xa7e   : > { %p3328_p4 = por %p3327_p12, %p3326_p10 }
 0xa80   : > { %p3329_p5 = pnand %p3328_p4, %p3322_p8 }
 0xa82   : > { %3332 = shalt.err (!%p3329_p5)
}
 0xa83   : > { %s3469_s27 = smov 128   ;;  %s3470_s7 = smov 256  }
 0xa84   : > { %3029 = dma.vmem_to_hbm [thread:$0]  (%p4267_p1), %s4092_s2, 512, %s4090_s28, %s2583_s24, %s3469_s27, %s3470_s7, %s3466_s3  }
 0xa85   : > { %s2857_s15 = sshll.u32 %s3431_s1, 1  ;;  %s4268_s3 = sld [smem:[#allocation38_spill]] }
 0xa86   : > { %s2594_s20 = sadd.s32 %s3427_s21, %s2857_s15  ;;  %s4269_s24 = sld [smem:[#allocation39_spill]] }
 0xa87   : > { %s2858_s23 = sshll.u32 %s2594_s20, 7  ;;  %s2598_s25 = sshll.u32 %s3768_s19, 4  ;;  %s4133_s25 = int_to_ptr.vmem [resolvable:$true] %s2598_s25 }
 0xa88   : > { %s4270_s1 = sld [smem:[#allocation40_spill]]  ;;  %s2578_s21 = scalar_lea.sflag [#allocation6], %s3752_s18 }
 0xa89   : > { %s3333_s15 = scalar_lea.vmem %s4133_s25, 128  ;;  %s3471_s20 = smov [#allocation12]  }
 0xa8a   : > { %p3334_p6 = scmp.ne.s32.totalorder %s4133_s25, %s3333_s15  ;;  %s3337_s13 = sshll.u32 %s3471_s20, 4  ;;  %s3338_s13 = int_to_ptr.vmem [resolvable:$false] %s3337_s13 }
 0xa8b   : > { %v2853_v24 = vld [vmem:[%s4268_s3] ss:$0 sm:$0xff]  ;;  %s3339_s14 = scalar_lea.vmem %s3338_s13, 256  ;;  %p3340_p11 = scmp.lt.s32.totalorder %s4133_s25, %s3338_s13 }
 0xa8c   : > { %v2854_v26 = vld [vmem:[%s4269_s24] ss:$0 sm:$0xff]  ;;  %p3335_p7 = pnand %p3334_p6, %p4267_p1  ;;  %p3341_p13 = scmp.lt.s32.totalorder %s3339_s14, %s3333_s15 }
 0xa8e   : > { %s4271_s27 = smov %s4270_s1  ;;  %s4131_s7 = scalar_lea.hbm %s4270_s1, %s2858_s23 }
 0xa8f   : > { %p3336_p9 = pneg %p3335_p7  ;;  %p3342_p3 = por %p3341_p13, %p3340_p11 }
 0xa91   : > { %p3343_p8 = pnand %p3342_p3, %p3336_p9 }
 0xaff   : > { %v2548_v11 = vpop.xlane.xlu0 %2547 }
 0xb00   : > { %v2549_v39 = vmul.f32 0.03125, %v2548_v11 }
 0xb02   : > { %v2555_v13 = vmul.f32 %v2549_v39, %v2549_v39  ;;  %v2558_v20 = vsub.f32 %v2543_v6, %v2549_v39 }
 0xb03   : > { %v2553_v12 = vpop.xlane.xlu0 %2552 }
 0xb04   : > { %v2554_v14 = vmul.f32 0.03125, %v2553_v12 }
 0xb06   : > { %v2556_v15 = vsub.f32 %v2554_v14, %v2555_v13 }
 0xb08   : > { %v2557_v18 = vmax.f32 %v2556_v15, 0.0 }
 0xb0a   : > { %v2559_v19 = vadd.f32 1e-05, %v2557_v18 }
 0xb0c   : > { %3191 = vrsqrt.f32 %v2559_v19 }
 0xb16   : > { %v3192_v23 = vpop.eup %3191 }
 0xb17   : > { %v2561_v25 = vmul.f32 %v3192_v23, %v2558_v20 }
 0xb19   : > { %v2568_v21 = vmul.f32 %v2853_v24, %v2561_v25 }
 0xb1b   : > { %v2575_v22 = vadd.f32 %v2854_v26, %v2568_v21 }
 0xb1d   : > { %2576 = vst.msk [vmem:[%s3768_s19] sm:$0xff] %vm1485_vm4, %v2575_v22 }
 0xb1e   : > { %3346 = shalt.err (!%p3343_p8)
}
 0xb1f   : > { %s3347_s18 = scalar_lea.hbm %s4131_s7, 128  ;;  %s3351_s2 = scalar_lea.hbm %s4271_s27, 512 }
 0xb20   : > { %p3348_p0 = scmp.ne.s32.totalorder %s4131_s7, %s3347_s18  ;;  %p3352_p12 = scmp.lt.u32.totalorder %s4131_s7, %s4271_s27 }
 0xb21   : > { %p3353_p4 = scmp.lt.u32.totalorder %s3351_s2, %s3347_s18  ;;  %p3355_p6 = scmp.lt.u32.totalorder %s3347_s18, %s4131_s7 }
 0xb22   : > { %p3349_p2 = pnand %p3348_p0, %p4267_p1 }
 0xb23   : > { %p3354_p5 = por %p3353_p4, %p3352_p12 }
 0xb24   : > { %p3350_p10 = pneg %p3349_p2 }
 0xb25   : > { %p3356_p7 = por %p3355_p6, %p3354_p5 }
 0xb27   : > { %p3357_p9 = pnand %p3356_p7, %p3350_p10 }
 0xb29   : > { %3360 = shalt.err (!%p3357_p9)
}
 0xb2a   : > { %3028 = dma.vmem_to_hbm [thread:$0]  (%p4267_p1), %s4133_s25, 128, %s4131_s7, %s2578_s21  }
 0xb2b PF: > { %s4272_s23 = sld [smem:[#allocation24_spill]]  ;;  %s4273_s26 = sld [smem:[#allocation20_spill]] }
 0xb2c   : > { %s4274_s0 = sld [smem:[#allocation28_spill]] }
 0xb31   : > { %p3060_p11 = scmp.ge.s32.totalorder %s4272_s23, 2  ;;  %s2627_s1 = sand.u32 1, %s4273_s26  }
 0xb32   : > { %p4275_p13 = scmp.ne.s32.totalorder %s4274_s0, 0  ;;  %s2628_s15 = scalar_lea.sflag [#allocation6], %s2627_s1 }
 0xb34   : > { %p3046_p3 = pnand %p3060_p11, %p4275_p13 }
 0xb36   : > { %3406 = dma.done.wait (!%p3046_p3), %s2628_s15, 128  }
 0xb37   : > { %3408 = vsyncadd (!%p3046_p3), %s2628_s15, 4294967168  ;;  %s2637_s20 = scalar_lea.sflag [#allocation14], %s2627_s1 }
 0xb38   : > { %3410 = dma.done.wait (!%p3046_p3), %s2637_s20, 512  }
 0xb39   : > { %3412 = vsyncadd (!%p3046_p3), %s2637_s20, 4294966784  ;;  %s39_s23 = sadd.s32 1, %s4272_s23   ;;  %s4276_s22 = sld [smem:[#allocation21_spill]] }
 0xb3a   : > { %p36_p8 = scmp.ge.s32.totalorder %s39_s23, 6   ;;  %s4277_s20 = sld [smem:[#allocation29_spill]] }
 0xb3b   : > { %s4278_s21 = sld [smem:[#allocation22_spill]]  ;;  %s4279_s1 = sld [smem:[#allocation23_spill]] }
 0xb3c   : > { %s4280_s25 = sld [smem:[#allocation25_spill]]  ;;  %s4281_s2 = sld [smem:[#allocation27_spill]] }
 0xb3d   : > { %s4282_s0 = smov %s3419_s30  ;;  %38 = sbr.rel (!%p36_p8) target bundleno = 23 (0x17), region = 168 }
 0xb3f   : > { %s4283_s30 = smov %s4276_s22 }
 0xb42   : > { %s4284_s22 = smov %s4280_s25 }
 0xb44   :  { %2642 = vsyncpa [#allocation5], 1 }
 0xb45   :  { %2644 = vsyncpa [#allocation5 + $0x1], 1 }
 0xb46   :  { %2645 = vsyncpa [#allocation8], 1 }
 0xb47   :  { %2646 = vsyncpa [#allocation11], 1 }
 0xb48   :  { %2647 = vsyncpa [#allocation6], 1 }
 0xb49   :  { %2649 = vsyncpa [#allocation6 + $0x1], 1 }
 0xb4a   :  { %2650 = vsyncpa [#allocation14], 1 }
 0xb4b   :  { %2652 = vsyncpa [#allocation14 + $0x1], 1 }

</bundles_post_ra>
